<compile_context>
chip_gen: v7x
topology: tpu7x:2x2x1
jax: 0.10.0
libtpu: 0.0.40
codegen_flags: <defaults>
</compile_context>

<pallas_src>
import functools

import jax
import jax.numpy as jnp
from jax.experimental import pallas as pl
from jax.experimental.pallas import tpu as pltpu


def _stsgcl_kernel(n_vertices, num_layers, batch, win_per_step, mxu_dtype,
                   data_ref, emb_ref, adj_ref, *refs):
    """One grid step = `win_per_step` sliding windows, all batches.

    data_ref: (B, T, N, C) resident block (fetched from HBM once for the whole call)
    emb_ref:  (T, N, C) combined temporal+spatial position embedding (resident)
    adj_ref:  (3N, 3N) localized spatio-temporal adjacency, mxu_dtype (resident)
    refs:     [Wv0, Wg0, bv0, bg0, Wv1, ...] per-layer, blocked per window group, then o_ref
    """
    o_ref = refs[-1]
    params = refs[:-1]
    N = n_vertices
    B = batch
    V = 3 * N

    adj = adj_ref[...]                                   # (3N, 3N) mxu_dtype, hoisted
    g = pl.program_id(0)

    for w in range(win_per_step):                        # static unroll over windows in this block
        t0 = g * win_per_step + w                        # first time slice of window (dynamic)

        # Build the window with batch folded into the lane dim: H (3N, B*C).
        # Fused position-embedding add; time-major vertex stacking matches the PyTorch
        # reshape(-1, 3N, C).  Only sublane-aligned concats / static slices are used.
        cols = []
        for b in range(B):
            xb = data_ref[b, pl.ds(t0, 3)] + emb_ref[pl.ds(t0, 3)]      # (3, N, C) f32
            colb = jnp.concatenate([xb[0], xb[1], xb[2]], axis=0)       # (3N, C) f32
            cols.append(colb)
        h_lane = jnp.concatenate(cols, axis=1).astype(mxu_dtype)        # (3N, B*C)

        acc = [None] * B                                 # per-batch running max over GCN layers
        for l in range(num_layers):
            wv_ref, wg_ref, bv_ref, bg_ref = params[4 * l:4 * l + 4]
            c_in = wv_ref.shape[1]

            # Graph aggregation: one plain 2-D MXU matmul, K = 3N, f32 accumulate.
            agg = jnp.dot(adj, h_lane, preferred_element_type=jnp.float32)   # (3N, B*c_in) f32

            # Refold batch into rows for the weight-stationary GLU linears.
            agg_rows = jnp.concatenate(
                [agg[:, b * c_in:(b + 1) * c_in] for b in range(B)], axis=0
            ).astype(mxu_dtype)                                              # (B*3N, c_in)

            zv = jnp.dot(agg_rows, wv_ref[w],
                         preferred_element_type=jnp.float32) + bv_ref[w]     # (B*3N, F) f32
            zg = jnp.dot(agg_rows, wg_ref[w],
                         preferred_element_type=jnp.float32) + bg_ref[w]
            h_rows = zv * jax.nn.sigmoid(zg)                                 # GLU, f32

            # Layer max on the middle-time vertices, per batch — taken before the next
            # layer's inputs are built (keeps live set small).
            for b in range(B):
                mid = h_rows[b * V + N: b * V + 2 * N]                       # (N, F)
                acc[b] = mid if acc[b] is None else jnp.maximum(acc[b], mid)

            if l + 1 < num_layers:
                hm = h_rows.astype(mxu_dtype)
                # back to lane-folded batch for the next aggregation; no 3-way split.
                h_lane = jnp.concatenate(
                    [hm[b * V:(b + 1) * V] for b in range(B)], axis=1)        # (3N, B*F)

        for b in range(B):
            o_ref[b, w] = acc[b].astype(o_ref.dtype)


@functools.partial(jax.jit, static_argnames=("mxu_dtype", "windows_per_step"))
def stsgcl_forward(data, adj, temporal_emb, spatial_emb, w_stacks, b_stacks,
                   mxu_dtype=jnp.bfloat16, windows_per_step=None):
    """data: (B,T,N,C), adj: (3N,3N), w_stacks[l]: (T-2, C_in_l, 2F), b_stacks[l]: (T-2, 2F)."""
    B, T, N, C = data.shape
    Tm2 = T - 2
    num_layers = len(w_stacks)
    F = w_stacks[-1].shape[-1] // 2

    if windows_per_step is None:
        # two fat grid steps when possible; otherwise one (fewer steps = less per-step
        # overhead on single-TC v5e/v6e, bigger matmuls per step).
        windows_per_step = Tm2 // 2 if (Tm2 % 2 == 0 and Tm2 >= 2) else Tm2
    W = windows_per_step
    assert Tm2 % W == 0, "windows_per_step must divide T-2"
    G = Tm2 // W

    # Tiny parameter-sized prep only — no extra HBM pass over the data tensor.
    emb = (temporal_emb + spatial_emb).reshape(T, N, C)        # (T, N, C) f32
    adj_m = adj.astype(mxu_dtype)                              # full (3N, 3N), no pre-split

    in_specs = [
        # whole data tensor, constant index map -> DMA'd from HBM exactly once, resident
        pl.BlockSpec((B, T, N, C), lambda g: (0, 0, 0, 0)),
        pl.BlockSpec((T, N, C), lambda g: (0, 0, 0)),
        pl.BlockSpec((3 * N, 3 * N), lambda g: (0, 0)),
    ]
    args = [data, emb, adj_m]

    for l in range(num_layers):
        fl = w_stacks[l].shape[-1] // 2
        c_in = w_stacks[l].shape[1]
        wv = w_stacks[l][:, :, :fl].astype(mxu_dtype)          # (T-2, C_in, F) value half
        wg = w_stacks[l][:, :, fl:].astype(mxu_dtype)          # (T-2, C_in, F) gate half
        bv = b_stacks[l][:, :fl].reshape(Tm2, 1, fl)           # (T-2, 1, F) f32
        bg = b_stacks[l][:, fl:].reshape(Tm2, 1, fl)
        in_specs += [
            pl.BlockSpec((W, c_in, fl), lambda g: (g, 0, 0)),
            pl.BlockSpec((W, c_in, fl), lambda g: (g, 0, 0)),
            pl.BlockSpec((W, 1, fl), lambda g: (g, 0, 0)),
            pl.BlockSpec((W, 1, fl), lambda g: (g, 0, 0)),
        ]
        args += [wv, wg, bv, bg]

    kernel = functools.partial(_stsgcl_kernel, N, num_layers, B, W, mxu_dtype)
    out = pl.pallas_call(
        kernel,
        out_shape=jax.ShapeDtypeStruct((B, Tm2, N, F), jnp.float32),
        grid=(G,),
        in_specs=in_specs,
        out_specs=pl.BlockSpec((B, W, N, F), lambda g: (0, g, 0, 0)),
        compiler_params=pltpu.CompilerParams(
            dimension_semantics=("parallel",)),
    )(*args)
    return out


def stsgcl_reference(data, adj, temporal_emb, spatial_emb, w_stacks, b_stacks,
                     mxu_dtype=jnp.float32):
    """Pure-JAX mirror of STSGCNLayerIndividual.forward (GLU).  mxu_dtype mirrors the
    kernel's MXU-operand cast; jnp.float32 == exact PyTorch f32 semantics."""
    B, T, N, C = data.shape
    x = data + temporal_emb + spatial_emb
    adj_m = adj.astype(mxu_dtype)
    outs = []
    for i in range(T - 2):
        h = x[:, i:i + 3].reshape(B, 3 * N, C)
        keep = []
        for l in range(len(w_stacks)):
            h = jnp.einsum('vw,bwc->bvc', adj_m, h.astype(mxu_dtype),
                           preferred_element_type=jnp.float32)
            z = jnp.einsum('bvc,cf->bvf', h.astype(mxu_dtype),
                           w_stacks[l][i].astype(mxu_dtype),
                           preferred_element_type=jnp.float32) + b_stacks[l][i]
            f = z.shape[-1] // 2
            h = z[..., :f] * jax.nn.sigmoid(z[..., f:])
            keep.append(h[:, N:2 * N, :])            # transpose(1,0)[N:2N] == [:, N:2N]
        outs.append(jnp.max(jnp.stack(keep, axis=0), axis=0))   # max over GCN layers
    return jnp.stack(outs, axis=1)                               # (B, T-2, N, F)


def xavier_uniform(key, shape, fan_in, fan_out):
    bound = (6.0 / (fan_in + fan_out)) ** 0.5
    return jax.random.uniform(key, shape, jnp.float32, -bound, bound)


if __name__ == "__main__":
    # small deterministic shapes consistent with the module
    B, T, N, C = 2, 8, 16, 4          # batch, input_length, num_of_vertices, num_of_features
    filters = [32, 32, 32]            # Stsgcm filters (GLU)
    F = filters[-1]
    Tm2 = T - 2

    key = jax.random.PRNGKey(0)
    keys = jax.random.split(key, 6)
    data = jax.random.normal(keys[0], (B, T, N, C), jnp.float32)
    adj = jax.random.uniform(keys[1], (3 * N, 3 * N), jnp.float32)       # localized ST graph
    t_emb = xavier_uniform(keys[2], (1, T, 1, C), T, C)                  # temporal_emb param
    s_emb = xavier_uniform(keys[3], (1, 1, N, C), N, C)                  # spatial_emb param

    # 'individual' module type: each of the T-2 windows has its own Stsgcm.
    # Linear weights stored pre-transposed as (in, out) so the kernel does x @ W + b.
    w_stacks, b_stacks = [], []
    c_in = C
    wkeys = jax.random.split(keys[4], 2 * len(filters))
    for l, f in enumerate(filters):
        w_stacks.append(xavier_uniform(wkeys[2 * l], (Tm2, c_in, 2 * f), c_in, 2 * f))
        b_stacks.append(0.01 * jax.random.normal(wkeys[2 * l + 1], (Tm2, 2 * f), jnp.float32))
        c_in = f

    # bf16 MXU operands (recommended path for v6e / v7x); GLU / bias / max math stays f32.
    out = stsgcl_forward(data, adj, t_emb, s_emb, w_stacks, b_stacks,
                         mxu_dtype=jnp.bfloat16)
    out = jax.block_until_ready(out)
    assert out.shape == (B, Tm2, N, F)
    ref_bf16 = stsgcl_reference(data, adj, t_emb, s_emb, w_stacks, b_stacks,
                                mxu_dtype=jnp.bfloat16)
    if not jnp.allclose(out, ref_bf16, atol=2e-2, rtol=2e-2):
        raise AssertionError("Pallas kernel (bf16 MXU path) output mismatch vs reference")

    # f32 MXU operands reproduce the exact PyTorch f32 forward semantics.
    out32 = stsgcl_forward(data, adj, t_emb, s_emb, w_stacks, b_stacks,
                           mxu_dtype=jnp.float32)
    out32 = jax.block_until_ready(out32)
    ref32 = stsgcl_reference(data, adj, t_emb, s_emb, w_stacks, b_stacks,
                             mxu_dtype=jnp.float32)
    if not jnp.allclose(out32, ref32, atol=1e-3, rtol=1e-3):
        raise AssertionError("Pallas kernel (f32 path) output mismatch vs reference")

    print("KERNEL_OK")
</pallas_src>

<mosaic_0001>
module attributes {stable_mosaic.version = 11 : i64} {
  func.func @_stsgcl_kernel(%arg0: i32, %arg1: memref<2x8x16x4xf32, #tpu.memory_space<vmem>>, %arg2: memref<8x16x4xf32, #tpu.memory_space<vmem>>, %arg3: memref<48x48xbf16, #tpu.memory_space<vmem>>, %arg4: memref<3x4x32xbf16, #tpu.memory_space<vmem>>, %arg5: memref<3x4x32xbf16, #tpu.memory_space<vmem>>, %arg6: memref<3x1x32xf32, #tpu.memory_space<vmem>>, %arg7: memref<3x1x32xf32, #tpu.memory_space<vmem>>, %arg8: memref<3x32x32xbf16, #tpu.memory_space<vmem>>, %arg9: memref<3x32x32xbf16, #tpu.memory_space<vmem>>, %arg10: memref<3x1x32xf32, #tpu.memory_space<vmem>>, %arg11: memref<3x1x32xf32, #tpu.memory_space<vmem>>, %arg12: memref<3x32x32xbf16, #tpu.memory_space<vmem>>, %arg13: memref<3x32x32xbf16, #tpu.memory_space<vmem>>, %arg14: memref<3x1x32xf32, #tpu.memory_space<vmem>>, %arg15: memref<3x1x32xf32, #tpu.memory_space<vmem>>, %arg16: memref<2x3x16x32xf32, #tpu.memory_space<vmem>>) attributes {dimension_semantics = [#tpu.dimension_semantics<parallel>], iteration_bounds = array<i64: 2>, scalar_prefetch = 0 : i64, scratch_operands = 0 : i64, tpu.core_type = #tpu.core_type<tc>, window_params = [{pipeline_mode = #tpu.pipeline_mode<synchronous>, transform_indices = @transform_0, window_bounds = array<i64: 2, 8, 16, 4>}, {pipeline_mode = #tpu.pipeline_mode<synchronous>, transform_indices = @transform_1, window_bounds = array<i64: 8, 16, 4>}, {pipeline_mode = #tpu.pipeline_mode<synchronous>, transform_indices = @transform_2, window_bounds = array<i64: 48, 48>}, {transform_indices = @transform_3, window_bounds = array<i64: 3, 4, 32>}, {transform_indices = @transform_4, window_bounds = array<i64: 3, 4, 32>}, {transform_indices = @transform_5, window_bounds = array<i64: 3, 1, 32>}, {transform_indices = @transform_6, window_bounds = array<i64: 3, 1, 32>}, {transform_indices = @transform_7, window_bounds = array<i64: 3, 32, 32>}, {transform_indices = @transform_8, window_bounds = array<i64: 3, 32, 32>}, {transform_indices = @transform_9, window_bounds = array<i64: 3, 1, 32>}, {transform_indices = @transform_10, window_bounds = array<i64: 3, 1, 32>}, {transform_indices = @transform_11, window_bounds = array<i64: 3, 32, 32>}, {transform_indices = @transform_12, window_bounds = array<i64: 3, 32, 32>}, {transform_indices = @transform_13, window_bounds = array<i64: 3, 1, 32>}, {transform_indices = @transform_14, window_bounds = array<i64: 3, 1, 32>}, {transform_indices = @transform_15, window_bounds = array<i64: 2, 3, 16, 32>}]} {
    %c0 = arith.constant 0 : index
    %c0_0 = arith.constant 0 : index
    %0 = vector.load %arg3[%c0, %c0_0] : memref<48x48xbf16, #tpu.memory_space<vmem>>, vector<48x48xbf16>
    %c3_i32 = arith.constant 3 : i32
    %1 = arith.muli %arg0, %c3_i32 : i32
    %c0_i32 = arith.constant 0 : i32
    %2 = arith.addi %1, %c0_i32 : i32
    %c0_1 = arith.constant 0 : index
    %3 = arith.index_cast %2 : i32 to index
    %c0_2 = arith.constant 0 : index
    %c0_3 = arith.constant 0 : index
    %4 = vector.load %arg1[%c0_1, %3, %c0_2, %c0_3] : memref<2x8x16x4xf32, #tpu.memory_space<vmem>>, vector<1x3x16x4xf32>
    %5 = vector.shape_cast %4 : vector<1x3x16x4xf32> to vector<3x16x4xf32>
    %6 = arith.index_cast %2 : i32 to index
    %c0_4 = arith.constant 0 : index
    %c0_5 = arith.constant 0 : index
    %7 = vector.load %arg2[%6, %c0_4, %c0_5] : memref<8x16x4xf32, #tpu.memory_space<vmem>>, vector<3x16x4xf32>
    %8 = arith.addf %5, %7 : vector<3x16x4xf32>
    %9 = vector.extract_strided_slice %8 {offsets = [0, 0, 0], sizes = [1, 16, 4], strides = [1, 1, 1]} : vector<3x16x4xf32> to vector<1x16x4xf32>
    %10 = vector.shape_cast %9 : vector<1x16x4xf32> to vector<16x4xf32>
    %11 = vector.extract_strided_slice %8 {offsets = [1, 0, 0], sizes = [1, 16, 4], strides = [1, 1, 1]} : vector<3x16x4xf32> to vector<1x16x4xf32>
    %12 = vector.shape_cast %11 : vector<1x16x4xf32> to vector<16x4xf32>
    %13 = vector.extract_strided_slice %8 {offsets = [2, 0, 0], sizes = [1, 16, 4], strides = [1, 1, 1]} : vector<3x16x4xf32> to vector<1x16x4xf32>
    %14 = vector.shape_cast %13 : vector<1x16x4xf32> to vector<16x4xf32>
    %15 = tpu.concatenate %10, %12, %14 in 0 : vector<16x4xf32>, vector<16x4xf32>, vector<16x4xf32> -> vector<48x4xf32>
    %c1 = arith.constant 1 : index
    %16 = arith.index_cast %2 : i32 to index
    %c0_6 = arith.constant 0 : index
    %c0_7 = arith.constant 0 : index
    %17 = vector.load %arg1[%c1, %16, %c0_6, %c0_7] : memref<2x8x16x4xf32, #tpu.memory_space<vmem>>, vector<1x3x16x4xf32>
    %18 = vector.shape_cast %17 : vector<1x3x16x4xf32> to vector<3x16x4xf32>
    %19 = arith.index_cast %2 : i32 to index
    %c0_8 = arith.constant 0 : index
    %c0_9 = arith.constant 0 : index
    %20 = vector.load %arg2[%19, %c0_8, %c0_9] : memref<8x16x4xf32, #tpu.memory_space<vmem>>, vector<3x16x4xf32>
    %21 = arith.addf %18, %20 : vector<3x16x4xf32>
    %22 = vector.extract_strided_slice %21 {offsets = [0, 0, 0], sizes = [1, 16, 4], strides = [1, 1, 1]} : vector<3x16x4xf32> to vector<1x16x4xf32>
    %23 = vector.shape_cast %22 : vector<1x16x4xf32> to vector<16x4xf32>
    %24 = vector.extract_strided_slice %21 {offsets = [1, 0, 0], sizes = [1, 16, 4], strides = [1, 1, 1]} : vector<3x16x4xf32> to vector<1x16x4xf32>
    %25 = vector.shape_cast %24 : vector<1x16x4xf32> to vector<16x4xf32>
    %26 = vector.extract_strided_slice %21 {offsets = [2, 0, 0], sizes = [1, 16, 4], strides = [1, 1, 1]} : vector<3x16x4xf32> to vector<1x16x4xf32>
    %27 = vector.shape_cast %26 : vector<1x16x4xf32> to vector<16x4xf32>
    %28 = tpu.concatenate %23, %25, %27 in 0 : vector<16x4xf32>, vector<16x4xf32>, vector<16x4xf32> -> vector<48x4xf32>
    %29 = tpu.concatenate %15, %28 in 1 : vector<48x4xf32>, vector<48x4xf32> -> vector<48x8xf32>
    %30 = arith.truncf %29 : vector<48x8xf32> to vector<48x8xbf16>
    %cst = arith.constant dense<0.000000e+00> : vector<48x8xf32>
    %31 = tpu.matmul %0, %30, %cst {dimension_numbers = #tpu.dot_dimension_numbers<[1], [0], [0], [1], [0, 0, 1, 1], [], []>} : vector<48x48xbf16>, vector<48x8xbf16>, vector<48x8xf32> -> vector<48x8xf32>
    %32 = vector.extract_strided_slice %31 {offsets = [0, 0], sizes = [48, 4], strides = [1, 1]} : vector<48x8xf32> to vector<48x4xf32>
    %33 = vector.extract_strided_slice %31 {offsets = [0, 4], sizes = [48, 4], strides = [1, 1]} : vector<48x8xf32> to vector<48x4xf32>
    %34 = tpu.concatenate %32, %33 in 0 : vector<48x4xf32>, vector<48x4xf32> -> vector<96x4xf32>
    %35 = arith.truncf %34 : vector<96x4xf32> to vector<96x4xbf16>
    %c0_10 = arith.constant 0 : index
    %c0_11 = arith.constant 0 : index
    %c0_12 = arith.constant 0 : index
    %36 = vector.load %arg4[%c0_10, %c0_11, %c0_12] : memref<3x4x32xbf16, #tpu.memory_space<vmem>>, vector<1x4x32xbf16>
    %37 = vector.shape_cast %36 : vector<1x4x32xbf16> to vector<4x32xbf16>
    %cst_13 = arith.constant dense<0.000000e+00> : vector<96x32xf32>
    %38 = tpu.matmul %35, %37, %cst_13 {dimension_numbers = #tpu.dot_dimension_numbers<[1], [0], [0], [1], [0, 0, 1, 1], [], []>} : vector<96x4xbf16>, vector<4x32xbf16>, vector<96x32xf32> -> vector<96x32xf32>
    %c0_14 = arith.constant 0 : index
    %c0_15 = arith.constant 0 : index
    %c0_16 = arith.constant 0 : index
    %39 = vector.load %arg6[%c0_14, %c0_15, %c0_16] : memref<3x1x32xf32, #tpu.memory_space<vmem>>, vector<1x1x32xf32>
    %40 = vector.shape_cast %39 : vector<1x1x32xf32> to vector<1x32xf32>
    %41 = vector.broadcast %40 : vector<1x32xf32> to vector<96x32xf32>
    %42 = arith.addf %38, %41 : vector<96x32xf32>
    %c0_17 = arith.constant 0 : index
    %c0_18 = arith.constant 0 : index
    %c0_19 = arith.constant 0 : index
    %43 = vector.load %arg5[%c0_17, %c0_18, %c0_19] : memref<3x4x32xbf16, #tpu.memory_space<vmem>>, vector<1x4x32xbf16>
    %44 = vector.shape_cast %43 : vector<1x4x32xbf16> to vector<4x32xbf16>
    %cst_20 = arith.constant dense<0.000000e+00> : vector<96x32xf32>
    %45 = tpu.matmul %35, %44, %cst_20 {dimension_numbers = #tpu.dot_dimension_numbers<[1], [0], [0], [1], [0, 0, 1, 1], [], []>} : vector<96x4xbf16>, vector<4x32xbf16>, vector<96x32xf32> -> vector<96x32xf32>
    %c0_21 = arith.constant 0 : index
    %c0_22 = arith.constant 0 : index
    %c0_23 = arith.constant 0 : index
    %46 = vector.load %arg7[%c0_21, %c0_22, %c0_23] : memref<3x1x32xf32, #tpu.memory_space<vmem>>, vector<1x1x32xf32>
    %47 = vector.shape_cast %46 : vector<1x1x32xf32> to vector<1x32xf32>
    %48 = vector.broadcast %47 : vector<1x32xf32> to vector<96x32xf32>
    %49 = arith.addf %45, %48 : vector<96x32xf32>
    %50 = arith.negf %49 : vector<96x32xf32>
    %51 = math.exp %50 : vector<96x32xf32>
    %cst_24 = arith.constant 1.000000e+00 : f32
    %52 = vector.broadcast %cst_24 : f32 to vector<96x32xf32>
    %53 = arith.addf %52, %51 : vector<96x32xf32>
    %54 = arith.divf %52, %53 : vector<96x32xf32>
    %55 = arith.mulf %42, %54 : vector<96x32xf32>
    %56 = vector.extract_strided_slice %55 {offsets = [16, 0], sizes = [16, 32], strides = [1, 1]} : vector<96x32xf32> to vector<16x32xf32>
    %57 = vector.extract_strided_slice %55 {offsets = [64, 0], sizes = [16, 32], strides = [1, 1]} : vector<96x32xf32> to vector<16x32xf32>
    %58 = arith.truncf %55 : vector<96x32xf32> to vector<96x32xbf16>
    %59 = vector.extract_strided_slice %58 {offsets = [0, 0], sizes = [48, 32], strides = [1, 1]} : vector<96x32xbf16> to vector<48x32xbf16>
    %60 = vector.extract_strided_slice %58 {offsets = [48, 0], sizes = [48, 32], strides = [1, 1]} : vector<96x32xbf16> to vector<48x32xbf16>
    %61 = tpu.concatenate %59, %60 in 1 : vector<48x32xbf16>, vector<48x32xbf16> -> vector<48x64xbf16>
    %cst_25 = arith.constant dense<0.000000e+00> : vector<48x64xf32>
    %62 = tpu.matmul %0, %61, %cst_25 {dimension_numbers = #tpu.dot_dimension_numbers<[1], [0], [0], [1], [0, 0, 1, 1], [], []>} : vector<48x48xbf16>, vector<48x64xbf16>, vector<48x64xf32> -> vector<48x64xf32>
    %63 = vector.extract_strided_slice %62 {offsets = [0, 0], sizes = [48, 32], strides = [1, 1]} : vector<48x64xf32> to vector<48x32xf32>
    %64 = vector.extract_strided_slice %62 {offsets = [0, 32], sizes = [48, 32], strides = [1, 1]} : vector<48x64xf32> to vector<48x32xf32>
    %65 = tpu.concatenate %63, %64 in 0 : vector<48x32xf32>, vector<48x32xf32> -> vector<96x32xf32>
    %66 = arith.truncf %65 : vector<96x32xf32> to vector<96x32xbf16>
    %c0_26 = arith.constant 0 : index
    %c0_27 = arith.constant 0 : index
    %c0_28 = arith.constant 0 : index
    %67 = vector.load %arg8[%c0_26, %c0_27, %c0_28] : memref<3x32x32xbf16, #tpu.memory_space<vmem>>, vector<1x32x32xbf16>
    %68 = vector.shape_cast %67 : vector<1x32x32xbf16> to vector<32x32xbf16>
    %cst_29 = arith.constant dense<0.000000e+00> : vector<96x32xf32>
    %69 = tpu.matmul %66, %68, %cst_29 {dimension_numbers = #tpu.dot_dimension_numbers<[1], [0], [0], [1], [0, 0, 1, 1], [], []>} : vector<96x32xbf16>, vector<32x32xbf16>, vector<96x32xf32> -> vector<96x32xf32>
    %c0_30 = arith.constant 0 : index
    %c0_31 = arith.constant 0 : index
    %c0_32 = arith.constant 0 : index
    %70 = vector.load %arg10[%c0_30, %c0_31, %c0_32] : memref<3x1x32xf32, #tpu.memory_space<vmem>>, vector<1x1x32xf32>
    %71 = vector.shape_cast %70 : vector<1x1x32xf32> to vector<1x32xf32>
    %72 = vector.broadcast %71 : vector<1x32xf32> to vector<96x32xf32>
    %73 = arith.addf %69, %72 : vector<96x32xf32>
    %c0_33 = arith.constant 0 : index
    %c0_34 = arith.constant 0 : index
    %c0_35 = arith.constant 0 : index
    %74 = vector.load %arg9[%c0_33, %c0_34, %c0_35] : memref<3x32x32xbf16, #tpu.memory_space<vmem>>, vector<1x32x32xbf16>
    %75 = vector.shape_cast %74 : vector<1x32x32xbf16> to vector<32x32xbf16>
    %cst_36 = arith.constant dense<0.000000e+00> : vector<96x32xf32>
    %76 = tpu.matmul %66, %75, %cst_36 {dimension_numbers = #tpu.dot_dimension_numbers<[1], [0], [0], [1], [0, 0, 1, 1], [], []>} : vector<96x32xbf16>, vector<32x32xbf16>, vector<96x32xf32> -> vector<96x32xf32>
    %c0_37 = arith.constant 0 : index
    %c0_38 = arith.constant 0 : index
    %c0_39 = arith.constant 0 : index
    %77 = vector.load %arg11[%c0_37, %c0_38, %c0_39] : memref<3x1x32xf32, #tpu.memory_space<vmem>>, vector<1x1x32xf32>
    %78 = vector.shape_cast %77 : vector<1x1x32xf32> to vector<1x32xf32>
    %79 = vector.broadcast %78 : vector<1x32xf32> to vector<96x32xf32>
    %80 = arith.addf %76, %79 : vector<96x32xf32>
    %81 = arith.negf %80 : vector<96x32xf32>
    %82 = math.exp %81 : vector<96x32xf32>
    %cst_40 = arith.constant 1.000000e+00 : f32
    %83 = vector.broadcast %cst_40 : f32 to vector<96x32xf32>
    %84 = arith.addf %83, %82 : vector<96x32xf32>
    %85 = arith.divf %83, %84 : vector<96x32xf32>
    %86 = arith.mulf %73, %85 : vector<96x32xf32>
    %87 = vector.extract_strided_slice %86 {offsets = [16, 0], sizes = [16, 32], strides = [1, 1]} : vector<96x32xf32> to vector<16x32xf32>
    %88 = arith.maximumf %56, %87 : vector<16x32xf32>
    %89 = vector.extract_strided_slice %86 {offsets = [64, 0], sizes = [16, 32], strides = [1, 1]} : vector<96x32xf32> to vector<16x32xf32>
    %90 = arith.maximumf %57, %89 : vector<16x32xf32>
    %91 = arith.truncf %86 : vector<96x32xf32> to vector<96x32xbf16>
    %92 = vector.extract_strided_slice %91 {offsets = [0, 0], sizes = [48, 32], strides = [1, 1]} : vector<96x32xbf16> to vector<48x32xbf16>
    %93 = vector.extract_strided_slice %91 {offsets = [48, 0], sizes = [48, 32], strides = [1, 1]} : vector<96x32xbf16> to vector<48x32xbf16>
    %94 = tpu.concatenate %92, %93 in 1 : vector<48x32xbf16>, vector<48x32xbf16> -> vector<48x64xbf16>
    %cst_41 = arith.constant dense<0.000000e+00> : vector<48x64xf32>
    %95 = tpu.matmul %0, %94, %cst_41 {dimension_numbers = #tpu.dot_dimension_numbers<[1], [0], [0], [1], [0, 0, 1, 1], [], []>} : vector<48x48xbf16>, vector<48x64xbf16>, vector<48x64xf32> -> vector<48x64xf32>
    %96 = vector.extract_strided_slice %95 {offsets = [0, 0], sizes = [48, 32], strides = [1, 1]} : vector<48x64xf32> to vector<48x32xf32>
    %97 = vector.extract_strided_slice %95 {offsets = [0, 32], sizes = [48, 32], strides = [1, 1]} : vector<48x64xf32> to vector<48x32xf32>
    %98 = tpu.concatenate %96, %97 in 0 : vector<48x32xf32>, vector<48x32xf32> -> vector<96x32xf32>
    %99 = arith.truncf %98 : vector<96x32xf32> to vector<96x32xbf16>
    %c0_42 = arith.constant 0 : index
    %c0_43 = arith.constant 0 : index
    %c0_44 = arith.constant 0 : index
    %100 = vector.load %arg12[%c0_42, %c0_43, %c0_44] : memref<3x32x32xbf16, #tpu.memory_space<vmem>>, vector<1x32x32xbf16>
    %101 = vector.shape_cast %100 : vector<1x32x32xbf16> to vector<32x32xbf16>
    %cst_45 = arith.constant dense<0.000000e+00> : vector<96x32xf32>
    %102 = tpu.matmul %99, %101, %cst_45 {dimension_numbers = #tpu.dot_dimension_numbers<[1], [0], [0], [1], [0, 0, 1, 1], [], []>} : vector<96x32xbf16>, vector<32x32xbf16>, vector<96x32xf32> -> vector<96x32xf32>
    %c0_46 = arith.constant 0 : index
    %c0_47 = arith.constant 0 : index
    %c0_48 = arith.constant 0 : index
    %103 = vector.load %arg14[%c0_46, %c0_47, %c0_48] : memref<3x1x32xf32, #tpu.memory_space<vmem>>, vector<1x1x32xf32>
    %104 = vector.shape_cast %103 : vector<1x1x32xf32> to vector<1x32xf32>
    %105 = vector.broadcast %104 : vector<1x32xf32> to vector<96x32xf32>
    %106 = arith.addf %102, %105 : vector<96x32xf32>
    %c0_49 = arith.constant 0 : index
    %c0_50 = arith.constant 0 : index
    %c0_51 = arith.constant 0 : index
    %107 = vector.load %arg13[%c0_49, %c0_50, %c0_51] : memref<3x32x32xbf16, #tpu.memory_space<vmem>>, vector<1x32x32xbf16>
    %108 = vector.shape_cast %107 : vector<1x32x32xbf16> to vector<32x32xbf16>
    %cst_52 = arith.constant dense<0.000000e+00> : vector<96x32xf32>
    %109 = tpu.matmul %99, %108, %cst_52 {dimension_numbers = #tpu.dot_dimension_numbers<[1], [0], [0], [1], [0, 0, 1, 1], [], []>} : vector<96x32xbf16>, vector<32x32xbf16>, vector<96x32xf32> -> vector<96x32xf32>
    %c0_53 = arith.constant 0 : index
    %c0_54 = arith.constant 0 : index
    %c0_55 = arith.constant 0 : index
    %110 = vector.load %arg15[%c0_53, %c0_54, %c0_55] : memref<3x1x32xf32, #tpu.memory_space<vmem>>, vector<1x1x32xf32>
    %111 = vector.shape_cast %110 : vector<1x1x32xf32> to vector<1x32xf32>
    %112 = vector.broadcast %111 : vector<1x32xf32> to vector<96x32xf32>
    %113 = arith.addf %109, %112 : vector<96x32xf32>
    %114 = arith.negf %113 : vector<96x32xf32>
    %115 = math.exp %114 : vector<96x32xf32>
    %cst_56 = arith.constant 1.000000e+00 : f32
    %116 = vector.broadcast %cst_56 : f32 to vector<96x32xf32>
    %117 = arith.addf %116, %115 : vector<96x32xf32>
    %118 = arith.divf %116, %117 : vector<96x32xf32>
    %119 = arith.mulf %106, %118 : vector<96x32xf32>
    %120 = vector.extract_strided_slice %119 {offsets = [16, 0], sizes = [16, 32], strides = [1, 1]} : vector<96x32xf32> to vector<16x32xf32>
    %121 = arith.maximumf %88, %120 : vector<16x32xf32>
    %122 = vector.extract_strided_slice %119 {offsets = [64, 0], sizes = [16, 32], strides = [1, 1]} : vector<96x32xf32> to vector<16x32xf32>
    %123 = arith.maximumf %90, %122 : vector<16x32xf32>
    %c0_57 = arith.constant 0 : index
    %c0_58 = arith.constant 0 : index
    %c0_59 = arith.constant 0 : index
    %c0_60 = arith.constant 0 : index
    %124 = vector.load %arg16[%c0_57, %c0_58, %c0_59, %c0_60] : memref<2x3x16x32xf32, #tpu.memory_space<vmem>>, vector<1x1x16x32xf32>
    %125 = vector.shape_cast %124 : vector<1x1x16x32xf32> to vector<16x32xf32>
    %126 = vector.shape_cast %121 : vector<16x32xf32> to vector<1x1x16x32xf32>
    tpu.vector_store %arg16[%c0_57, %c0_58, %c0_59, %c0_60], %126 {strides = array<i32>} : memref<2x3x16x32xf32, #tpu.memory_space<vmem>>, vector<1x1x16x32xf32>,
    %c1_61 = arith.constant 1 : index
    %c0_62 = arith.constant 0 : index
    %c0_63 = arith.constant 0 : index
    %c0_64 = arith.constant 0 : index
    %127 = vector.load %arg16[%c1_61, %c0_62, %c0_63, %c0_64] : memref<2x3x16x32xf32, #tpu.memory_space<vmem>>, vector<1x1x16x32xf32>
    %128 = vector.shape_cast %127 : vector<1x1x16x32xf32> to vector<16x32xf32>
    %129 = vector.shape_cast %123 : vector<16x32xf32> to vector<1x1x16x32xf32>
    tpu.vector_store %arg16[%c1_61, %c0_62, %c0_63, %c0_64], %129 {strides = array<i32>} : memref<2x3x16x32xf32, #tpu.memory_space<vmem>>, vector<1x1x16x32xf32>,
    %c3_i32_65 = arith.constant 3 : i32
    %130 = arith.muli %arg0, %c3_i32_65 : i32
    %c1_i32 = arith.constant 1 : i32
    %131 = arith.addi %130, %c1_i32 : i32
    %c0_66 = arith.constant 0 : index
    %132 = arith.index_cast %131 : i32 to index
    %c0_67 = arith.constant 0 : index
    %c0_68 = arith.constant 0 : index
    %133 = vector.load %arg1[%c0_66, %132, %c0_67, %c0_68] : memref<2x8x16x4xf32, #tpu.memory_space<vmem>>, vector<1x3x16x4xf32>
    %134 = vector.shape_cast %133 : vector<1x3x16x4xf32> to vector<3x16x4xf32>
    %135 = arith.index_cast %131 : i32 to index
    %c0_69 = arith.constant 0 : index
    %c0_70 = arith.constant 0 : index
    %136 = vector.load %arg2[%135, %c0_69, %c0_70] : memref<8x16x4xf32, #tpu.memory_space<vmem>>, vector<3x16x4xf32>
    %137 = arith.addf %134, %136 : vector<3x16x4xf32>
    %138 = vector.extract_strided_slice %137 {offsets = [0, 0, 0], sizes = [1, 16, 4], strides = [1, 1, 1]} : vector<3x16x4xf32> to vector<1x16x4xf32>
    %139 = vector.shape_cast %138 : vector<1x16x4xf32> to vector<16x4xf32>
    %140 = vector.extract_strided_slice %137 {offsets = [1, 0, 0], sizes = [1, 16, 4], strides = [1, 1, 1]} : vector<3x16x4xf32> to vector<1x16x4xf32>
    %141 = vector.shape_cast %140 : vector<1x16x4xf32> to vector<16x4xf32>
    %142 = vector.extract_strided_slice %137 {offsets = [2, 0, 0], sizes = [1, 16, 4], strides = [1, 1, 1]} : vector<3x16x4xf32> to vector<1x16x4xf32>
    %143 = vector.shape_cast %142 : vector<1x16x4xf32> to vector<16x4xf32>
    %144 = tpu.concatenate %139, %141, %143 in 0 : vector<16x4xf32>, vector<16x4xf32>, vector<16x4xf32> -> vector<48x4xf32>
    %c1_71 = arith.constant 1 : index
    %145 = arith.index_cast %131 : i32 to index
    %c0_72 = arith.constant 0 : index
    %c0_73 = arith.constant 0 : index
    %146 = vector.load %arg1[%c1_71, %145, %c0_72, %c0_73] : memref<2x8x16x4xf32, #tpu.memory_space<vmem>>, vector<1x3x16x4xf32>
    %147 = vector.shape_cast %146 : vector<1x3x16x4xf32> to vector<3x16x4xf32>
    %148 = arith.index_cast %131 : i32 to index
    %c0_74 = arith.constant 0 : index
    %c0_75 = arith.constant 0 : index
    %149 = vector.load %arg2[%148, %c0_74, %c0_75] : memref<8x16x4xf32, #tpu.memory_space<vmem>>, vector<3x16x4xf32>
    %150 = arith.addf %147, %149 : vector<3x16x4xf32>
    %151 = vector.extract_strided_slice %150 {offsets = [0, 0, 0], sizes = [1, 16, 4], strides = [1, 1, 1]} : vector<3x16x4xf32> to vector<1x16x4xf32>
    %152 = vector.shape_cast %151 : vector<1x16x4xf32> to vector<16x4xf32>
    %153 = vector.extract_strided_slice %150 {offsets = [1, 0, 0], sizes = [1, 16, 4], strides = [1, 1, 1]} : vector<3x16x4xf32> to vector<1x16x4xf32>
    %154 = vector.shape_cast %153 : vector<1x16x4xf32> to vector<16x4xf32>
    %155 = vector.extract_strided_slice %150 {offsets = [2, 0, 0], sizes = [1, 16, 4], strides = [1, 1, 1]} : vector<3x16x4xf32> to vector<1x16x4xf32>
    %156 = vector.shape_cast %155 : vector<1x16x4xf32> to vector<16x4xf32>
    %157 = tpu.concatenate %152, %154, %156 in 0 : vector<16x4xf32>, vector<16x4xf32>, vector<16x4xf32> -> vector<48x4xf32>
    %158 = tpu.concatenate %144, %157 in 1 : vector<48x4xf32>, vector<48x4xf32> -> vector<48x8xf32>
    %159 = arith.truncf %158 : vector<48x8xf32> to vector<48x8xbf16>
    %cst_76 = arith.constant dense<0.000000e+00> : vector<48x8xf32>
    %160 = tpu.matmul %0, %159, %cst_76 {dimension_numbers = #tpu.dot_dimension_numbers<[1], [0], [0], [1], [0, 0, 1, 1], [], []>} : vector<48x48xbf16>, vector<48x8xbf16>, vector<48x8xf32> -> vector<48x8xf32>
    %161 = vector.extract_strided_slice %160 {offsets = [0, 0], sizes = [48, 4], strides = [1, 1]} : vector<48x8xf32> to vector<48x4xf32>
    %162 = vector.extract_strided_slice %160 {offsets = [0, 4], sizes = [48, 4], strides = [1, 1]} : vector<48x8xf32> to vector<48x4xf32>
    %163 = tpu.concatenate %161, %162 in 0 : vector<48x4xf32>, vector<48x4xf32> -> vector<96x4xf32>
    %164 = arith.truncf %163 : vector<96x4xf32> to vector<96x4xbf16>
    %c1_77 = arith.constant 1 : index
    %c0_78 = arith.constant 0 : index
    %c0_79 = arith.constant 0 : index
    %165 = vector.load %arg4[%c1_77, %c0_78, %c0_79] : memref<3x4x32xbf16, #tpu.memory_space<vmem>>, vector<1x4x32xbf16>
    %166 = vector.shape_cast %165 : vector<1x4x32xbf16> to vector<4x32xbf16>
    %cst_80 = arith.constant dense<0.000000e+00> : vector<96x32xf32>
    %167 = tpu.matmul %164, %166, %cst_80 {dimension_numbers = #tpu.dot_dimension_numbers<[1], [0], [0], [1], [0, 0, 1, 1], [], []>} : vector<96x4xbf16>, vector<4x32xbf16>, vector<96x32xf32> -> vector<96x32xf32>
    %c1_81 = arith.constant 1 : index
    %c0_82 = arith.constant 0 : index
    %c0_83 = arith.constant 0 : index
    %168 = vector.load %arg6[%c1_81, %c0_82, %c0_83] : memref<3x1x32xf32, #tpu.memory_space<vmem>>, vector<1x1x32xf32>
    %169 = vector.shape_cast %168 : vector<1x1x32xf32> to vector<1x32xf32>
    %170 = vector.broadcast %169 : vector<1x32xf32> to vector<96x32xf32>
    %171 = arith.addf %167, %170 : vector<96x32xf32>
    %c1_84 = arith.constant 1 : index
    %c0_85 = arith.constant 0 : index
    %c0_86 = arith.constant 0 : index
    %172 = vector.load %arg5[%c1_84, %c0_85, %c0_86] : memref<3x4x32xbf16, #tpu.memory_space<vmem>>, vector<1x4x32xbf16>
    %173 = vector.shape_cast %172 : vector<1x4x32xbf16> to vector<4x32xbf16>
    %cst_87 = arith.constant dense<0.000000e+00> : vector<96x32xf32>
    %174 = tpu.matmul %164, %173, %cst_87 {dimension_numbers = #tpu.dot_dimension_numbers<[1], [0], [0], [1], [0, 0, 1, 1], [], []>} : vector<96x4xbf16>, vector<4x32xbf16>, vector<96x32xf32> -> vector<96x32xf32>
    %c1_88 = arith.constant 1 : index
    %c0_89 = arith.constant 0 : index
    %c0_90 = arith.constant 0 : index
    %175 = vector.load %arg7[%c1_88, %c0_89, %c0_90] : memref<3x1x32xf32, #tpu.memory_space<vmem>>, vector<1x1x32xf32>
    %176 = vector.shape_cast %175 : vector<1x1x32xf32> to vector<1x32xf32>
    %177 = vector.broadcast %176 : vector<1x32xf32> to vector<96x32xf32>
    %178 = arith.addf %174, %177 : vector<96x32xf32>
    %179 = arith.negf %178 : vector<96x32xf32>
    %180 = math.exp %179 : vector<96x32xf32>
    %cst_91 = arith.constant 1.000000e+00 : f32
    %181 = vector.broadcast %cst_91 : f32 to vector<96x32xf32>
    %182 = arith.addf %181, %180 : vector<96x32xf32>
    %183 = arith.divf %181, %182 : vector<96x32xf32>
    %184 = arith.mulf %171, %183 : vector<96x32xf32>
    %185 = vector.extract_strided_slice %184 {offsets = [16, 0], sizes = [16, 32], strides = [1, 1]} : vector<96x32xf32> to vector<16x32xf32>
    %186 = vector.extract_strided_slice %184 {offsets = [64, 0], sizes = [16, 32], strides = [1, 1]} : vector<96x32xf32> to vector<16x32xf32>
    %187 = arith.truncf %184 : vector<96x32xf32> to vector<96x32xbf16>
    %188 = vector.extract_strided_slice %187 {offsets = [0, 0], sizes = [48, 32], strides = [1, 1]} : vector<96x32xbf16> to vector<48x32xbf16>
    %189 = vector.extract_strided_slice %187 {offsets = [48, 0], sizes = [48, 32], strides = [1, 1]} : vector<96x32xbf16> to vector<48x32xbf16>
    %190 = tpu.concatenate %188, %189 in 1 : vector<48x32xbf16>, vector<48x32xbf16> -> vector<48x64xbf16>
    %cst_92 = arith.constant dense<0.000000e+00> : vector<48x64xf32>
    %191 = tpu.matmul %0, %190, %cst_92 {dimension_numbers = #tpu.dot_dimension_numbers<[1], [0], [0], [1], [0, 0, 1, 1], [], []>} : vector<48x48xbf16>, vector<48x64xbf16>, vector<48x64xf32> -> vector<48x64xf32>
    %192 = vector.extract_strided_slice %191 {offsets = [0, 0], sizes = [48, 32], strides = [1, 1]} : vector<48x64xf32> to vector<48x32xf32>
    %193 = vector.extract_strided_slice %191 {offsets = [0, 32], sizes = [48, 32], strides = [1, 1]} : vector<48x64xf32> to vector<48x32xf32>
    %194 = tpu.concatenate %192, %193 in 0 : vector<48x32xf32>, vector<48x32xf32> -> vector<96x32xf32>
    %195 = arith.truncf %194 : vector<96x32xf32> to vector<96x32xbf16>
    %c1_93 = arith.constant 1 : index
    %c0_94 = arith.constant 0 : index
    %c0_95 = arith.constant 0 : index
    %196 = vector.load %arg8[%c1_93, %c0_94, %c0_95] : memref<3x32x32xbf16, #tpu.memory_space<vmem>>, vector<1x32x32xbf16>
    %197 = vector.shape_cast %196 : vector<1x32x32xbf16> to vector<32x32xbf16>
    %cst_96 = arith.constant dense<0.000000e+00> : vector<96x32xf32>
    %198 = tpu.matmul %195, %197, %cst_96 {dimension_numbers = #tpu.dot_dimension_numbers<[1], [0], [0], [1], [0, 0, 1, 1], [], []>} : vector<96x32xbf16>, vector<32x32xbf16>, vector<96x32xf32> -> vector<96x32xf32>
    %c1_97 = arith.constant 1 : index
    %c0_98 = arith.constant 0 : index
    %c0_99 = arith.constant 0 : index
    %199 = vector.load %arg10[%c1_97, %c0_98, %c0_99] : memref<3x1x32xf32, #tpu.memory_space<vmem>>, vector<1x1x32xf32>
    %200 = vector.shape_cast %199 : vector<1x1x32xf32> to vector<1x32xf32>
    %201 = vector.broadcast %200 : vector<1x32xf32> to vector<96x32xf32>
    %202 = arith.addf %198, %201 : vector<96x32xf32>
    %c1_100 = arith.constant 1 : index
    %c0_101 = arith.constant 0 : index
    %c0_102 = arith.constant 0 : index
    %203 = vector.load %arg9[%c1_100, %c0_101, %c0_102] : memref<3x32x32xbf16, #tpu.memory_space<vmem>>, vector<1x32x32xbf16>
    %204 = vector.shape_cast %203 : vector<1x32x32xbf16> to vector<32x32xbf16>
    %cst_103 = arith.constant dense<0.000000e+00> : vector<96x32xf32>
    %205 = tpu.matmul %195, %204, %cst_103 {dimension_numbers = #tpu.dot_dimension_numbers<[1], [0], [0], [1], [0, 0, 1, 1], [], []>} : vector<96x32xbf16>, vector<32x32xbf16>, vector<96x32xf32> -> vector<96x32xf32>
    %c1_104 = arith.constant 1 : index
    %c0_105 = arith.constant 0 : index
    %c0_106 = arith.constant 0 : index
    %206 = vector.load %arg11[%c1_104, %c0_105, %c0_106] : memref<3x1x32xf32, #tpu.memory_space<vmem>>, vector<1x1x32xf32>
    %207 = vector.shape_cast %206 : vector<1x1x32xf32> to vector<1x32xf32>
    %208 = vector.broadcast %207 : vector<1x32xf32> to vector<96x32xf32>
    %209 = arith.addf %205, %208 : vector<96x32xf32>
    %210 = arith.negf %209 : vector<96x32xf32>
    %211 = math.exp %210 : vector<96x32xf32>
    %cst_107 = arith.constant 1.000000e+00 : f32
    %212 = vector.broadcast %cst_107 : f32 to vector<96x32xf32>
    %213 = arith.addf %212, %211 : vector<96x32xf32>
    %214 = arith.divf %212, %213 : vector<96x32xf32>
    %215 = arith.mulf %202, %214 : vector<96x32xf32>
    %216 = vector.extract_strided_slice %215 {offsets = [16, 0], sizes = [16, 32], strides = [1, 1]} : vector<96x32xf32> to vector<16x32xf32>
    %217 = arith.maximumf %185, %216 : vector<16x32xf32>
    %218 = vector.extract_strided_slice %215 {offsets = [64, 0], sizes = [16, 32], strides = [1, 1]} : vector<96x32xf32> to vector<16x32xf32>
    %219 = arith.maximumf %186, %218 : vector<16x32xf32>
    %220 = arith.truncf %215 : vector<96x32xf32> to vector<96x32xbf16>
    %221 = vector.extract_strided_slice %220 {offsets = [0, 0], sizes = [48, 32], strides = [1, 1]} : vector<96x32xbf16> to vector<48x32xbf16>
    %222 = vector.extract_strided_slice %220 {offsets = [48, 0], sizes = [48, 32], strides = [1, 1]} : vector<96x32xbf16> to vector<48x32xbf16>
    %223 = tpu.concatenate %221, %222 in 1 : vector<48x32xbf16>, vector<48x32xbf16> -> vector<48x64xbf16>
    %cst_108 = arith.constant dense<0.000000e+00> : vector<48x64xf32>
    %224 = tpu.matmul %0, %223, %cst_108 {dimension_numbers = #tpu.dot_dimension_numbers<[1], [0], [0], [1], [0, 0, 1, 1], [], []>} : vector<48x48xbf16>, vector<48x64xbf16>, vector<48x64xf32> -> vector<48x64xf32>
    %225 = vector.extract_strided_slice %224 {offsets = [0, 0], sizes = [48, 32], strides = [1, 1]} : vector<48x64xf32> to vector<48x32xf32>
    %226 = vector.extract_strided_slice %224 {offsets = [0, 32], sizes = [48, 32], strides = [1, 1]} : vector<48x64xf32> to vector<48x32xf32>
    %227 = tpu.concatenate %225, %226 in 0 : vector<48x32xf32>, vector<48x32xf32> -> vector<96x32xf32>
    %228 = arith.truncf %227 : vector<96x32xf32> to vector<96x32xbf16>
    %c1_109 = arith.constant 1 : index
    %c0_110 = arith.constant 0 : index
    %c0_111 = arith.constant 0 : index
    %229 = vector.load %arg12[%c1_109, %c0_110, %c0_111] : memref<3x32x32xbf16, #tpu.memory_space<vmem>>, vector<1x32x32xbf16>
    %230 = vector.shape_cast %229 : vector<1x32x32xbf16> to vector<32x32xbf16>
    %cst_112 = arith.constant dense<0.000000e+00> : vector<96x32xf32>
    %231 = tpu.matmul %228, %230, %cst_112 {dimension_numbers = #tpu.dot_dimension_numbers<[1], [0], [0], [1], [0, 0, 1, 1], [], []>} : vector<96x32xbf16>, vector<32x32xbf16>, vector<96x32xf32> -> vector<96x32xf32>
    %c1_113 = arith.constant 1 : index
    %c0_114 = arith.constant 0 : index
    %c0_115 = arith.constant 0 : index
    %232 = vector.load %arg14[%c1_113, %c0_114, %c0_115] : memref<3x1x32xf32, #tpu.memory_space<vmem>>, vector<1x1x32xf32>
    %233 = vector.shape_cast %232 : vector<1x1x32xf32> to vector<1x32xf32>
    %234 = vector.broadcast %233 : vector<1x32xf32> to vector<96x32xf32>
    %235 = arith.addf %231, %234 : vector<96x32xf32>
    %c1_116 = arith.constant 1 : index
    %c0_117 = arith.constant 0 : index
    %c0_118 = arith.constant 0 : index
    %236 = vector.load %arg13[%c1_116, %c0_117, %c0_118] : memref<3x32x32xbf16, #tpu.memory_space<vmem>>, vector<1x32x32xbf16>
    %237 = vector.shape_cast %236 : vector<1x32x32xbf16> to vector<32x32xbf16>
    %cst_119 = arith.constant dense<0.000000e+00> : vector<96x32xf32>
    %238 = tpu.matmul %228, %237, %cst_119 {dimension_numbers = #tpu.dot_dimension_numbers<[1], [0], [0], [1], [0, 0, 1, 1], [], []>} : vector<96x32xbf16>, vector<32x32xbf16>, vector<96x32xf32> -> vector<96x32xf32>
    %c1_120 = arith.constant 1 : index
    %c0_121 = arith.constant 0 : index
    %c0_122 = arith.constant 0 : index
    %239 = vector.load %arg15[%c1_120, %c0_121, %c0_122] : memref<3x1x32xf32, #tpu.memory_space<vmem>>, vector<1x1x32xf32>
    %240 = vector.shape_cast %239 : vector<1x1x32xf32> to vector<1x32xf32>
    %241 = vector.broadcast %240 : vector<1x32xf32> to vector<96x32xf32>
    %242 = arith.addf %238, %241 : vector<96x32xf32>
    %243 = arith.negf %242 : vector<96x32xf32>
    %244 = math.exp %243 : vector<96x32xf32>
    %cst_123 = arith.constant 1.000000e+00 : f32
    %245 = vector.broadcast %cst_123 : f32 to vector<96x32xf32>
    %246 = arith.addf %245, %244 : vector<96x32xf32>
    %247 = arith.divf %245, %246 : vector<96x32xf32>
    %248 = arith.mulf %235, %247 : vector<96x32xf32>
    %249 = vector.extract_strided_slice %248 {offsets = [16, 0], sizes = [16, 32], strides = [1, 1]} : vector<96x32xf32> to vector<16x32xf32>
    %250 = arith.maximumf %217, %249 : vector<16x32xf32>
    %251 = vector.extract_strided_slice %248 {offsets = [64, 0], sizes = [16, 32], strides = [1, 1]} : vector<96x32xf32> to vector<16x32xf32>
    %252 = arith.maximumf %219, %251 : vector<16x32xf32>
    %c0_124 = arith.constant 0 : index
    %c1_125 = arith.constant 1 : index
    %c0_126 = arith.constant 0 : index
    %c0_127 = arith.constant 0 : index
    %253 = vector.load %arg16[%c0_124, %c1_125, %c0_126, %c0_127] : memref<2x3x16x32xf32, #tpu.memory_space<vmem>>, vector<1x1x16x32xf32>
    %254 = vector.shape_cast %253 : vector<1x1x16x32xf32> to vector<16x32xf32>
    %255 = vector.shape_cast %250 : vector<16x32xf32> to vector<1x1x16x32xf32>
    tpu.vector_store %arg16[%c0_124, %c1_125, %c0_126, %c0_127], %255 {strides = array<i32>} : memref<2x3x16x32xf32, #tpu.memory_space<vmem>>, vector<1x1x16x32xf32>,
    %c1_128 = arith.constant 1 : index
    %c1_129 = arith.constant 1 : index
    %c0_130 = arith.constant 0 : index
    %c0_131 = arith.constant 0 : index
    %256 = vector.load %arg16[%c1_128, %c1_129, %c0_130, %c0_131] : memref<2x3x16x32xf32, #tpu.memory_space<vmem>>, vector<1x1x16x32xf32>
    %257 = vector.shape_cast %256 : vector<1x1x16x32xf32> to vector<16x32xf32>
    %258 = vector.shape_cast %252 : vector<16x32xf32> to vector<1x1x16x32xf32>
    tpu.vector_store %arg16[%c1_128, %c1_129, %c0_130, %c0_131], %258 {strides = array<i32>} : memref<2x3x16x32xf32, #tpu.memory_space<vmem>>, vector<1x1x16x32xf32>,
    %c3_i32_132 = arith.constant 3 : i32
    %259 = arith.muli %arg0, %c3_i32_132 : i32
    %c2_i32 = arith.constant 2 : i32
    %260 = arith.addi %259, %c2_i32 : i32
    %c0_133 = arith.constant 0 : index
    %261 = arith.index_cast %260 : i32 to index
    %c0_134 = arith.constant 0 : index
    %c0_135 = arith.constant 0 : index
    %262 = vector.load %arg1[%c0_133, %261, %c0_134, %c0_135] : memref<2x8x16x4xf32, #tpu.memory_space<vmem>>, vector<1x3x16x4xf32>
    %263 = vector.shape_cast %262 : vector<1x3x16x4xf32> to vector<3x16x4xf32>
    %264 = arith.index_cast %260 : i32 to index
    %c0_136 = arith.constant 0 : index
    %c0_137 = arith.constant 0 : index
    %265 = vector.load %arg2[%264, %c0_136, %c0_137] : memref<8x16x4xf32, #tpu.memory_space<vmem>>, vector<3x16x4xf32>
    %266 = arith.addf %263, %265 : vector<3x16x4xf32>
    %267 = vector.extract_strided_slice %266 {offsets = [0, 0, 0], sizes = [1, 16, 4], strides = [1, 1, 1]} : vector<3x16x4xf32> to vector<1x16x4xf32>
    %268 = vector.shape_cast %267 : vector<1x16x4xf32> to vector<16x4xf32>
    %269 = vector.extract_strided_slice %266 {offsets = [1, 0, 0], sizes = [1, 16, 4], strides = [1, 1, 1]} : vector<3x16x4xf32> to vector<1x16x4xf32>
    %270 = vector.shape_cast %269 : vector<1x16x4xf32> to vector<16x4xf32>
    %271 = vector.extract_strided_slice %266 {offsets = [2, 0, 0], sizes = [1, 16, 4], strides = [1, 1, 1]} : vector<3x16x4xf32> to vector<1x16x4xf32>
    %272 = vector.shape_cast %271 : vector<1x16x4xf32> to vector<16x4xf32>
    %273 = tpu.concatenate %268, %270, %272 in 0 : vector<16x4xf32>, vector<16x4xf32>, vector<16x4xf32> -> vector<48x4xf32>
    %c1_138 = arith.constant 1 : index
    %274 = arith.index_cast %260 : i32 to index
    %c0_139 = arith.constant 0 : index
    %c0_140 = arith.constant 0 : index
    %275 = vector.load %arg1[%c1_138, %274, %c0_139, %c0_140] : memref<2x8x16x4xf32, #tpu.memory_space<vmem>>, vector<1x3x16x4xf32>
    %276 = vector.shape_cast %275 : vector<1x3x16x4xf32> to vector<3x16x4xf32>
    %277 = arith.index_cast %260 : i32 to index
    %c0_141 = arith.constant 0 : index
    %c0_142 = arith.constant 0 : index
    %278 = vector.load %arg2[%277, %c0_141, %c0_142] : memref<8x16x4xf32, #tpu.memory_space<vmem>>, vector<3x16x4xf32>
    %279 = arith.addf %276, %278 : vector<3x16x4xf32>
    %280 = vector.extract_strided_slice %279 {offsets = [0, 0, 0], sizes = [1, 16, 4], strides = [1, 1, 1]} : vector<3x16x4xf32> to vector<1x16x4xf32>
    %281 = vector.shape_cast %280 : vector<1x16x4xf32> to vector<16x4xf32>
    %282 = vector.extract_strided_slice %279 {offsets = [1, 0, 0], sizes = [1, 16, 4], strides = [1, 1, 1]} : vector<3x16x4xf32> to vector<1x16x4xf32>
    %283 = vector.shape_cast %282 : vector<1x16x4xf32> to vector<16x4xf32>
    %284 = vector.extract_strided_slice %279 {offsets = [2, 0, 0], sizes = [1, 16, 4], strides = [1, 1, 1]} : vector<3x16x4xf32> to vector<1x16x4xf32>
    %285 = vector.shape_cast %284 : vector<1x16x4xf32> to vector<16x4xf32>
    %286 = tpu.concatenate %281, %283, %285 in 0 : vector<16x4xf32>, vector<16x4xf32>, vector<16x4xf32> -> vector<48x4xf32>
    %287 = tpu.concatenate %273, %286 in 1 : vector<48x4xf32>, vector<48x4xf32> -> vector<48x8xf32>
    %288 = arith.truncf %287 : vector<48x8xf32> to vector<48x8xbf16>
    %cst_143 = arith.constant dense<0.000000e+00> : vector<48x8xf32>
    %289 = tpu.matmul %0, %288, %cst_143 {dimension_numbers = #tpu.dot_dimension_numbers<[1], [0], [0], [1], [0, 0, 1, 1], [], []>} : vector<48x48xbf16>, vector<48x8xbf16>, vector<48x8xf32> -> vector<48x8xf32>
    %290 = vector.extract_strided_slice %289 {offsets = [0, 0], sizes = [48, 4], strides = [1, 1]} : vector<48x8xf32> to vector<48x4xf32>
    %291 = vector.extract_strided_slice %289 {offsets = [0, 4], sizes = [48, 4], strides = [1, 1]} : vector<48x8xf32> to vector<48x4xf32>
    %292 = tpu.concatenate %290, %291 in 0 : vector<48x4xf32>, vector<48x4xf32> -> vector<96x4xf32>
    %293 = arith.truncf %292 : vector<96x4xf32> to vector<96x4xbf16>
    %c2 = arith.constant 2 : index
    %c0_144 = arith.constant 0 : index
    %c0_145 = arith.constant 0 : index
    %294 = vector.load %arg4[%c2, %c0_144, %c0_145] : memref<3x4x32xbf16, #tpu.memory_space<vmem>>, vector<1x4x32xbf16>
    %295 = vector.shape_cast %294 : vector<1x4x32xbf16> to vector<4x32xbf16>
    %cst_146 = arith.constant dense<0.000000e+00> : vector<96x32xf32>
    %296 = tpu.matmul %293, %295, %cst_146 {dimension_numbers = #tpu.dot_dimension_numbers<[1], [0], [0], [1], [0, 0, 1, 1], [], []>} : vector<96x4xbf16>, vector<4x32xbf16>, vector<96x32xf32> -> vector<96x32xf32>
    %c2_147 = arith.constant 2 : index
    %c0_148 = arith.constant 0 : index
    %c0_149 = arith.constant 0 : index
    %297 = vector.load %arg6[%c2_147, %c0_148, %c0_149] : memref<3x1x32xf32, #tpu.memory_space<vmem>>, vector<1x1x32xf32>
    %298 = vector.shape_cast %297 : vector<1x1x32xf32> to vector<1x32xf32>
    %299 = vector.broadcast %298 : vector<1x32xf32> to vector<96x32xf32>
    %300 = arith.addf %296, %299 : vector<96x32xf32>
    %c2_150 = arith.constant 2 : index
    %c0_151 = arith.constant 0 : index
    %c0_152 = arith.constant 0 : index
    %301 = vector.load %arg5[%c2_150, %c0_151, %c0_152] : memref<3x4x32xbf16, #tpu.memory_space<vmem>>, vector<1x4x32xbf16>
    %302 = vector.shape_cast %301 : vector<1x4x32xbf16> to vector<4x32xbf16>
    %cst_153 = arith.constant dense<0.000000e+00> : vector<96x32xf32>
    %303 = tpu.matmul %293, %302, %cst_153 {dimension_numbers = #tpu.dot_dimension_numbers<[1], [0], [0], [1], [0, 0, 1, 1], [], []>} : vector<96x4xbf16>, vector<4x32xbf16>, vector<96x32xf32> -> vector<96x32xf32>
    %c2_154 = arith.constant 2 : index
    %c0_155 = arith.constant 0 : index
    %c0_156 = arith.constant 0 : index
    %304 = vector.load %arg7[%c2_154, %c0_155, %c0_156] : memref<3x1x32xf32, #tpu.memory_space<vmem>>, vector<1x1x32xf32>
    %305 = vector.shape_cast %304 : vector<1x1x32xf32> to vector<1x32xf32>
    %306 = vector.broadcast %305 : vector<1x32xf32> to vector<96x32xf32>
    %307 = arith.addf %303, %306 : vector<96x32xf32>
    %308 = arith.negf %307 : vector<96x32xf32>
    %309 = math.exp %308 : vector<96x32xf32>
    %cst_157 = arith.constant 1.000000e+00 : f32
    %310 = vector.broadcast %cst_157 : f32 to vector<96x32xf32>
    %311 = arith.addf %310, %309 : vector<96x32xf32>
    %312 = arith.divf %310, %311 : vector<96x32xf32>
    %313 = arith.mulf %300, %312 : vector<96x32xf32>
    %314 = vector.extract_strided_slice %313 {offsets = [16, 0], sizes = [16, 32], strides = [1, 1]} : vector<96x32xf32> to vector<16x32xf32>
    %315 = vector.extract_strided_slice %313 {offsets = [64, 0], sizes = [16, 32], strides = [1, 1]} : vector<96x32xf32> to vector<16x32xf32>
    %316 = arith.truncf %313 : vector<96x32xf32> to vector<96x32xbf16>
    %317 = vector.extract_strided_slice %316 {offsets = [0, 0], sizes = [48, 32], strides = [1, 1]} : vector<96x32xbf16> to vector<48x32xbf16>
    %318 = vector.extract_strided_slice %316 {offsets = [48, 0], sizes = [48, 32], strides = [1, 1]} : vector<96x32xbf16> to vector<48x32xbf16>
    %319 = tpu.concatenate %317, %318 in 1 : vector<48x32xbf16>, vector<48x32xbf16> -> vector<48x64xbf16>
    %cst_158 = arith.constant dense<0.000000e+00> : vector<48x64xf32>
    %320 = tpu.matmul %0, %319, %cst_158 {dimension_numbers = #tpu.dot_dimension_numbers<[1], [0], [0], [1], [0, 0, 1, 1], [], []>} : vector<48x48xbf16>, vector<48x64xbf16>, vector<48x64xf32> -> vector<48x64xf32>
    %321 = vector.extract_strided_slice %320 {offsets = [0, 0], sizes = [48, 32], strides = [1, 1]} : vector<48x64xf32> to vector<48x32xf32>
    %322 = vector.extract_strided_slice %320 {offsets = [0, 32], sizes = [48, 32], strides = [1, 1]} : vector<48x64xf32> to vector<48x32xf32>
    %323 = tpu.concatenate %321, %322 in 0 : vector<48x32xf32>, vector<48x32xf32> -> vector<96x32xf32>
    %324 = arith.truncf %323 : vector<96x32xf32> to vector<96x32xbf16>
    %c2_159 = arith.constant 2 : index
    %c0_160 = arith.constant 0 : index
    %c0_161 = arith.constant 0 : index
    %325 = vector.load %arg8[%c2_159, %c0_160, %c0_161] : memref<3x32x32xbf16, #tpu.memory_space<vmem>>, vector<1x32x32xbf16>
    %326 = vector.shape_cast %325 : vector<1x32x32xbf16> to vector<32x32xbf16>
    %cst_162 = arith.constant dense<0.000000e+00> : vector<96x32xf32>
    %327 = tpu.matmul %324, %326, %cst_162 {dimension_numbers = #tpu.dot_dimension_numbers<[1], [0], [0], [1], [0, 0, 1, 1], [], []>} : vector<96x32xbf16>, vector<32x32xbf16>, vector<96x32xf32> -> vector<96x32xf32>
    %c2_163 = arith.constant 2 : index
    %c0_164 = arith.constant 0 : index
    %c0_165 = arith.constant 0 : index
    %328 = vector.load %arg10[%c2_163, %c0_164, %c0_165] : memref<3x1x32xf32, #tpu.memory_space<vmem>>, vector<1x1x32xf32>
    %329 = vector.shape_cast %328 : vector<1x1x32xf32> to vector<1x32xf32>
    %330 = vector.broadcast %329 : vector<1x32xf32> to vector<96x32xf32>
    %331 = arith.addf %327, %330 : vector<96x32xf32>
    %c2_166 = arith.constant 2 : index
    %c0_167 = arith.constant 0 : index
    %c0_168 = arith.constant 0 : index
    %332 = vector.load %arg9[%c2_166, %c0_167, %c0_168] : memref<3x32x32xbf16, #tpu.memory_space<vmem>>, vector<1x32x32xbf16>
    %333 = vector.shape_cast %332 : vector<1x32x32xbf16> to vector<32x32xbf16>
    %cst_169 = arith.constant dense<0.000000e+00> : vector<96x32xf32>
    %334 = tpu.matmul %324, %333, %cst_169 {dimension_numbers = #tpu.dot_dimension_numbers<[1], [0], [0], [1], [0, 0, 1, 1], [], []>} : vector<96x32xbf16>, vector<32x32xbf16>, vector<96x32xf32> -> vector<96x32xf32>
    %c2_170 = arith.constant 2 : index
    %c0_171 = arith.constant 0 : index
    %c0_172 = arith.constant 0 : index
    %335 = vector.load %arg11[%c2_170, %c0_171, %c0_172] : memref<3x1x32xf32, #tpu.memory_space<vmem>>, vector<1x1x32xf32>
    %336 = vector.shape_cast %335 : vector<1x1x32xf32> to vector<1x32xf32>
    %337 = vector.broadcast %336 : vector<1x32xf32> to vector<96x32xf32>
    %338 = arith.addf %334, %337 : vector<96x32xf32>
    %339 = arith.negf %338 : vector<96x32xf32>
    %340 = math.exp %339 : vector<96x32xf32>
    %cst_173 = arith.constant 1.000000e+00 : f32
    %341 = vector.broadcast %cst_173 : f32 to vector<96x32xf32>
    %342 = arith.addf %341, %340 : vector<96x32xf32>
    %343 = arith.divf %341, %342 : vector<96x32xf32>
    %344 = arith.mulf %331, %343 : vector<96x32xf32>
    %345 = vector.extract_strided_slice %344 {offsets = [16, 0], sizes = [16, 32], strides = [1, 1]} : vector<96x32xf32> to vector<16x32xf32>
    %346 = arith.maximumf %314, %345 : vector<16x32xf32>
    %347 = vector.extract_strided_slice %344 {offsets = [64, 0], sizes = [16, 32], strides = [1, 1]} : vector<96x32xf32> to vector<16x32xf32>
    %348 = arith.maximumf %315, %347 : vector<16x32xf32>
    %349 = arith.truncf %344 : vector<96x32xf32> to vector<96x32xbf16>
    %350 = vector.extract_strided_slice %349 {offsets = [0, 0], sizes = [48, 32], strides = [1, 1]} : vector<96x32xbf16> to vector<48x32xbf16>
    %351 = vector.extract_strided_slice %349 {offsets = [48, 0], sizes = [48, 32], strides = [1, 1]} : vector<96x32xbf16> to vector<48x32xbf16>
    %352 = tpu.concatenate %350, %351 in 1 : vector<48x32xbf16>, vector<48x32xbf16> -> vector<48x64xbf16>
    %cst_174 = arith.constant dense<0.000000e+00> : vector<48x64xf32>
    %353 = tpu.matmul %0, %352, %cst_174 {dimension_numbers = #tpu.dot_dimension_numbers<[1], [0], [0], [1], [0, 0, 1, 1], [], []>} : vector<48x48xbf16>, vector<48x64xbf16>, vector<48x64xf32> -> vector<48x64xf32>
    %354 = vector.extract_strided_slice %353 {offsets = [0, 0], sizes = [48, 32], strides = [1, 1]} : vector<48x64xf32> to vector<48x32xf32>
    %355 = vector.extract_strided_slice %353 {offsets = [0, 32], sizes = [48, 32], strides = [1, 1]} : vector<48x64xf32> to vector<48x32xf32>
    %356 = tpu.concatenate %354, %355 in 0 : vector<48x32xf32>, vector<48x32xf32> -> vector<96x32xf32>
    %357 = arith.truncf %356 : vector<96x32xf32> to vector<96x32xbf16>
    %c2_175 = arith.constant 2 : index
    %c0_176 = arith.constant 0 : index
    %c0_177 = arith.constant 0 : index
    %358 = vector.load %arg12[%c2_175, %c0_176, %c0_177] : memref<3x32x32xbf16, #tpu.memory_space<vmem>>, vector<1x32x32xbf16>
    %359 = vector.shape_cast %358 : vector<1x32x32xbf16> to vector<32x32xbf16>
    %cst_178 = arith.constant dense<0.000000e+00> : vector<96x32xf32>
    %360 = tpu.matmul %357, %359, %cst_178 {dimension_numbers = #tpu.dot_dimension_numbers<[1], [0], [0], [1], [0, 0, 1, 1], [], []>} : vector<96x32xbf16>, vector<32x32xbf16>, vector<96x32xf32> -> vector<96x32xf32>
    %c2_179 = arith.constant 2 : index
    %c0_180 = arith.constant 0 : index
    %c0_181 = arith.constant 0 : index
    %361 = vector.load %arg14[%c2_179, %c0_180, %c0_181] : memref<3x1x32xf32, #tpu.memory_space<vmem>>, vector<1x1x32xf32>
    %362 = vector.shape_cast %361 : vector<1x1x32xf32> to vector<1x32xf32>
    %363 = vector.broadcast %362 : vector<1x32xf32> to vector<96x32xf32>
    %364 = arith.addf %360, %363 : vector<96x32xf32>
    %c2_182 = arith.constant 2 : index
    %c0_183 = arith.constant 0 : index
    %c0_184 = arith.constant 0 : index
    %365 = vector.load %arg13[%c2_182, %c0_183, %c0_184] : memref<3x32x32xbf16, #tpu.memory_space<vmem>>, vector<1x32x32xbf16>
    %366 = vector.shape_cast %365 : vector<1x32x32xbf16> to vector<32x32xbf16>
    %cst_185 = arith.constant dense<0.000000e+00> : vector<96x32xf32>
    %367 = tpu.matmul %357, %366, %cst_185 {dimension_numbers = #tpu.dot_dimension_numbers<[1], [0], [0], [1], [0, 0, 1, 1], [], []>} : vector<96x32xbf16>, vector<32x32xbf16>, vector<96x32xf32> -> vector<96x32xf32>
    %c2_186 = arith.constant 2 : index
    %c0_187 = arith.constant 0 : index
    %c0_188 = arith.constant 0 : index
    %368 = vector.load %arg15[%c2_186, %c0_187, %c0_188] : memref<3x1x32xf32, #tpu.memory_space<vmem>>, vector<1x1x32xf32>
    %369 = vector.shape_cast %368 : vector<1x1x32xf32> to vector<1x32xf32>
    %370 = vector.broadcast %369 : vector<1x32xf32> to vector<96x32xf32>
    %371 = arith.addf %367, %370 : vector<96x32xf32>
    %372 = arith.negf %371 : vector<96x32xf32>
    %373 = math.exp %372 : vector<96x32xf32>
    %cst_189 = arith.constant 1.000000e+00 : f32
    %374 = vector.broadcast %cst_189 : f32 to vector<96x32xf32>
    %375 = arith.addf %374, %373 : vector<96x32xf32>
    %376 = arith.divf %374, %375 : vector<96x32xf32>
    %377 = arith.mulf %364, %376 : vector<96x32xf32>
    %378 = vector.extract_strided_slice %377 {offsets = [16, 0], sizes = [16, 32], strides = [1, 1]} : vector<96x32xf32> to vector<16x32xf32>
    %379 = arith.maximumf %346, %378 : vector<16x32xf32>
    %380 = vector.extract_strided_slice %377 {offsets = [64, 0], sizes = [16, 32], strides = [1, 1]} : vector<96x32xf32> to vector<16x32xf32>
    %381 = arith.maximumf %348, %380 : vector<16x32xf32>
    %c0_190 = arith.constant 0 : index
    %c2_191 = arith.constant 2 : index
    %c0_192 = arith.constant 0 : index
    %c0_193 = arith.constant 0 : index
    %382 = vector.load %arg16[%c0_190, %c2_191, %c0_192, %c0_193] : memref<2x3x16x32xf32, #tpu.memory_space<vmem>>, vector<1x1x16x32xf32>
    %383 = vector.shape_cast %382 : vector<1x1x16x32xf32> to vector<16x32xf32>
    %384 = vector.shape_cast %379 : vector<16x32xf32> to vector<1x1x16x32xf32>
    tpu.vector_store %arg16[%c0_190, %c2_191, %c0_192, %c0_193], %384 {strides = array<i32>} : memref<2x3x16x32xf32, #tpu.memory_space<vmem>>, vector<1x1x16x32xf32>,
    %c1_194 = arith.constant 1 : index
    %c2_195 = arith.constant 2 : index
    %c0_196 = arith.constant 0 : index
    %c0_197 = arith.constant 0 : index
    %385 = vector.load %arg16[%c1_194, %c2_195, %c0_196, %c0_197] : memref<2x3x16x32xf32, #tpu.memory_space<vmem>>, vector<1x1x16x32xf32>
    %386 = vector.shape_cast %385 : vector<1x1x16x32xf32> to vector<16x32xf32>
    %387 = vector.shape_cast %381 : vector<16x32xf32> to vector<1x1x16x32xf32>
    tpu.vector_store %arg16[%c1_194, %c2_195, %c0_196, %c0_197], %387 {strides = array<i32>} : memref<2x3x16x32xf32, #tpu.memory_space<vmem>>, vector<1x1x16x32xf32>,
    return
  }
  func.func @transform_0(%arg0: i32) -> (i32, i32, i32, i32) {
    %c0_i32 = arith.constant 0 : i32
    %c0_i32_0 = arith.constant 0 : i32
    %c0_i32_1 = arith.constant 0 : i32
    %c0_i32_2 = arith.constant 0 : i32
    %c0_i32_3 = arith.constant 0 : i32
    return %c0_i32, %c0_i32_0, %c0_i32_1, %c0_i32_2 : i32, i32, i32, i32
  }
  func.func @transform_1(%arg0: i32) -> (i32, i32, i32) {
    %c0_i32 = arith.constant 0 : i32
    %c0_i32_0 = arith.constant 0 : i32
    %c0_i32_1 = arith.constant 0 : i32
    %c0_i32_2 = arith.constant 0 : i32
    return %c0_i32, %c0_i32_0, %c0_i32_1 : i32, i32, i32
  }
  func.func @transform_2(%arg0: i32) -> (i32, i32) {
    %c0_i32 = arith.constant 0 : i32
    %c0_i32_0 = arith.constant 0 : i32
    %c0_i32_1 = arith.constant 0 : i32
    return %c0_i32, %c0_i32_0 : i32, i32
  }
  func.func @transform_3(%arg0: i32) -> (i32, i32, i32) {
    %c0_i32 = arith.constant 0 : i32
    %c0_i32_0 = arith.constant 0 : i32
    %c0_i32_1 = arith.constant 0 : i32
    return %arg0, %c0_i32, %c0_i32_0 : i32, i32, i32
  }
  func.func @transform_4(%arg0: i32) -> (i32, i32, i32) {
    %c0_i32 = arith.constant 0 : i32
    %c0_i32_0 = arith.constant 0 : i32
    %c0_i32_1 = arith.constant 0 : i32
    return %arg0, %c0_i32, %c0_i32_0 : i32, i32, i32
  }
  func.func @transform_5(%arg0: i32) -> (i32, i32, i32) {
    %c0_i32 = arith.constant 0 : i32
    %c0_i32_0 = arith.constant 0 : i32
    %c0_i32_1 = arith.constant 0 : i32
    return %arg0, %c0_i32, %c0_i32_0 : i32, i32, i32
  }
  func.func @transform_6(%arg0: i32) -> (i32, i32, i32) {
    %c0_i32 = arith.constant 0 : i32
    %c0_i32_0 = arith.constant 0 : i32
    %c0_i32_1 = arith.constant 0 : i32
    return %arg0, %c0_i32, %c0_i32_0 : i32, i32, i32
  }
  func.func @transform_7(%arg0: i32) -> (i32, i32, i32) {
    %c0_i32 = arith.constant 0 : i32
    %c0_i32_0 = arith.constant 0 : i32
    %c0_i32_1 = arith.constant 0 : i32
    return %arg0, %c0_i32, %c0_i32_0 : i32, i32, i32
  }
  func.func @transform_8(%arg0: i32) -> (i32, i32, i32) {
    %c0_i32 = arith.constant 0 : i32
    %c0_i32_0 = arith.constant 0 : i32
    %c0_i32_1 = arith.constant 0 : i32
    return %arg0, %c0_i32, %c0_i32_0 : i32, i32, i32
  }
  func.func @transform_9(%arg0: i32) -> (i32, i32, i32) {
    %c0_i32 = arith.constant 0 : i32
    %c0_i32_0 = arith.constant 0 : i32
    %c0_i32_1 = arith.constant 0 : i32
    return %arg0, %c0_i32, %c0_i32_0 : i32, i32, i32
  }
  func.func @transform_10(%arg0: i32) -> (i32, i32, i32) {
    %c0_i32 = arith.constant 0 : i32
    %c0_i32_0 = arith.constant 0 : i32
    %c0_i32_1 = arith.constant 0 : i32
    return %arg0, %c0_i32, %c0_i32_0 : i32, i32, i32
  }
  func.func @transform_11(%arg0: i32) -> (i32, i32, i32) {
    %c0_i32 = arith.constant 0 : i32
    %c0_i32_0 = arith.constant 0 : i32
    %c0_i32_1 = arith.constant 0 : i32
    return %arg0, %c0_i32, %c0_i32_0 : i32, i32, i32
  }
  func.func @transform_12(%arg0: i32) -> (i32, i32, i32) {
    %c0_i32 = arith.constant 0 : i32
    %c0_i32_0 = arith.constant 0 : i32
    %c0_i32_1 = arith.constant 0 : i32
    return %arg0, %c0_i32, %c0_i32_0 : i32, i32, i32
  }
  func.func @transform_13(%arg0: i32) -> (i32, i32, i32) {
    %c0_i32 = arith.constant 0 : i32
    %c0_i32_0 = arith.constant 0 : i32
    %c0_i32_1 = arith.constant 0 : i32
    return %arg0, %c0_i32, %c0_i32_0 : i32, i32, i32
  }
  func.func @transform_14(%arg0: i32) -> (i32, i32, i32) {
    %c0_i32 = arith.constant 0 : i32
    %c0_i32_0 = arith.constant 0 : i32
    %c0_i32_1 = arith.constant 0 : i32
    return %arg0, %c0_i32, %c0_i32_0 : i32, i32, i32
  }
  func.func @transform_15(%arg0: i32) -> (i32, i32, i32, i32) {
    %c0_i32 = arith.constant 0 : i32
    %c0_i32_0 = arith.constant 0 : i32
    %c0_i32_1 = arith.constant 0 : i32
    %c0_i32_2 = arith.constant 0 : i32
    return %c0_i32, %arg0, %c0_i32_0, %c0_i32_1 : i32, i32, i32, i32
  }
}

</mosaic_0001>

<bundles_post_ra>
// kernel: stsgcl_forward.1
= control target key start
LH: loop header
LB: loop body
LE: loop exit
PB: predicated region body
PF: predicated region fallthrough
CT: control target
= control target key end

     0   :  { %s7549_s0 = inlined_call_operand.vmem [shape: f32[2,8,16,4], index: 0, kind: input, shape index: {}]   ;;  %s7550_s1 = inlined_call_operand.vmem [shape: f32[8,16,4], index: 1, kind: input, shape index: {}]   ;;  %s7551_s2 = inlined_call_operand.vmem [shape: bf16[48,48], index: 2, kind: input, shape index: {}]   ;;  %s7552_s3 = inlined_call_operand.vmem [shape: bf16[6,4,32], index: 3, kind: input, shape index: {}]   ;;  %s7553_s4 = inlined_call_operand.vmem [shape: bf16[6,4,32], index: 4, kind: input, shape index: {}]   ;;  %s7554_s5 = inlined_call_operand.vmem [shape: f32[6,1,32], index: 5, kind: input, shape index: {}]   ;;  %s7555_s6 = inlined_call_operand.vmem [shape: f32[6,1,32], index: 6, kind: input, shape index: {}]   ;;  %s7556_s7 = inlined_call_operand.vmem [shape: bf16[6,32,32], index: 7, kind: input, shape index: {}]   ;;  %s7557_s8 = inlined_call_operand.vmem [shape: bf16[6,32,32], index: 8, kind: input, shape index: {}]   ;;  %s7558_s9 = inlined_call_operand.vmem [shape: f32[6,1,32], index: 9, kind: input, shape index: {}]   ;;  %s7559_s10 = inlined_call_operand.vmem [shape: f32[6,1,32], index: 10, kind: input, shape index: {}]   ;;  %s7560_s11 = inlined_call_operand.vmem [shape: bf16[6,32,32], index: 11, kind: input, shape index: {}]   ;;  %s7561_s12 = inlined_call_operand.vmem [shape: bf16[6,32,32], index: 12, kind: input, shape index: {}]   ;;  %s7562_s13 = inlined_call_operand.vmem [shape: f32[6,1,32], index: 13, kind: input, shape index: {}]   ;;  %s7563_s14 = inlined_call_operand.vmem [shape: f32[6,1,32], index: 14, kind: input, shape index: {}]   ;;  %s7564_s15 = inlined_call_operand.hbm [shape: f32[2,6,16,32], index: 15, kind: output, shape index: {}]  }
   0x1   :  { %7577 = sst [smem:[#allocation11_spill]] %s7549_s0 }
   0x2   :  { %7578 = sst [smem:[#allocation12_spill]] %s7550_s1 }
   0x3   :  { %7579 = sst [smem:[#allocation13_spill]] %s7552_s3 }
   0x4   :  { %7580 = sst [smem:[#allocation14_spill]] %s7553_s4 }
   0x5   :  { %7581 = sst [smem:[#allocation15_spill]] %s7554_s5 }
   0x6   :  { %7582 = sst [smem:[#allocation16_spill]] %s7555_s6 }
   0x7   :  { %7583 = sst [smem:[#allocation17_spill]] %s7556_s7 }
   0x8   :  { %7584 = sst [smem:[#allocation18_spill]] %s7557_s8 }
   0x9   :  { %7585 = sst [smem:[#allocation19_spill]] %s7558_s9 }
   0xa   :  { %7586 = sst [smem:[#allocation20_spill]] %s7559_s10 }
   0xb   :  { %7587 = sst [smem:[#allocation21_spill]] %s7560_s11 }
   0xc   :  { %7588 = sst [smem:[#allocation22_spill]] %s7561_s12 }
   0xd   :  { %20 = vsyncpa [#allocation3], 0 }
   0xe   :  { %22 = vsyncpa [#allocation3 + $0x1], 0  ;;  %s6510_s18 = smov 0   ;;  %s6512_s19 = smov 0  }
   0xf   :  { %s6514_s20 = smov 0   ;;  %s6516_s21 = smov 0  }
  0x10 LB: > { %7589 = sst [smem:[#allocation7_spill]] %s6411_s20  ;;  %s6531_s22 = sadd.s32 4294967295, %s6415_s21   ;;  %s6415_s21 = sphi %s6516_s21, %s7614_s21   ;;  %s6411_s20 = sphi %s6514_s20, %s7616_s20   ;;  %s6407_s19 = sphi %s6512_s19, %s7618_s19   ;;  %s6403_s18 = sphi %s6510_s18, %s7617_s18  }
  0x11   : > { %s4737_s23 = sadd.s32 4294967294, %s6415_s21   ;;  %s6535_s24 = sadd.s32 1, %s6415_s21  }
  0x12   : > { %7590 = sst [smem:[#allocation8_spill]] %s6535_s24  ;;  %s410_s25 = sadd.s32 1, %s6411_s20 }
  0x13   : > { %s407_s26 = ssub.s32 %s6415_s21, %s6535_s24  ;;  %p420_p0 = scmp.ne.s32.totalorder %s6411_s20, %s6407_s19 }
  0x14   : > { %p408_p1 = scmp.eq.s32.totalorder %s407_s26, 0  ;;  %p421_p2 = scmp.eq.s32.totalorder %s6531_s22, 1 }
  0x15   : > { %p426_p3 = scmp.ne.s32.totalorder %s6407_s19, %s6403_s18  ;;  %p427_p4 = scmp.eq.s32.totalorder %s4737_s23, 1 }
  0x16   : > { %s6546_s27 = scalar_select %p408_p1, %s6411_s20, %s410_s25  }
  0x17   : > { %p6548_p5 = por %p421_p2, %p420_p0  ;;  %p6552_p6 = por %p427_p4, %p426_p3 }
  0x18   : > { %7591 = sst [smem:[#allocation9_spill]] %s6546_s27  ;;  %p4740_p7 = scmp.ge.s32.totalorder %s6415_s21, 1 }
  0x19   : > { %s7593_s29 = scalar_select %p6552_p6, 1, 0 }
  0x1a   : > { %p560_p8 = scmp.lt.s32.totalorder %s6415_s21, 3 }
  0x1b   : > { %7594 = sst [smem:[#allocation10_spill]] %s7593_s29 }
  0x1c   : > { %p561_p9 = pnand %p4740_p7, %p560_p8 }
  0x1d   : > { %s4751_s30 = smul.u32 (!%p561_p9), 48, %s6531_s22  ;;  %v6417_v0 = vmov (!%p561_p9), 0.0   ;;  %s7595_s0 = sld [smem:[#allocation11_spill]] (!%p561_p9)  ;;  %vm6419_vm0 = vmmov (!%p561_p9), 0   ;;  %vm799_vm1 = vcmask (!%p561_p9), 31744   ;;  %v6604_v52 = vld [vmem:[%s7551_s2] sm:$0xff] (!%p561_p9)  }
  0x1e   : > { %564 = sbr.rel (%p561_p9) target bundleno = 5860 (0x16e4), region = 80  ;;  %5325 = vmatprep.subr.bf16.mxu0 (!%p561_p9), %v6417_v0  ;;  %s7596_s1 = sld [smem:[#allocation12_spill]] (!%p561_p9)  ;;  %5331 = vmatprep.mubr.msk.bf16.mxu0 (!%p561_p9), %vm6419_vm0, %v6417_v0  ;;  %vm824_vm2 = vcmask (!%p561_p9), 392192   ;;  %v6614_v53 = vld [vmem:[%s7551_s2 + $0x8] sm:$0xff] (!%p561_p9)   ;;  %v6623_v54 = vld [vmem:[%s7551_s2 + $0x10] sm:$0xff] (!%p561_p9)   ;;  %vm947_vm3 = vcmask (!%p561_p9), 1041408  }
  0x1f   : > { %s661_s25 = smul.u32 (!%p561_p9), 3, %s6531_s22  ;;  %s7597_s3 = sld [smem:[#allocation13_spill]] (!%p561_p9)  ;;  %vm1223_vm4 = vcmask (!%p561_p9), 261120  }
  0x20   : > { %s7598_s4 = sld [smem:[#allocation14_spill]] (!%p561_p9)  ;;  %s7599_s6 = sld [smem:[#allocation16_spill]] (!%p561_p9) }
  0x21   : > { %p662_p10 = scmp.lt.s32.totalorder (!%p561_p9), %s661_s25, 5  ;;  %s7600_s5 = sld [smem:[#allocation15_spill]] (!%p561_p9) }
  0x22   : > { %s7570_s17 = smov (!%p561_p9), 32   ;;  %s7601_s7 = sld [smem:[#allocation17_spill]] (!%p561_p9) }
  0x23   : > { %s6563_s23 = scalar_lea.vmem (!%p561_p9), %s7595_s0, %s4751_s30  ;;  %s7568_s0 = smov (!%p561_p9), 124  }
  0x24   : > { %s6568_s27 = scalar_lea.vmem (!%p561_p9), %s7596_s1, %s4751_s30  ;;  %v4752_v3 = vld [vmem:[%s6563_s23 + $0x80] sm:$0xff] (!%p561_p9)  ;;  %v4753_v4 = vld [vmem:[%s6563_s23 + $0x88] sm:$0xff] (!%p561_p9)  ;;  %v4754_v9 = vld [vmem:[%s6563_s23 + $0x90] sm:$0xff] (!%p561_p9)  ;;  %s7565_s30 = smov (!%p561_p9), 4  }
  0x25   : > { %v749_v1 = vld [vmem:[%s6568_s27] sm:$0xff]  ;;  %v750_v2 = vld [vmem:[%s6568_s27 + $0x8] sm:$0xff]  ;;  %v751_v7 = vld [vmem:[%s6568_s27 + $0x10] sm:$0xff]  ;;  %s7620_s25 = smov (!%p662_p10, %s661_s25), 5  ;;  %s7602_s8 = sld [smem:[#allocation18_spill]] }
  0x26   : > { %v769_v5 = vadd.f32 %v4752_v3, %v749_v1  ;;  %v770_v6 = vadd.f32 %v4753_v4, %v750_v2  ;;  %v752_v8 = vld [vmem:[%s6568_s27 + $0x18] sm:$0xff]  ;;  %v771_v11 = vadd.f32 %v4754_v9, %v751_v7  ;;  %v753_v14 = vld [vmem:[%s6568_s27 + $0x20] sm:$0xff]  ;;  %v754_v15 = vld [vmem:[%s6568_s27 + $0x28] sm:$0xff]  ;;  %s4741_s26 = sshll.u32 %s7620_s25, 1  ;;  %s6692_s16 = scalar_lea.vmem %s7599_s6, %s7620_s25 }
  0x27   : > { %v4755_v10 = vld [vmem:[%s6563_s23 + $0x98] sm:$0xff]  ;;  %v4756_v16 = vld [vmem:[%s6563_s23 + $0xa0] sm:$0xff]  ;;  %v4757_v17 = vld [vmem:[%s6563_s23 + $0xa8] sm:$0xff]  ;;  %s6636_s1 = scalar_lea.vmem %s7597_s3, %s4741_s26  ;;  %s6644_s20 = scalar_lea.vmem %s7598_s4, %s4741_s26 }
  0x28   : > { %v5832_v12 = vpack.i.bf16 %v770_v6, %v769_v5  ;;  %v772_v13 = vadd.f32 %v4755_v10, %v752_v8  ;;  %v773_v18 = vadd.f32 %v4756_v16, %v753_v14  ;;  %v774_v20 = vadd.f32 %v4757_v17, %v754_v15  ;;  %v742_v22 = vld [vmem:[%s6563_s23] sm:$0xff]  ;;  %v743_v23 = vld [vmem:[%s6563_s23 + $0x8] sm:$0xff]  ;;  %v744_v26 = vld [vmem:[%s6563_s23 + $0x10] sm:$0xff]  ;;  %s6699_s26 = scalar_lea.vmem %s7600_s5, %s7620_s25  ;;  %s7603_s10 = sld [smem:[#allocation20_spill]] }
  0x29   : > { %v755_v24 = vadd.f32 %v749_v1, %v742_v22  ;;  %v756_v25 = vadd.f32 %v750_v2, %v743_v23  ;;  %v745_v27 = vld [vmem:[%s6563_s23 + $0x18] sm:$0xff]  ;;  %v746_v28 = vld [vmem:[%s6563_s23 + $0x20] sm:$0xff]  ;;  %v747_v29 = vld [vmem:[%s6563_s23 + $0x28] sm:$0xff]  ;;  %v757_v33 = vadd.f32 %v751_v7, %v744_v26  ;;  %s7604_s9 = sld [smem:[#allocation19_spill]]  ;;  %s7605_s4 = smov 32  }
  0x2a   : > { %5833 = vrot.lane.b32.xlu0 %v5832_v12, %s7565_s30  ;;  %v5837_v19 = vpack.i.bf16 %v772_v13, %v771_v11  ;;  %v5842_v21 = vpack.i.bf16 %v774_v20, %v773_v18  ;;  %v758_v34 = vadd.f32 %v752_v8, %v745_v27  ;;  %v759_v35 = vadd.f32 %v753_v14, %v746_v28  ;;  %v921_v55 = vld [vmem:[%s6636_s1] sm:$0x3]  ;;  %s7606_s11 = sld [smem:[#allocation21_spill]]  ;;  %s7607_s12 = sld [smem:[#allocation22_spill]] }
  0x2b   : > { %v760_v36 = vadd.f32 %v754_v15, %v747_v29  ;;  %5767 = vmatprep.subr.msk.bf16.mxu1 %vm947_vm3, %v921_v55  ;;  %v949_v56 = vsel %vm947_vm3, %v921_v55, 0  ;;  %v1032_v63 = vld [vmem:[%s6644_s20] sm:$0x3] }
  0x2c   : > { %5843 = vrot.lane.b32.xlu1 %v5842_v21, %s7565_s30  ;;  %5344 = vmatpush3.bf16.msra.mxu1 %v949_v56  ;;  %v1041_v7 = vsel %vm947_vm3, %v1032_v63, 0 }
  0x2d   : > { %5768 = vmatprep.subr.msk.bf16.mxu1 %vm947_vm3, %v1032_v63 }
  0x2e   : > { %5838 = vrot.lane.b32.xlu0 %v5837_v19, %s7565_s30  ;;  %s6745_s30 = sshll.u32 %s7620_s25, 4 }
  0x2f   : > { %s6751_s3 = scalar_lea.vmem %s7601_s7, %s6745_s30  ;;  %s6759_s6 = scalar_lea.vmem %s7602_s8, %s6745_s30 }
  0x30   : > { %s6869_s8 = scalar_lea.vmem %s7606_s11, %s6745_s30  ;;  %s6875_s24 = scalar_lea.vmem %s7607_s12, %s6745_s30 }
  0x31   : > { %s7608_s7 = smov 4   ;;  %s6958_s11 = scalar_lea.vmem %s7563_s14, %s7620_s25 }
  0x32   : > { %s7610_s30 = sand.u32 1, %s6407_s19   ;;  %s7611_s12 = smov 124  }
  0x33   : > { %s5773_s5 = smul.u32 96, %s7610_s30 }
  0x9c   : > { %v5834_v30 = vpop.permute.xlu0 %5833 }
  0x9d   : > { %v5836_v31 = vunpack.i.h.bf16 %v5834_v30  ;;  %v5835_v32 = vunpack.i.l.bf16 %v5834_v30 }
  0x9e   : > { %v5844_v41 = vpop.permute.xlu1 %5843 }
  0x9f   : > { %v800_v37 = vsel %vm799_vm1, %v755_v24, %v5835_v32  ;;  %v801_v38 = vsel %vm799_vm1, %v756_v25, %v5836_v31  ;;  %v5846_v44 = vunpack.i.h.bf16 %v5844_v41  ;;  %v5845_v45 = vunpack.i.l.bf16 %v5844_v41 }
  0xa0   : > { %v5839_v39 = vpop.permute.xlu0 %5838  ;;  %v806_v40 = vpack.c.bf16 %v801_v38, %v800_v37  ;;  %v4771_v38 = vld [vmem:[%s6692_s16] ss:$0 sm:$0xff] }
  0xa1   : > { %v5841_v42 = vunpack.i.h.bf16 %v5839_v39  ;;  %v5840_v43 = vunpack.i.l.bf16 %v5839_v39  ;;  %v804_v48 = vsel %vm799_vm1, %v759_v35, %v5845_v45  ;;  %v805_v49 = vsel %vm799_vm1, %v760_v36, %v5846_v44 }
  0xa2   : > { %5326 = vmatpush3.bf16.msra.mxu0 %v806_v40  ;;  %v808_v51 = vpack.c.bf16 %v805_v49, %v804_v48 }
  0xa3   : > { %5327 = vmatprep.subr.bf16.mxu0 %v6417_v0  ;;  %v802_v46 = vsel %vm799_vm1, %v757_v33, %v5840_v43  ;;  %v803_v47 = vsel %vm799_vm1, %v758_v34, %v5841_v42 }
  0xa4   : > { %v807_v50 = vpack.c.bf16 %v803_v47, %v802_v46 }
  0xa6   : > { %5328 = vmatpush3.bf16.msra.mxu0 %v807_v50 }
  0xa7   : > { %5329 = vmatprep.subr.bf16.mxu0 %v6417_v0 }
  0xaa   : > { %5330 = vmatpush3.bf16.msra.mxu0 %v808_v51 }
  0xab   : > { %5371 = vmatprep.subr.bf16.mxu0 %v6417_v0 }
  0xad   : > { %5332 = vmatmul.mubr.msk.bf16.vlgmr.msra.gmra.mrb[0].mxu0 %vm824_vm2, %v6604_v52 }
  0xae   : > { %5335 = vmatprep.mubr.msk.bf16.mxu0 %vm6419_vm0, %v6417_v0 }
  0xb5   : > { %5336 = vmatmul.mubr.msk.bf16.gmra.mrb[4].mxu0 %vm824_vm2, %v6614_v53 }
  0xb6   : > { %5339 = vmatprep.mubr.msk.bf16.mxu0 %vm6419_vm0, %v6417_v0 }
  0xbd   : > { %5340 = vmatmul.mubr.msk.bf16.gmra.mrb[8].mxu0 %vm824_vm2, %v6623_v54 }
  0xbe   : > { %5377 = vmatprep.mubr.msk.bf16.mxu0 %vm6419_vm0, %v6417_v0 }
 0x180   : > { %v868_v57 = vpop.f32.mrb[0].mxu0 }
 0x181   : > { %v5333_v58 = vpop.f32.mrb[1].mxu0 }
 0x182   : > { %v871_v59 = vpop.f32.mrb[2].mxu0 }
 0x183   : > { %v5847_v60 = vpack.i.bf16 %v871_v59, %v868_v57  ;;  %v5334_v61 = vpop.f32.mrb[3].mxu0  ;;  %v915_v62 = vpack.c.bf16 %v871_v59, %v868_v57 }
 0x185   : > { %5848 = vrot.lane.b32.xlu1 %v5847_v60, %s7568_s0  ;;  %5345 = vmatprep.mubr.msk.bf16.mxu1 %vm799_vm1, %v915_v62 }
 0x188   : > { %v876_v1 = vpop.f32.mrb[4].mxu0 }
 0x189   : > { %v5337_v2 = vpop.f32.mrb[5].mxu0 }
 0x18a   : > { %v879_v3 = vpop.f32.mrb[6].mxu0 }
 0x18b   : > { %v5852_v4 = vpack.i.bf16 %v879_v3, %v876_v1  ;;  %v916_v5 = vpack.c.bf16 %v879_v3, %v876_v1  ;;  %v5338_v6 = vpop.f32.mrb[7].mxu0 }
 0x18d   : > { %5853 = vrot.lane.b32.xlu0 %v5852_v4, %s7568_s0  ;;  %5346 = vmatmul.mubr.msk.bf16.vlgmr.msra.gmra.mrb[0].mxu1 %vm799_vm1, %v916_v5 }
 0x18e   : > { %5358 = vmatpush3.bf16.msra.mxu1 %v1041_v7 }
 0x190   : > { %v884_v8 = vpop.f32.mrb[8].mxu0 }
 0x191   : > { %v5341_v9 = vpop.f32.mrb[9].mxu0 }
 0x192   : > { %v887_v10 = vpop.f32.mrb[10].mxu0 }
 0x193   : > { %v5857_v11 = vpack.i.bf16 %v887_v10, %v884_v8  ;;  %v917_v12 = vpack.c.bf16 %v887_v10, %v884_v8  ;;  %v5342_v13 = vpop.f32.mrb[11].mxu0 }
 0x195   : > { %5858 = vrot.lane.b32.xlu1 %v5857_v11, %s7568_s0  ;;  %5349 = vmatprep.mubr.msk.bf16.mxu1 %vm799_vm1, %v917_v12  ;;  %s7572_s0 = smov 96  }
 0x1f7   : > { %v5849_v14 = vpop.permute.xlu1 %5848 }
 0x1f8   : > { %v5851_v15 = vunpack.i.h.bf16 %v5849_v14  ;;  %v5850_v16 = vunpack.i.l.bf16 %v5849_v14 }
 0x1fa   : > { %v918_v17 = vpack.c.bf16 %v5851_v15, %v5850_v16 }
 0x1fc   : > { %5350 = vmatmul.mubr.msk.bf16.gmra.mrb[4].mxu1 %vm799_vm1, %v918_v17 }
 0x1ff   : > { %v5854_v18 = vpop.permute.xlu0 %5853 }
 0x200   : > { %v5856_v19 = vunpack.i.h.bf16 %v5854_v18  ;;  %v5855_v20 = vunpack.i.l.bf16 %v5854_v18 }
 0x202   : > { %v919_v21 = vpack.c.bf16 %v5856_v19, %v5855_v20 }
 0x204   : > { %5353 = vmatprep.mubr.msk.bf16.mxu1 %vm799_vm1, %v919_v21 }
 0x207   : > { %v5859_v22 = vpop.permute.xlu1 %5858 }
 0x208   : > { %v5861_v23 = vunpack.i.h.bf16 %v5859_v22  ;;  %v5860_v24 = vunpack.i.l.bf16 %v5859_v22 }
 0x20a   : > { %v920_v25 = vpack.c.bf16 %v5861_v23, %v5860_v24 }
 0x20c   : > { %5354 = vmatmul.mubr.msk.bf16.gmra.mrb[8].mxu1 %vm799_vm1, %v920_v25 }
 0x20d   : > { %5359 = vmatprep.mubr.msk.bf16.mxu1 %vm799_vm1, %v915_v62 }
 0x214   : > { %5360 = vmatmul.mubr.msk.bf16.vlgmr.msra.gmra.mrb[12].mxu1 %vm799_vm1, %v916_v5 }
 0x215   : > { %5363 = vmatprep.mubr.msk.bf16.mxu1 %vm799_vm1, %v917_v12 }
 0x21c   : > { %5364 = vmatmul.mubr.msk.bf16.gmra.mrb[16].mxu1 %vm799_vm1, %v918_v17 }
 0x21d   : > { %5367 = vmatprep.mubr.msk.bf16.mxu1 %vm799_vm1, %v919_v21 }
 0x224   : > { %5368 = vmatmul.mubr.msk.bf16.gmra.mrb[20].mxu1 %vm799_vm1, %v920_v25  ;;  %v4764_v25 = vld [vmem:[%s6699_s26] ss:$0 sm:$0xff] }
 0x260   : > { %v6664_v26 = vpop.f32.mrb[0].mxu1 }
 0x261   : > { %v6666_v27 = vpop.f32.mrb[1].mxu1 }
 0x262   : > { %v6668_v28 = vpop.f32.mrb[2].mxu1 }
 0x263   : > { %v6670_v29 = vpop.f32.mrb[3].mxu1 }
 0x2cf   : > { %v6672_v30 = vpop.f32.mrb[4].mxu1 }
 0x2d0   : > { %v6674_v31 = vpop.f32.mrb[5].mxu1 }
 0x2d1   : > { %v6676_v32 = vpop.f32.mrb[6].mxu1 }
 0x2d2   : > { %v6678_v33 = vpop.f32.mrb[7].mxu1 }
 0x2df   : > { %v6680_v34 = vpop.f32.mrb[8].mxu1 }
 0x2e0   : > { %v6682_v35 = vpop.f32.mrb[9].mxu1 }
 0x2e1   : > { %v6684_v36 = vpop.f32.mrb[10].mxu1 }
 0x2e2   : > { %v6686_v37 = vpop.f32.mrb[11].mxu1 }
 0x2e7   : > { %v5361_v39 = vpop.f32.mrb[12].mxu1 }
 0x2e8   : > { %v1086_v40 = vadd.f32 %v5361_v39, %v4771_v38  ;;  %v1077_v41 = vpop.f32.mrb[13].mxu1 }
 0x2e9   : > { %v1078_v42 = vadd.f32 %v4771_v38, %v1077_v41  ;;  %v5362_v43 = vpop.f32.mrb[14].mxu1 }
 0x2ea   : > { %v4780_v44 = vmul.f32 -1.442695, %v1086_v40  ;;  %v1089_v45 = vadd.f32 %v5362_v43, %v4771_v38  ;;  %v1080_v46 = vpop.f32.mrb[15].mxu1  ;;  %v994_v43 = vadd.f32 %v6664_v26, %v4764_v25 }
 0x2eb   : > { %v4778_v47 = vmul.f32 -1.442695, %v1078_v42  ;;  %v1081_v48 = vadd.f32 %v4771_v38, %v1080_v46  ;;  %v986_v46 = vadd.f32 %v4764_v25, %v6666_v27 }
 0x2ec   : > { %6039 = vpow2.f32 %v4780_v44  ;;  %v4781_v49 = vmul.f32 -1.442695, %v1089_v45 }
 0x2ed   : > { %6041 = vpow2.f32 %v4778_v47  ;;  %v4779_v50 = vmul.f32 -1.442695, %v1081_v48  ;;  %v997_v48 = vadd.f32 %v6668_v28, %v4764_v25  ;;  %v1010_v28 = vadd.f32 %v6672_v30, %v4764_v25 }
 0x2ee   : > { %6043 = vpow2.f32 %v4781_v49 }
 0x2ef   : > { %6045 = vpow2.f32 %v4779_v50  ;;  %v5365_v51 = vpop.f32.mrb[16].mxu1 }
 0x2f0   : > { %v1102_v55 = vadd.f32 %v5365_v51, %v4771_v38  ;;  %v1093_v56 = vpop.f32.mrb[17].mxu1  ;;  %v989_v51 = vadd.f32 %v4764_v25, %v6670_v29 }
 0x2f1   : > { %v1094_v57 = vadd.f32 %v4771_v38, %v1093_v56  ;;  %v5366_v58 = vpop.f32.mrb[18].mxu1 }
 0x2f2   : > { %v4784_v59 = vmul.f32 -1.442695, %v1102_v55  ;;  %v1105_v60 = vadd.f32 %v5366_v58, %v4771_v38  ;;  %v1096_v61 = vpop.f32.mrb[19].mxu1 }
 0x2f3   : > { %v4782_v62 = vmul.f32 -1.442695, %v1094_v57  ;;  %v1097_v63 = vadd.f32 %v4771_v38, %v1096_v61 }
 0x2f4   : > { %6047 = vpow2.f32 %v4784_v59  ;;  %v4785_v1 = vmul.f32 -1.442695, %v1105_v60 }
 0x2f5   : > { %6049 = vpow2.f32 %v4782_v62  ;;  %v4783_v2 = vmul.f32 -1.442695, %v1097_v63 }
 0x2f6   : > { %v6040_v3 = vpop.eup %6039  ;;  %6051 = vpow2.f32 %v4785_v1 }
 0x2f7   : > { %v6042_v4 = vpop.eup %6041  ;;  %v1162_v5 = vadd.f32 1.0, %v6040_v3  ;;  %6053 = vpow2.f32 %v4783_v2  ;;  %v5369_v6 = vpop.f32.mrb[20].mxu1  ;;  %v1002_v3 = vadd.f32 %v4764_v25, %v6674_v31  ;;  %v1026_v31 = vadd.f32 %v6680_v34, %v4764_v25 }
 0x2f8   : > { %v6044_v7 = vpop.eup %6043  ;;  %v1160_v8 = vadd.f32 1.0, %v6042_v4  ;;  %v1118_v9 = vadd.f32 %v5369_v6, %v4771_v38  ;;  %v1109_v10 = vpop.f32.mrb[21].mxu1 }
 0x2f9   : > { %v6046_v11 = vpop.eup %6045  ;;  %6055 = vrcp.f32 %v1162_v5  ;;  %v1163_v12 = vadd.f32 1.0, %v6044_v7  ;;  %v1110_v13 = vadd.f32 %v4771_v38, %v1109_v10  ;;  %v5370_v14 = vpop.f32.mrb[22].mxu1  ;;  %v1013_v5 = vadd.f32 %v6676_v32, %v4764_v25 }
 0x2fa   : > { %6057 = vrcp.f32 %v1160_v8  ;;  %v1161_v15 = vadd.f32 1.0, %v6046_v11  ;;  %v4788_v16 = vmul.f32 -1.442695, %v1118_v9  ;;  %v1121_v17 = vadd.f32 %v5370_v14, %v4771_v38  ;;  %v1112_v18 = vpop.f32.mrb[23].mxu1 }
 0x2fb   : > { %6059 = vrcp.f32 %v1163_v12  ;;  %v4786_v19 = vmul.f32 -1.442695, %v1110_v13  ;;  %v1113_v20 = vadd.f32 %v4771_v38, %v1112_v18  ;;  %v1005_v8 = vadd.f32 %v4764_v25, %v6678_v33 }
 0x2fc   : > { %6061 = vrcp.f32 %v1161_v15  ;;  %v4789_v21 = vmul.f32 -1.442695, %v1121_v17  ;;  %v1018_v32 = vadd.f32 %v4764_v25, %v6682_v35  ;;  %v1021_v18 = vadd.f32 %v4764_v25, %v6686_v37 }
 0x2fd   : > { %6063 = vpow2.f32 %v4788_v16  ;;  %v4787_v22 = vmul.f32 -1.442695, %v1113_v20  ;;  %v1029_v16 = vadd.f32 %v6684_v36, %v4764_v25 }
 0x2fe   : > { %v6048_v23 = vpop.eup %6047  ;;  %6065 = vpow2.f32 %v4786_v19 }
 0x2ff   : > { %v6050_v24 = vpop.eup %6049  ;;  %v1166_v39 = vadd.f32 1.0, %v6048_v23  ;;  %6067 = vpow2.f32 %v4789_v21 }
 0x300   : > { %v6052_v40 = vpop.eup %6051  ;;  %v1164_v41 = vadd.f32 1.0, %v6050_v24  ;;  %6069 = vpow2.f32 %v4787_v22 }
 0x301   : > { %v6054_v38 = vpop.eup %6053  ;;  %6071 = vrcp.f32 %v1166_v39  ;;  %v1167_v42 = vadd.f32 1.0, %v6052_v40 }
 0x302   : > { %6073 = vrcp.f32 %v1164_v41  ;;  %v1165_v44 = vadd.f32 1.0, %v6054_v38  ;;  %v6015_v41 = vld [vmem:[%s6751_s3] sm:$0xff]   ;;  %v6016_v38 = vld [vmem:[%s6751_s3 + $0x8] sm:$0xff]  }
 0x303   : > { %v6056_v45 = vpop.eup %6055  ;;  %6075 = vrcp.f32 %v1167_v42  ;;  %5763 = vmatprep.subr.bf16.mxu1 %v6015_v41  ;;  %v6017_v42 = vld [vmem:[%s6759_s6] sm:$0xff]  }
 0x304   : > { %v6058_v47 = vpop.eup %6057  ;;  %6077 = vrcp.f32 %v1165_v44  ;;  %v6705_v49 = vmul.f32 %v6056_v45, %v994_v43  ;;  %5765 = vmatpush3.bf16.msra.mxu1 %v6015_v41 }
 0x305   : > { %v6060_v50 = vpop.eup %6059  ;;  %v1196_v55 = vmul.f32 %v6058_v47, %v986_v46  ;;  %5764 = vmatprep.subr.bf16.mxu1 %v6016_v38 }
 0x306   : > { %v6062_v56 = vpop.eup %6061  ;;  %v6708_v57 = vmul.f32 %v6060_v50, %v997_v48 }
 0x307   : > { %v6064_v26 = vpop.eup %6063  ;;  %v1197_v58 = vmul.f32 %v6062_v56, %v989_v51 }
 0x308   : > { %v6066_v59 = vpop.eup %6065  ;;  %v1170_v60 = vadd.f32 1.0, %v6064_v26  ;;  %v1209_v37 = vpack.c.bf16 %v6708_v57, %v6705_v49  ;;  %5766 = vmatpush3.bf16.msra.mxu1 %v6016_v38 }
 0x309   : > { %v6068_v61 = vpop.eup %6067  ;;  %v1168_v27 = vadd.f32 1.0, %v6066_v59  ;;  %v1208_v62 = vpack.c.bf16 %v1197_v58, %v1196_v55  ;;  %5421 = vmatprep.subr.bf16.mxu1 %v6417_v0  ;;  %v6018_v59 = vld [vmem:[%s6759_s6 + $0x8] sm:$0xff]  }
 0x30a   : > { %v6070_v63 = vpop.eup %6069  ;;  %6079 = vrcp.f32 %v1170_v60  ;;  %v1171_v1 = vadd.f32 1.0, %v6068_v61 }
 0x30b   : > { %v6072_v2 = vpop.eup %6071  ;;  %6081 = vrcp.f32 %v1168_v27  ;;  %v1169_v29 = vadd.f32 1.0, %v6070_v63 }
 0x30c   : > { %v6074_v4 = vpop.eup %6073  ;;  %6083 = vrcp.f32 %v1171_v1  ;;  %v1202_v6 = vmul.f32 %v6072_v2, %v1010_v28 }
 0x30d   : > { %v6076_v7 = vpop.eup %6075  ;;  %6085 = vrcp.f32 %v1169_v29  ;;  %v1200_v9 = vmul.f32 %v6074_v4, %v1002_v3 }
 0x30e   : > { %v6078_v10 = vpop.eup %6077  ;;  %v1203_v11 = vmul.f32 %v6076_v7, %v1013_v5 }
 0x30f   : > { %v1201_v30 = vmul.f32 %v6078_v10, %v1005_v8 }
 0x310   : > { %v1211_v12 = vpack.c.bf16 %v1203_v11, %v1202_v6 }
 0x311   : > { %v1210_v13 = vpack.c.bf16 %v1201_v30, %v1200_v9 }
 0x312   : > { %1217 = vrot.lane.b32.xlu0 %v1211_v12, %s7570_s17 }
 0x314   : > { %v6080_v14 = vpop.eup %6079 }
 0x315   : > { %v6082_v15 = vpop.eup %6081  ;;  %v1206_v17 = vmul.f32 %v6080_v14, %v1026_v31 }
 0x316   : > { %v6084_v33 = vpop.eup %6083  ;;  %v6719_v19 = vmul.f32 %v6082_v15, %v1018_v32 }
 0x317   : > { %v6086_v20 = vpop.eup %6085  ;;  %v1207_v21 = vmul.f32 %v6084_v33, %v1029_v16 }
 0x318   : > { %v6721_v22 = vmul.f32 %v6086_v20, %v1021_v18 }
 0x319   : > { %v1213_v23 = vpack.c.bf16 %v1207_v21, %v1206_v17 }
 0x31a   : > { %v1212_v34 = vpack.c.bf16 %v6721_v22, %v6719_v19 }
 0x31b   : > { %1221 = vrot.lane.b32.xlu0 %v1213_v23, %s7570_s17 }
 0x31c   : > { %1219 = vrot.lane.b32.xlu1 %v1212_v34, %s7570_s17  ;;  %s6785_s17 = scalar_lea.vmem %s7603_s10, %s7620_s25  ;;  %s6976_s10 = scalar_lea.vmem %s7562_s13, %s7620_s25 }
 0x31d   : > { %v6788_v14 = vld [vmem:[%s6785_s17] ss:$0 sm:$0xff] }
 0x384   : > { %v1218_v35 = vpop.permute.xlu0 %1217 }
 0x385   : > { %v1226_v36 = vsel %vm1223_vm4, %v1208_v62, %v1218_v35 }
 0x386   : > { %5372 = vmatpush3.bf16.msra.mxu0 %v1226_v36 }
 0x387   : > { %5373 = vmatprep.subr.bf16.mxu0 %v6417_v0 }
 0x38d   : > { %v1222_v39 = vpop.permute.xlu0 %1221 }
 0x38e   : > { %v1220_v24 = vpop.permute.xlu1 %1219  ;;  %v1234_v40 = vsel %vm1223_vm4, %v1210_v13, %v1222_v39 }
 0x38f   : > { %v1230_v25 = vsel %vm1223_vm4, %v1209_v37, %v1220_v24 }
 0x390   : > { %5374 = vmatpush3.bf16.msra.mxu0 %v1230_v25 }
 0x391   : > { %5375 = vmatprep.subr.bf16.mxu0 %v6417_v0 }
 0x394   : > { %5376 = vmatpush3.bf16.msra.mxu0 %v1234_v40 }
 0x395   : > { %5389 = vmatprep.subr.bf16.mxu0 %v6015_v41 }
 0x397   : > { %5378 = vmatmul.mubr.msk.bf16.vlgmr.msra.gmra.mrb[12].mxu0 %vm824_vm2, %v6604_v52 }
 0x398   : > { %5381 = vmatprep.mubr.msk.bf16.mxu0 %vm6419_vm0, %v6417_v0  ;;  %5390 = vmatpush3.bf16.msra.mxu0 %v6015_v41 }
 0x399   : > { %5391 = vmatprep.subr.bf16.mxu0 %v6016_v38 }
 0x39c   : > { %5392 = vmatpush3.bf16.msra.mxu0 %v6016_v38 }
 0x39d   : > { %5405 = vmatprep.subr.bf16.mxu0 %v6017_v42 }
 0x39f   : > { %5382 = vmatmul.mubr.msk.bf16.gmra.mrb[16].mxu0 %vm824_vm2, %v6614_v53 }
 0x3a0   : > { %5385 = vmatprep.mubr.msk.bf16.mxu0 %vm6419_vm0, %v6417_v0 }
 0x3a7   : > { %5386 = vmatmul.mubr.msk.bf16.gmra.mrb[20].mxu0 %vm824_vm2, %v6623_v54 }
 0x46a   : > { %v1270_v43 = vpop.f32.mrb[12].mxu0 }
 0x46b   : > { %v5379_v44 = vpop.f32.mrb[13].mxu0 }
 0x46c   : > { %v1273_v45 = vpop.f32.mrb[14].mxu0 }
 0x46d   : > { %v5862_v46 = vpack.i.bf16 %v1273_v45, %v1270_v43  ;;  %v1317_v47 = vpack.c.bf16 %v1273_v45, %v1270_v43  ;;  %v5380_v48 = vpop.f32.mrb[15].mxu0 }
 0x46f   : > { %5863 = vrot.lane.b32.xlu1 %v5862_v46, %s7572_s0  ;;  %5393 = vmatprep.mubr.msk.bf16.mxu0 %vm1223_vm4, %v1317_v47 }
 0x472   : > { %v1278_v50 = vpop.f32.mrb[16].mxu0 }
 0x473   : > { %v5383_v51 = vpop.f32.mrb[17].mxu0 }
 0x474   : > { %v1281_v55 = vpop.f32.mrb[18].mxu0 }
 0x475   : > { %v5867_v56 = vpack.i.bf16 %v1281_v55, %v1278_v50  ;;  %v1318_v26 = vpack.c.bf16 %v1281_v55, %v1278_v50  ;;  %v5384_v58 = vpop.f32.mrb[19].mxu0 }
 0x477   : > { %5868 = vrot.lane.b32.xlu0 %v5867_v56, %s7572_s0  ;;  %5394 = vmatmul.mubr.msk.bf16.vlgmr.msra.gmra.mrb[24].mxu0 %vm1223_vm4, %v1318_v26 }
 0x478   : > { %5406 = vmatpush3.bf16.msra.mxu0 %v6017_v42  ;;  %5409 = vmatprep.mubr.msk.bf16.mxu0 %vm1223_vm4, %v1317_v47 }
 0x479   : > { %5407 = vmatprep.subr.bf16.mxu0 %v6018_v59 }
 0x47a   : > { %v1286_v60 = vpop.f32.mrb[20].mxu0 }
 0x47b   : > { %v5387_v61 = vpop.f32.mrb[21].mxu0 }
 0x47c   : > { %v1289_v27 = vpop.f32.mrb[22].mxu0  ;;  %5408 = vmatpush3.bf16.msra.mxu0 %v6018_v59 }
 0x47d   : > { %v5872_v62 = vpack.i.bf16 %v1289_v27, %v1286_v60  ;;  %v1319_v63 = vpack.c.bf16 %v1289_v27, %v1286_v60  ;;  %v5388_v28 = vpop.f32.mrb[23].mxu0 }
 0x47f   : > { %5410 = vmatmul.mubr.msk.bf16.vlgmr.msra.gmra.mrb[28].mxu0 %vm1223_vm4, %v1318_v26  ;;  %5873 = vrot.lane.b32.xlu1 %v5872_v62, %s7572_s0  ;;  %s6798_s0 = scalar_lea.vmem %s7604_s9, %s7620_s25  ;;  %s7609_s9 = smov 96  }
 0x480   : > { %5397 = vmatprep.mubr.msk.bf16.mxu1 %vm1223_vm4, %v1319_v63  ;;  %5413 = vmatprep.mubr.msk.bf16.mxu0 %vm1223_vm4, %v1319_v63  ;;  %v6801_v43 = vld [vmem:[%s6798_s0] ss:$0 sm:$0xff]  ;;  %s6989_s25 = scalar_lea.vmem [#allocation2], %s5773_s5 }
 0x4e1   : > { %v5864_v1 = vpop.permute.xlu1 %5863 }
 0x4e2   : > { %v5866_v2 = vunpack.i.h.bf16 %v5864_v1  ;;  %v5865_v3 = vunpack.i.l.bf16 %v5864_v1 }
 0x4e4   : > { %v1320_v29 = vpack.c.bf16 %v5866_v2, %v5865_v3 }
 0x4e6   : > { %5398 = vmatmul.mubr.msk.bf16.vlgmr.msra.gmra.mrb[24].mxu1 %vm1223_vm4, %v1320_v29  ;;  %5414 = vmatmul.mubr.msk.bf16.gmra.mrb[32].mxu0 %vm1223_vm4, %v1320_v29 }
 0x4e9   : > { %v5869_v4 = vpop.permute.xlu0 %5868 }
 0x4ea   : > { %v5871_v5 = vunpack.i.h.bf16 %v5869_v4  ;;  %v5870_v6 = vunpack.i.l.bf16 %v5869_v4 }
 0x4ec   : > { %v1321_v7 = vpack.c.bf16 %v5871_v5, %v5870_v6 }
 0x4ee   : > { %5401 = vmatprep.mubr.msk.bf16.mxu1 %vm1223_vm4, %v1321_v7  ;;  %5417 = vmatprep.mubr.msk.bf16.mxu0 %vm1223_vm4, %v1321_v7 }
 0x4f1   : > { %v5874_v8 = vpop.permute.xlu1 %5873 }
 0x4f2   : > { %v5876_v9 = vunpack.i.h.bf16 %v5874_v8  ;;  %v5875_v10 = vunpack.i.l.bf16 %v5874_v8 }
 0x4f4   : > { %v1322_v11 = vpack.c.bf16 %v5876_v9, %v5875_v10 }
 0x4f6   : > { %5402 = vmatmul.mubr.msk.bf16.gmra.mrb[28].mxu1 %vm1223_vm4, %v1322_v11  ;;  %5418 = vmatmul.mubr.msk.bf16.gmra.mrb[36].mxu0 %vm1223_vm4, %v1322_v11 }
 0x4f7   : > { %5427 = vmatprep.mubr.msk.bf16.mxu1 %vm6419_vm0, %v6417_v0 }
 0x54a   : > { %v5395_v30 = vpop.f32.mrb[24].mxu0 }
 0x54b   : > { %v1398_v12 = vpop.f32.mrb[25].mxu0  ;;  %v1407_v44 = vadd.f32 %v5395_v30, %v6801_v43 }
 0x54c   : > { %v5396_v13 = vpop.f32.mrb[26].mxu0  ;;  %v1399_v46 = vadd.f32 %v6801_v43, %v1398_v12 }
 0x54d   : > { %v1401_v31 = vpop.f32.mrb[27].mxu0  ;;  %v1410_v48 = vadd.f32 %v5396_v13, %v6801_v43 }
 0x54e   : > { %v1402_v55 = vadd.f32 %v6801_v43, %v1401_v31 }
 0x552   : > { %v5411_v32 = vpop.f32.mrb[28].mxu0 }
 0x553   : > { %v1511_v15 = vadd.f32 %v5411_v32, %v6788_v14  ;;  %v1502_v16 = vpop.f32.mrb[29].mxu0 }
 0x554   : > { %v1503_v17 = vadd.f32 %v6788_v14, %v1502_v16  ;;  %v5412_v33 = vpop.f32.mrb[30].mxu0 }
 0x555   : > { %v4813_v18 = vmul.f32 -1.442695, %v1511_v15  ;;  %v1514_v20 = vadd.f32 %v5412_v33, %v6788_v14  ;;  %v1505_v21 = vpop.f32.mrb[31].mxu0 }
 0x556   : > { %v4811_v23 = vmul.f32 -1.442695, %v1503_v17  ;;  %v1506_v34 = vadd.f32 %v6788_v14, %v1505_v21 }
 0x557   : > { %6087 = vpow2.f32 %v4813_v18  ;;  %v4814_v35 = vmul.f32 -1.442695, %v1514_v20 }
 0x558   : > { %6089 = vpow2.f32 %v4811_v23  ;;  %v4812_v36 = vmul.f32 -1.442695, %v1506_v34 }
 0x559   : > { %6091 = vpow2.f32 %v4814_v35 }
 0x55a   : > { %6093 = vpow2.f32 %v4812_v36 }
 0x561   : > { %v6088_v37 = vpop.eup %6087 }
 0x562   : > { %v6090_v24 = vpop.eup %6089  ;;  %v1587_v25 = vadd.f32 1.0, %v6088_v37 }
 0x563   : > { %v6092_v39 = vpop.eup %6091  ;;  %v1585_v40 = vadd.f32 1.0, %v6090_v24 }
 0x564   : > { %v6094_v41 = vpop.eup %6093  ;;  %6095 = vrcp.f32 %v1587_v25  ;;  %v1588_v38 = vadd.f32 1.0, %v6092_v39 }
 0x565   : > { %6097 = vrcp.f32 %v1585_v40  ;;  %v1586_v42 = vadd.f32 1.0, %v6094_v41 }
 0x566   : > { %6099 = vrcp.f32 %v1588_v38 }
 0x567   : > { %6101 = vrcp.f32 %v1586_v42 }
 0x56e   : > { %v6096_v45 = vpop.eup %6095 }
 0x56f   : > { %v6098_v47 = vpop.eup %6097  ;;  %v6806_v50 = vmul.f32 %v6096_v45, %v1407_v44 }
 0x570   : > { %v6100_v51 = vpop.eup %6099  ;;  %v6809_v56 = vmul.f32 %v6098_v47, %v1399_v46 }
 0x571   : > { %v6102_v26 = vpop.eup %6101  ;;  %v6811_v58 = vmul.f32 %v6100_v51, %v1410_v48 }
 0x572   : > { %v6813_v59 = vmul.f32 %v6102_v26, %v1402_v55 }
 0x573   : > { %v1638_v60 = vpack.c.bf16 %v6811_v58, %v6806_v50 }
 0x574   : > { %v1637_v61 = vpack.c.bf16 %v6813_v59, %v6809_v56  ;;  %v6022_v56 = vld [vmem:[%s6875_s24 + $0x8] sm:$0xff]   ;;  %v4858_v59 = vld [vmem:[%s6568_s27 + $0x10] sm:$0xff] }
 0x5b9   : > { %v5399_v27 = vpop.f32.mrb[24].mxu1  ;;  %v5415_v62 = vpop.f32.mrb[32].mxu0 }
 0x5ba   : > { %v1527_v63 = vadd.f32 %v5415_v62, %v6788_v14  ;;  %v1414_v28 = vpop.f32.mrb[25].mxu1  ;;  %v1518_v1 = vpop.f32.mrb[33].mxu0  ;;  %v1423_v44 = vadd.f32 %v5399_v27, %v6801_v43 }
 0x5bb   : > { %v1519_v2 = vadd.f32 %v6788_v14, %v1518_v1  ;;  %v5400_v3 = vpop.f32.mrb[26].mxu1  ;;  %v5416_v29 = vpop.f32.mrb[34].mxu0  ;;  %v1415_v46 = vadd.f32 %v6801_v43, %v1414_v28 }
 0x5bc   : > { %v4817_v4 = vmul.f32 -1.442695, %v1527_v63  ;;  %v1530_v5 = vadd.f32 %v5416_v29, %v6788_v14  ;;  %v1417_v6 = vpop.f32.mrb[27].mxu1  ;;  %v1521_v7 = vpop.f32.mrb[35].mxu0  ;;  %v1426_v48 = vadd.f32 %v5400_v3, %v6801_v43 }
 0x5bd   : > { %v4815_v8 = vmul.f32 -1.442695, %v1519_v2  ;;  %v1522_v9 = vadd.f32 %v6788_v14, %v1521_v7  ;;  %v1418_v26 = vadd.f32 %v6801_v43, %v1417_v6 }
 0x5be   : > { %6103 = vpow2.f32 %v4817_v4  ;;  %v4818_v10 = vmul.f32 -1.442695, %v1530_v5 }
 0x5bf   : > { %6105 = vpow2.f32 %v4815_v8  ;;  %v4816_v11 = vmul.f32 -1.442695, %v1522_v9 }
 0x5c0   : > { %6107 = vpow2.f32 %v4818_v10 }
 0x5c1   : > { %6109 = vpow2.f32 %v4816_v11 }
 0x5c8   : > { %v6104_v30 = vpop.eup %6103 }
 0x5c9   : > { %v6106_v12 = vpop.eup %6105  ;;  %v1591_v13 = vadd.f32 1.0, %v6104_v30  ;;  %v5403_v31 = vpop.f32.mrb[28].mxu1 }
 0x5ca   : > { %v5419_v32 = vpop.f32.mrb[36].mxu0  ;;  %v6108_v15 = vpop.eup %6107  ;;  %v1589_v16 = vadd.f32 1.0, %v6106_v12  ;;  %v1439_v6 = vadd.f32 %v5403_v31, %v6801_v43 }
 0x5cb   : > { %v1543_v17 = vadd.f32 %v5419_v32, %v6788_v14  ;;  %v1430_v33 = vpop.f32.mrb[29].mxu1  ;;  %v1534_v18 = vpop.f32.mrb[37].mxu0  ;;  %6111 = vrcp.f32 %v1591_v13  ;;  %v1592_v21 = vadd.f32 1.0, %v6108_v15 }
 0x5cc   : > { %v6110_v20 = vpop.eup %6109  ;;  %v1535_v23 = vadd.f32 %v6788_v14, %v1534_v18  ;;  %v5404_v34 = vpop.f32.mrb[30].mxu1  ;;  %6113 = vrcp.f32 %v1589_v16  ;;  %v1431_v11 = vadd.f32 %v6801_v43, %v1430_v33 }
 0x5cd   : > { %v5420_v35 = vpop.f32.mrb[38].mxu0  ;;  %v1590_v36 = vadd.f32 1.0, %v6110_v20  ;;  %v4821_v37 = vmul.f32 -1.442695, %v1543_v17  ;;  %v1433_v24 = vpop.f32.mrb[31].mxu1  ;;  %6115 = vrcp.f32 %v1592_v21  ;;  %v1442_v12 = vadd.f32 %v5404_v34, %v6801_v43 }
 0x5ce   : > { %v1537_v25 = vpop.f32.mrb[39].mxu0  ;;  %v4819_v39 = vmul.f32 -1.442695, %v1535_v23  ;;  %v1546_v40 = vadd.f32 %v5420_v35, %v6788_v14  ;;  %v1434_v15 = vadd.f32 %v6801_v43, %v1433_v24 }
 0x5cf   : > { %6117 = vrcp.f32 %v1590_v36  ;;  %v1538_v41 = vadd.f32 %v6788_v14, %v1537_v25 }
 0x5d0   : > { %6119 = vpow2.f32 %v4821_v37  ;;  %v4822_v38 = vmul.f32 -1.442695, %v1546_v40  ;;  %v4866_v37 = vld [vmem:[%s6563_s23 + $0x98] sm:$0xff]  ;;  %v4851_v40 = vld [vmem:[%s6563_s23 + $0x10] sm:$0xff] }
 0x5d1   : > { %6121 = vpow2.f32 %v4819_v39  ;;  %v4820_v42 = vmul.f32 -1.442695, %v1538_v41  ;;  %v4852_v41 = vld [vmem:[%s6563_s23 + $0x18] sm:$0xff] }
 0x5d2   : > { %6123 = vpow2.f32 %v4822_v38 }
 0x5d3   : > { %6125 = vpow2.f32 %v4820_v42 }
 0x5d5   : > { %v6112_v45 = vpop.eup %6111 }
 0x5d6   : > { %v6114_v47 = vpop.eup %6113  ;;  %v1627_v51 = vmul.f32 %v6112_v45, %v1423_v44  ;;  %v2014_v45 = vadd.f32 %v4858_v59, %v4851_v40 }
 0x5d7   : > { %v6116_v55 = vpop.eup %6115  ;;  %v1625_v62 = vmul.f32 %v6114_v47, %v1415_v46 }
 0x5d8   : > { %v1628_v63 = vmul.f32 %v6116_v55, %v1426_v48 }
 0x5d9   : > { %v6118_v14 = vpop.eup %6117 }
 0x5da   : > { %v6120_v1 = vpop.eup %6119  ;;  %v1626_v2 = vmul.f32 %v6118_v14, %v1418_v26  ;;  %v1640_v5 = vpack.c.bf16 %v1628_v63, %v1627_v51  ;;  %v4860_v14 = vld [vmem:[%s6568_s27 + $0x20] sm:$0xff]  ;;  %v4861_v63 = vld [vmem:[%s6568_s27 + $0x28] sm:$0xff] }
 0x5db   : > { %v6122_v29 = vpop.eup %6121  ;;  %v1595_v4 = vadd.f32 1.0, %v6120_v1  ;;  %v4867_v1 = vld [vmem:[%s6563_s23 + $0xa0] sm:$0xff] }
 0x5dc   : > { %v6124_v7 = vpop.eup %6123  ;;  %v1593_v27 = vadd.f32 1.0, %v6122_v29  ;;  %v1639_v8 = vpack.c.bf16 %v1626_v2, %v1625_v62  ;;  %1646 = vrot.lane.b32.xlu0 %v1640_v5, %s7605_s4  ;;  %v4868_v2 = vld [vmem:[%s6563_s23 + $0xa8] sm:$0xff] }
 0x5dd   : > { %v6126_v9 = vpop.eup %6125  ;;  %6127 = vrcp.f32 %v1595_v4  ;;  %v1596_v28 = vadd.f32 1.0, %v6124_v7 }
 0x5de   : > { %6129 = vrcp.f32 %v1593_v27  ;;  %v1594_v3 = vadd.f32 1.0, %v6126_v9  ;;  %v2031_v9 = vadd.f32 %v4868_v2, %v4861_v63 }
 0x5df   : > { %6131 = vrcp.f32 %v1596_v28 }
 0x5e0   : > { %6133 = vrcp.f32 %v1594_v3 }
 0x5e7   : > { %v6128_v10 = vpop.eup %6127 }
 0x5e8   : > { %v6130_v30 = vpop.eup %6129  ;;  %v1631_v13 = vmul.f32 %v6128_v10, %v1439_v6 }
 0x5e9   : > { %v6132_v32 = vpop.eup %6131  ;;  %v6836_v16 = vmul.f32 %v6130_v30, %v1431_v11  ;;  %v4862_v30 = vld [vmem:[%s6568_s27 + $0x30] sm:$0xff] }
 0x5ea   : > { %v6134_v17 = vpop.eup %6133  ;;  %v1632_v18 = vmul.f32 %v6132_v32, %v1442_v12  ;;  %v4863_v12 = vld [vmem:[%s6568_s27 + $0x38] sm:$0xff] }
 0x5eb   : > { %v6838_v20 = vmul.f32 %v6134_v17, %v1434_v15  ;;  %v4870_v32 = vld [vmem:[%s6563_s23 + $0xb8] sm:$0xff] }
 0x5ec   : > { %v1642_v21 = vpack.c.bf16 %v1632_v18, %v1631_v13  ;;  %v4869_v13 = vld [vmem:[%s6563_s23 + $0xb0] sm:$0xff] }
 0x5ed   : > { %v1641_v31 = vpack.c.bf16 %v6838_v20, %v6836_v16  ;;  %v2032_v18 = vadd.f32 %v4869_v13, %v4862_v30 }
 0x5ee   : > { %1650 = vrot.lane.b32.xlu0 %v1642_v21, %s7605_s4  ;;  %v2033_v21 = vadd.f32 %v4870_v32, %v4863_v12 }
 0x5ef   : > { %1648 = vrot.lane.b32.xlu1 %v1641_v31, %s7605_s4 }
 0x64e   : > { %v1647_v33 = vpop.permute.xlu0 %1646 }
 0x64f   : > { %v1654_v43 = vsel %vm1223_vm4, %v1637_v61, %v1647_v33  ;;  %v4865_v61 = vld [vmem:[%s6563_s23 + $0x90] sm:$0xff] }
 0x650   : > { %5422 = vmatpush3.bf16.msra.mxu1 %v1654_v43  ;;  %v2028_v24 = vadd.f32 %v4865_v61, %v4858_v59 }
 0x651   : > { %5423 = vmatprep.subr.bf16.mxu1 %v6417_v0 }
 0x660   : > { %v1651_v35 = vpop.permute.xlu0 %1650 }
 0x661   : > { %v1649_v23 = vpop.permute.xlu1 %1648  ;;  %v1662_v36 = vsel %vm1223_vm4, %v1639_v8, %v1651_v35  ;;  %v2030_v8 = vadd.f32 %v4867_v1, %v4860_v14 }
 0x662   : > { %v1658_v34 = vsel %vm1223_vm4, %v1638_v60, %v1649_v23  ;;  %v4859_v60 = vld [vmem:[%s6568_s27 + $0x18] sm:$0xff] }
 0x663   : > { %5424 = vmatpush3.bf16.msra.mxu1 %v1658_v34  ;;  %v2029_v25 = vadd.f32 %v4866_v37, %v4859_v60  ;;  %v2015_v46 = vadd.f32 %v4859_v60, %v4852_v41  ;;  %v5892_v11 = vpack.i.bf16 %v2031_v9, %v2030_v8  ;;  %v5902_v34 = vpack.i.bf16 %v2033_v21, %v2032_v18  ;;  %v6961_v8 = vld [vmem:[%s6958_s11] ss:$0 sm:$0xff]  ;;  %v4874_v21 = vld [vmem:[%s6636_s1 + $0x2] sm:$0x3] }
 0x664   : > { %5425 = vmatprep.subr.bf16.mxu1 %v6417_v0 }
 0x665   : > { %v5877_v39 = vpack.i.bf16 %v2029_v25, %v2028_v24 }
 0x667   : > { %5426 = vmatpush3.bf16.msra.mxu1 %v1662_v36  ;;  %5878 = vrot.lane.b32.xlu0 %v5877_v39, %s7608_s7 }
 0x66a   : > { %5428 = vmatmul.mubr.msk.bf16.vlgmr.msra.gmra.mrb[32].mxu1 %vm824_vm2, %v6604_v52  ;;  %v6019_v52 = vld [vmem:[%s6869_s8] sm:$0xff]  }
 0x66b   : > { %5431 = vmatprep.mubr.msk.bf16.mxu1 %vm6419_vm0, %v6417_v0  ;;  %5439 = vmatprep.subr.bf16.mxu0 %v6019_v52 }
 0x66c   : > { %5440 = vmatpush3.bf16.msra.mxu0 %v6019_v52 }
 0x672   : > { %5432 = vmatmul.mubr.msk.bf16.gmra.mrb[36].mxu1 %vm824_vm2, %v6614_v53  ;;  %v6020_v53 = vld [vmem:[%s6875_s24] sm:$0xff]  }
 0x673   : > { %5435 = vmatprep.mubr.msk.bf16.mxu1 %vm6419_vm0, %v6417_v0  ;;  %5455 = vmatprep.subr.bf16.mxu1 %v6020_v53 }
 0x674   : > { %5456 = vmatpush3.bf16.msra.mxu1 %v6020_v53 }
 0x675   : > { %5457 = vmatprep.subr.bf16.mxu1 %v6022_v56 }
 0x678   : > { %5458 = vmatpush3.bf16.msra.mxu1 %v6022_v56  ;;  %v4854_v56 = vld [vmem:[%s6563_s23 + $0x28] sm:$0xff] }
 0x679   : > { %v2017_v24 = vadd.f32 %v4861_v63, %v4854_v56  ;;  %5769 = vmatprep.subr.msk.bf16.mxu1 %vm947_vm3, %v4874_v21 }
 0x67a   : > { %5436 = vmatmul.mubr.msk.bf16.gmra.mrb[40].mxu1 %vm824_vm2, %v6623_v54  ;;  %v6021_v54 = vld [vmem:[%s6869_s8 + $0x8] sm:$0xff]  }
 0x67b   : > { %5441 = vmatprep.subr.bf16.mxu0 %v6021_v54 }
 0x67c   : > { %5442 = vmatpush3.bf16.msra.mxu0 %v6021_v54  ;;  %v4853_v54 = vld [vmem:[%s6563_s23 + $0x20] sm:$0xff] }
 0x67d   : > { %5471 = vmatprep.subr.bf16.mxu0 %v6417_v0  ;;  %v2016_v37 = vadd.f32 %v4860_v14, %v4853_v54  ;;  %v1633_v54 = vmax.f32 %v6705_v49, %v6806_v50 }
 0x6d9   : > { %v5879_v55 = vpop.permute.xlu0 %5878 }
 0x6da   : > { %v5881_v26 = vunpack.i.h.bf16 %v5879_v55  ;;  %v5880_v62 = vunpack.i.l.bf16 %v5879_v55 }
 0x6dc   : > { %v2059_v29 = vsel %vm799_vm1, %v2015_v46, %v5881_v26  ;;  %v2058_v4 = vsel %vm799_vm1, %v2014_v45, %v5880_v62  ;;  %v4856_v45 = vld [vmem:[%s6563_s23 + $0x38] sm:$0xff] }
 0x6dd   : > { %v2064_v5 = vpack.c.bf16 %v2059_v29, %v2058_v4  ;;  %v2019_v26 = vadd.f32 %v4863_v12, %v4856_v45 }
 0x73d   : > { %v1698_v38 = vpop.f32.mrb[32].mxu1 }
 0x73e   : > { %v5429_v42 = vpop.f32.mrb[33].mxu1 }
 0x73f   : > { %v1701_v44 = vpop.f32.mrb[34].mxu1 }
 0x740   : > { %v5882_v47 = vpack.i.bf16 %v1701_v44, %v1698_v38  ;;  %v1745_v48 = vpack.c.bf16 %v1701_v44, %v1698_v38  ;;  %v5430_v51 = vpop.f32.mrb[35].mxu1  ;;  %v4855_v44 = vld [vmem:[%s6563_s23 + $0x30] sm:$0xff] }
 0x741   : > { %v2018_v55 = vadd.f32 %v4862_v30, %v4855_v44 }
 0x742   : > { %5883 = vrot.lane.b32.xlu1 %v5882_v47, %s7609_s9  ;;  %5443 = vmatprep.mubr.msk.bf16.mxu0 %vm1223_vm4, %v1745_v48 }
 0x743   : > { %5459 = vmatprep.mubr.msk.bf16.mxu1 %vm1223_vm4, %v1745_v48 }
 0x745   : > { %v1706_v7 = vpop.f32.mrb[36].mxu1 }
 0x746   : > { %v5433_v27 = vpop.f32.mrb[37].mxu1 }
 0x747   : > { %v1709_v28 = vpop.f32.mrb[38].mxu1  ;;  %v6950_v27 = vld [vmem:[%s7551_s2 + $0x10] sm:$0xff]  }
 0x748   : > { %v5887_v3 = vpack.i.bf16 %v1709_v28, %v1706_v7  ;;  %v1746_v6 = vpack.c.bf16 %v1709_v28, %v1706_v7  ;;  %v5434_v10 = vpop.f32.mrb[39].mxu1  ;;  %v6941_v7 = vld [vmem:[%s7551_s2 + $0x8] sm:$0xff]  }
 0x74a   : > { %5888 = vrot.lane.b32.xlu1 %v5887_v3, %s7609_s9  ;;  %5444 = vmatmul.mubr.msk.bf16.vlgmr.msra.gmra.mrb[40].mxu0 %vm1223_vm4, %v1746_v6 }
 0x74b   : > { %5460 = vmatmul.mubr.msk.bf16.vlgmr.msra.gmra.mrb[44].mxu1 %vm1223_vm4, %v1746_v6  ;;  %5472 = vmatpush3.bf16.msra.mxu0 %v2064_v5  ;;  %v6932_v5 = vld [vmem:[%s7551_s2] sm:$0xff]  }
 0x74c   : > { %5473 = vmatprep.subr.bf16.mxu0 %v6417_v0 }
 0x74d   : > { %v1714_v15 = vpop.f32.mrb[40].mxu1 }
 0x74e   : > { %v5437_v17 = vpop.f32.mrb[41].mxu1  ;;  %5893 = vrot.lane.b32.xlu1 %v5892_v11, %s7608_s7 }
 0x74f   : > { %v1717_v31 = vpop.f32.mrb[42].mxu1 }
 0x750   : > { %v5897_v33 = vpack.i.bf16 %v1717_v31, %v1714_v15  ;;  %v1747_v43 = vpack.c.bf16 %v1717_v31, %v1714_v15  ;;  %v5438_v23 = vpop.f32.mrb[43].mxu1  ;;  %v4883_v31 = vld [vmem:[%s6644_s20 + $0x2] sm:$0x3] }
 0x751   : > { %v2277_v23 = vsel %vm947_vm3, %v4883_v31, 0 }
 0x752   : > { %5898 = vrot.lane.b32.xlu0 %v5897_v33, %s7609_s9  ;;  %5447 = vmatprep.mubr.msk.bf16.mxu0 %vm1223_vm4, %v1747_v43 }
 0x753   : > { %5463 = vmatprep.mubr.msk.bf16.mxu1 %vm1223_vm4, %v1747_v43  ;;  %v2183_v43 = vsel %vm947_vm3, %v4874_v21, 0 }
 0x754   : > { %5490 = vmatpush3.bf16.msra.mxu1 %v2183_v43 }
 0x755   : > { %5517 = vmatprep.subr.bf16.mxu1 %v6417_v0 }
 0x756   : > { %5903 = vrot.lane.b32.xlu0 %v5902_v34, %s7608_s7 }
 0x7b4   : > { %v5884_v35 = vpop.permute.xlu1 %5883 }
 0x7b5   : > { %v5886_v36 = vunpack.i.h.bf16 %v5884_v35  ;;  %v5885_v52 = vunpack.i.l.bf16 %v5884_v35 }
 0x7b7   : > { %v1748_v53 = vpack.c.bf16 %v5886_v36, %v5885_v52  ;;  %v6979_v36 = vld [vmem:[%s6976_s10] ss:$0 sm:$0xff] }
 0x7b9   : > { %5448 = vmatmul.mubr.msk.bf16.gmra.mrb[44].mxu0 %vm1223_vm4, %v1748_v53  ;;  %5464 = vmatmul.mubr.msk.bf16.gmra.mrb[48].mxu1 %vm1223_vm4, %v1748_v53 }
 0x7bc   : > { %v5889_v59 = vpop.permute.xlu1 %5888 }
 0x7bd   : > { %v5891_v60 = vunpack.i.h.bf16 %v5889_v59  ;;  %v5890_v61 = vunpack.i.l.bf16 %v5889_v59 }
 0x7bf   : > { %v1749_v25 = vpack.c.bf16 %v5891_v60, %v5890_v61  ;;  %v1634_v61 = vmax.f32 %v6708_v57, %v6811_v58 }
 0x7c0   : > { %v5894_v39 = vpop.permute.xlu1 %5893 }
 0x7c1   : > { %5451 = vmatprep.mubr.msk.bf16.mxu0 %vm1223_vm4, %v1749_v25  ;;  %5467 = vmatprep.mubr.msk.bf16.mxu1 %vm1223_vm4, %v1749_v25  ;;  %v5896_v40 = vunpack.i.h.bf16 %v5894_v39  ;;  %v5895_v41 = vunpack.i.l.bf16 %v5894_v39 }
 0x7c3   : > { %v2061_v38 = vsel %vm799_vm1, %v2017_v24, %v5896_v40  ;;  %v2060_v42 = vsel %vm799_vm1, %v2016_v37, %v5895_v41 }
 0x7c4   : > { %v2065_v46 = vpack.c.bf16 %v2061_v38, %v2060_v42  ;;  %v5899_v47 = vpop.permute.xlu0 %5898 }
 0x7c5   : > { %v5901_v48 = vunpack.i.h.bf16 %v5899_v47  ;;  %v5900_v51 = vunpack.i.l.bf16 %v5899_v47 }
 0x7c6   : > { %5474 = vmatpush3.bf16.msra.mxu0 %v2065_v46 }
 0x7c7   : > { %v1750_v62 = vpack.c.bf16 %v5901_v48, %v5900_v51  ;;  %5475 = vmatprep.subr.bf16.mxu0 %v6417_v0 }
 0x7c8   : > { %v5904_v14 = vpop.permute.xlu0 %5903 }
 0x7c9   : > { %v5906_v63 = vunpack.i.h.bf16 %v5904_v14  ;;  %v5905_v1 = vunpack.i.l.bf16 %v5904_v14  ;;  %5452 = vmatmul.mubr.msk.bf16.gmra.mrb[48].mxu0 %vm1223_vm4, %v1750_v62  ;;  %5468 = vmatmul.mubr.msk.bf16.gmra.mrb[52].mxu1 %vm1223_vm4, %v1750_v62 }
 0x7ca   : > { %5477 = vmatprep.mubr.msk.bf16.mxu0 %vm6419_vm0, %v6417_v0 }
 0x7cb   : > { %v2063_v2 = vsel %vm799_vm1, %v2019_v26, %v5906_v63  ;;  %v2062_v29 = vsel %vm799_vm1, %v2018_v55, %v5905_v1 }
 0x7cc   : > { %v2066_v4 = vpack.c.bf16 %v2063_v2, %v2062_v29 }
 0x7ce   : > { %5476 = vmatpush3.bf16.msra.mxu0 %v2066_v4 }
 0x7cf   : > { %5770 = vmatprep.subr.msk.bf16.mxu0 %vm947_vm3, %v4883_v31 }
 0x7d1   : > { %5478 = vmatmul.mubr.msk.bf16.vlgmr.msra.gmra.mrb[52].mxu0 %vm824_vm2, %v6932_v5 }
 0x7d2   : > { %5481 = vmatprep.mubr.msk.bf16.mxu0 %vm6419_vm0, %v6417_v0  ;;  %5504 = vmatpush3.bf16.msra.mxu0 %v2277_v23 }
 0x7d9   : > { %5482 = vmatmul.mubr.msk.bf16.gmra.mrb[56].mxu0 %vm824_vm2, %v6941_v7 }
 0x7da   : > { %5485 = vmatprep.mubr.msk.bf16.mxu0 %vm6419_vm0, %v6417_v0 }
 0x7e1   : > { %5486 = vmatmul.mubr.msk.bf16.gmra.mrb[60].mxu0 %vm824_vm2, %v6950_v27 }
 0x81d   : > { %v5445_v9 = vpop.f32.mrb[40].mxu0 }
 0x81e   : > { %v5461_v28 = vpop.f32.mrb[44].mxu1  ;;  %v1826_v3 = vpop.f32.mrb[41].mxu0  ;;  %v1833_v52 = vadd.f32 %v5445_v9, %v6979_v36 }
 0x81f   : > { %v1929_v6 = vadd.f32 %v5461_v28, %v6961_v8  ;;  %v1922_v10 = vpop.f32.mrb[45].mxu1  ;;  %v5446_v11 = vpop.f32.mrb[42].mxu0 }
 0x820   : > { %v5462_v30 = vpop.f32.mrb[46].mxu1  ;;  %v1828_v12 = vpop.f32.mrb[43].mxu0  ;;  %v1836_v59 = vadd.f32 %v5446_v11, %v6979_v36 }
 0x821   : > { %v4844_v13 = vmul.f32 -1.442695, %v1929_v6  ;;  %v1932_v32 = vadd.f32 %v5462_v30, %v6961_v8  ;;  %v1924_v15 = vpop.f32.mrb[47].mxu1 }
 0x823   : > { %6135 = vpow2.f32 %v4844_v13  ;;  %v4845_v17 = vmul.f32 -1.442695, %v1932_v32 }
 0x825   : > { %6137 = vpow2.f32 %v4845_v17 }
 0x82d   : > { %v6136_v18 = vpop.eup %6135 }
 0x82e   : > { %v1973_v33 = vadd.f32 1.0, %v6136_v18 }
 0x82f   : > { %v6138_v34 = vpop.eup %6137 }
 0x830   : > { %6139 = vrcp.f32 %v1973_v33  ;;  %v1974_v35 = vadd.f32 1.0, %v6138_v34 }
 0x832   : > { %6141 = vrcp.f32 %v1974_v35  ;;  %v1635_v35 = vmax.f32 %v6719_v19, %v6836_v16 }
 0x83a   : > { %v6140_v53 = vpop.eup %6139 }
 0x83b   : > { %v1985_v56 = vmul.f32 %v6140_v53, %v1833_v52 }
 0x83c   : > { %v6142_v60 = vpop.eup %6141 }
 0x83d   : > { %v1989_v37 = vmax.f32 %v1633_v54, %v1985_v56  ;;  %v1986_v24 = vmul.f32 %v6142_v60, %v1836_v59  ;;  %v1636_v56 = vmax.f32 %v6721_v22, %v6838_v20 }
 0x83f   : > { %1993 = vst.msk [vmem:[%s6989_s25] sm:$0xff] %vm1223_vm4, %v1989_v37  ;;  %v1990_v25 = vmax.f32 %v1634_v61, %v1986_v24 }
 0x841   : > { %1994 = vst.msk [vmem:[%s6989_s25 + $0x8] sm:$0xff] %vm1223_vm4, %v1990_v25 }
 0x88c   : > { %v5449_v39 = vpop.f32.mrb[44].mxu0  ;;  %v5465_v49 = vpop.f32.mrb[48].mxu1 }
 0x88d   : > { %v1840_v50 = vpop.f32.mrb[45].mxu0  ;;  %v1936_v40 = vpop.f32.mrb[49].mxu1 }
 0x88e   : > { %v5450_v41 = vpop.f32.mrb[46].mxu0  ;;  %v5466_v38 = vpop.f32.mrb[50].mxu1 }
 0x88f   : > { %v1842_v42 = vpop.f32.mrb[47].mxu0  ;;  %v1938_v44 = vpop.f32.mrb[51].mxu1  ;;  %v7025_v41 = vld [vmem:[%s6692_s16 + $0x1] ss:$0 sm:$0xff] }
 0x89c   : > { %v5453_v57 = vpop.f32.mrb[48].mxu0  ;;  %v5469_v58 = vpop.f32.mrb[52].mxu1 }
 0x89d   : > { %v1852_v45 = vpop.f32.mrb[49].mxu0  ;;  %v1948_v46 = vpop.f32.mrb[53].mxu1 }
 0x89e   : > { %v1949_v47 = vadd.f32 %v6961_v8, %v1948_v46  ;;  %v5454_v48 = vpop.f32.mrb[50].mxu0  ;;  %v5470_v51 = vpop.f32.mrb[54].mxu1  ;;  %v1853_v23 = vadd.f32 %v6979_v36, %v1852_v45 }
 0x89f   : > { %v1855_v55 = vpop.f32.mrb[51].mxu0  ;;  %v1951_v26 = vpop.f32.mrb[55].mxu1 }
 0x8a0   : > { %v4846_v62 = vmul.f32 -1.442695, %v1949_v47  ;;  %v1952_v14 = vadd.f32 %v6961_v8, %v1951_v26  ;;  %v1856_v53 = vadd.f32 %v6979_v36, %v1855_v55 }
 0x8a2   : > { %6143 = vpow2.f32 %v4846_v62  ;;  %v4847_v63 = vmul.f32 -1.442695, %v1952_v14 }
 0x8a4   : > { %6145 = vpow2.f32 %v4847_v63  ;;  %v2101_v1 = vpop.f32.mrb[52].mxu0 }
 0x8a5   : > { %v5479_v2 = vpop.f32.mrb[53].mxu0 }
 0x8a6   : > { %v2104_v29 = vpop.f32.mrb[54].mxu0 }
 0x8a7   : > { %v5907_v4 = vpack.i.bf16 %v2104_v29, %v2101_v1  ;;  %v2148_v9 = vpack.c.bf16 %v2104_v29, %v2101_v1  ;;  %v5480_v28 = vpop.f32.mrb[55].mxu0 }
 0x8a9   : > { %5908 = vrot.lane.b32.xlu1 %v5907_v4, %s7611_s12  ;;  %5491 = vmatprep.mubr.msk.bf16.mxu1 %vm799_vm1, %v2148_v9 }
 0x8aa   : > { %5505 = vmatprep.mubr.msk.bf16.mxu0 %vm799_vm1, %v2148_v9 }
 0x8ac   : > { %v6144_v3 = vpop.eup %6143  ;;  %v2109_v6 = vpop.f32.mrb[56].mxu0 }
 0x8ad   : > { %v1975_v10 = vadd.f32 1.0, %v6144_v3  ;;  %v5483_v11 = vpop.f32.mrb[57].mxu0 }
 0x8ae   : > { %v6146_v8 = vpop.eup %6145  ;;  %v2112_v30 = vpop.f32.mrb[58].mxu0  ;;  %v7032_v11 = vld [vmem:[%s6699_s26 + $0x1] ss:$0 sm:$0xff] }
 0x8af   : > { %6147 = vrcp.f32 %v1975_v10  ;;  %v1976_v12 = vadd.f32 1.0, %v6146_v8  ;;  %v5912_v13 = vpack.i.bf16 %v2112_v30, %v2109_v6  ;;  %v2149_v32 = vpack.c.bf16 %v2112_v30, %v2109_v6  ;;  %v5484_v15 = vpop.f32.mrb[59].mxu0 }
 0x8b1   : > { %6149 = vrcp.f32 %v1976_v12  ;;  %5913 = vrot.lane.b32.xlu0 %v5912_v13, %s7611_s12  ;;  %5492 = vmatmul.mubr.msk.bf16.vlgmr.msra.gmra.mrb[56].mxu1 %vm799_vm1, %v2149_v32 }
 0x8b2   : > { %5506 = vmatmul.mubr.msk.bf16.vlgmr.msra.gmra.mrb[64].mxu0 %vm799_vm1, %v2149_v32 }
 0x8b4   : > { %v2117_v17 = vpop.f32.mrb[60].mxu0 }
 0x8b5   : > { %v5487_v18 = vpop.f32.mrb[61].mxu0 }
 0x8b6   : > { %v2120_v21 = vpop.f32.mrb[62].mxu0 }
 0x8b7   : > { %v5917_v31 = vpack.i.bf16 %v2120_v21, %v2117_v17  ;;  %v2150_v33 = vpack.c.bf16 %v2120_v21, %v2117_v17  ;;  %v5488_v43 = vpop.f32.mrb[63].mxu0 }
 0x8b9   : > { %v6148_v34 = vpop.eup %6147  ;;  %5918 = vrot.lane.b32.xlu1 %v5917_v31, %s7611_s12  ;;  %5495 = vmatprep.mubr.msk.bf16.mxu1 %vm799_vm1, %v2150_v33 }
 0x8ba   : > { %v1987_v52 = vmul.f32 %v6148_v34, %v1853_v23  ;;  %5509 = vmatprep.mubr.msk.bf16.mxu0 %vm799_vm1, %v2150_v33 }
 0x8bb   : > { %v6150_v54 = vpop.eup %6149 }
 0x8bc   : > { %v1991_v59 = vmax.f32 %v1635_v35, %v1987_v52  ;;  %v1988_v60 = vmul.f32 %v6150_v54, %v1856_v53 }
 0x8be   : > { %4848 = vst.msk [vmem:[%s6989_s25 + $0x30] sm:$0xff] %vm1223_vm4, %v1991_v59  ;;  %v1992_v61 = vmax.f32 %v1636_v56, %v1988_v60 }
 0x8c0   : > { %4849 = vst.msk [vmem:[%s6989_s25 + $0x38] sm:$0xff] %vm1223_vm4, %v1992_v61 }
 0x91b   : > { %v5909_v37 = vpop.permute.xlu1 %5908 }
 0x91c   : > { %v5911_v24 = vunpack.i.h.bf16 %v5909_v37  ;;  %v5910_v25 = vunpack.i.l.bf16 %v5909_v37 }
 0x91e   : > { %v2151_v19 = vpack.c.bf16 %v5911_v24, %v5910_v25 }
 0x920   : > { %5496 = vmatmul.mubr.msk.bf16.gmra.mrb[60].mxu1 %vm799_vm1, %v2151_v19  ;;  %5510 = vmatmul.mubr.msk.bf16.gmra.mrb[68].mxu0 %vm799_vm1, %v2151_v19 }
 0x923   : > { %v5914_v16 = vpop.permute.xlu0 %5913 }
 0x924   : > { %v5916_v36 = vunpack.i.h.bf16 %v5914_v16  ;;  %v5915_v39 = vunpack.i.l.bf16 %v5914_v16 }
 0x926   : > { %v2152_v22 = vpack.c.bf16 %v5916_v36, %v5915_v39 }
 0x928   : > { %5499 = vmatprep.mubr.msk.bf16.mxu1 %vm799_vm1, %v2152_v22  ;;  %5513 = vmatprep.mubr.msk.bf16.mxu0 %vm799_vm1, %v2152_v22 }
 0x92b   : > { %v5919_v20 = vpop.permute.xlu1 %5918 }
 0x92c   : > { %v5921_v49 = vunpack.i.h.bf16 %v5919_v20  ;;  %v5920_v50 = vunpack.i.l.bf16 %v5919_v20 }
 0x92e   : > { %v2153_v40 = vpack.c.bf16 %v5921_v49, %v5920_v50 }
 0x930   : > { %5500 = vmatmul.mubr.msk.bf16.gmra.mrb[64].mxu1 %vm799_vm1, %v2153_v40  ;;  %5514 = vmatmul.mubr.msk.bf16.gmra.mrb[72].mxu0 %vm799_vm1, %v2153_v40 }
 0x931   : > { %5523 = vmatprep.mubr.msk.bf16.mxu1 %vm6419_vm0, %v6417_v0 }
 0x984   : > { %v5493_v38 = vpop.f32.mrb[56].mxu1 }
 0x985   : > { %v5507_v42 = vpop.f32.mrb[64].mxu0  ;;  %v2219_v44 = vpop.f32.mrb[57].mxu1  ;;  %v2228_v8 = vadd.f32 %v5493_v38, %v7032_v11 }
 0x986   : > { %v2322_v57 = vadd.f32 %v5507_v42, %v7025_v41  ;;  %v2313_v58 = vpop.f32.mrb[65].mxu0  ;;  %v5494_v45 = vpop.f32.mrb[58].mxu1  ;;  %v2220_v12 = vadd.f32 %v7032_v11, %v2219_v44 }
 0x987   : > { %v2314_v46 = vadd.f32 %v7025_v41, %v2313_v58  ;;  %v5508_v47 = vpop.f32.mrb[66].mxu0  ;;  %v2222_v48 = vpop.f32.mrb[59].mxu1  ;;  %v2231_v32 = vadd.f32 %v5494_v45, %v7032_v11 }
 0x988   : > { %v4894_v51 = vmul.f32 -1.442695, %v2322_v57  ;;  %v2325_v55 = vadd.f32 %v5508_v47, %v7025_v41  ;;  %v2316_v26 = vpop.f32.mrb[67].mxu0  ;;  %v2223_v18 = vadd.f32 %v7032_v11, %v2222_v48 }
 0x989   : > { %v4892_v62 = vmul.f32 -1.442695, %v2314_v46  ;;  %v2317_v14 = vadd.f32 %v7025_v41, %v2316_v26 }
 0x98a   : > { %6151 = vpow2.f32 %v4894_v51  ;;  %v4895_v63 = vmul.f32 -1.442695, %v2325_v55 }
 0x98b   : > { %6153 = vpow2.f32 %v4892_v62  ;;  %v4893_v1 = vmul.f32 -1.442695, %v2317_v14 }
 0x98c   : > { %6155 = vpow2.f32 %v4895_v63 }
 0x98d   : > { %6157 = vpow2.f32 %v4893_v1 }
 0x994   : > { %v6152_v2 = vpop.eup %6151 }
 0x995   : > { %v6154_v29 = vpop.eup %6153  ;;  %v2398_v4 = vadd.f32 1.0, %v6152_v2 }
 0x996   : > { %v6156_v9 = vpop.eup %6155  ;;  %v2396_v28 = vadd.f32 1.0, %v6154_v29 }
 0x997   : > { %v6158_v3 = vpop.eup %6157  ;;  %6159 = vrcp.f32 %v2398_v4  ;;  %v2399_v6 = vadd.f32 1.0, %v6156_v9 }
 0x998   : > { %6161 = vrcp.f32 %v2396_v28  ;;  %v2397_v10 = vadd.f32 1.0, %v6158_v3 }
 0x999   : > { %6163 = vrcp.f32 %v2399_v6 }
 0x99a   : > { %6165 = vrcp.f32 %v2397_v10 }
 0x9a1   : > { %v6160_v30 = vpop.eup %6159 }
 0x9a2   : > { %v6162_v13 = vpop.eup %6161  ;;  %v7037_v15 = vmul.f32 %v6160_v30, %v2228_v8 }
 0x9a3   : > { %v6164_v17 = vpop.eup %6163  ;;  %v7040_v21 = vmul.f32 %v6162_v13, %v2220_v12 }
 0x9a4   : > { %v6166_v31 = vpop.eup %6165  ;;  %v7042_v33 = vmul.f32 %v6164_v17, %v2231_v32 }
 0x9a5   : > { %v7044_v43 = vmul.f32 %v6166_v31, %v2223_v18 }
 0x9a7   : > { %v2444_v23 = vpack.c.bf16 %v7044_v43, %v7040_v21  ;;  %v6023_v43 = vld [vmem:[%s6751_s3 + $0x10] sm:$0xff]  }
 0x9a8   : > { %5535 = vmatprep.subr.bf16.mxu0 %v6023_v43 }
 0x9a9   : > { %5536 = vmatpush3.bf16.msra.mxu0 %v6023_v43 }
 0x9f3   : > { %v5497_v34 = vpop.f32.mrb[60].mxu1  ;;  %v5511_v35 = vpop.f32.mrb[68].mxu0 }
 0x9f4   : > { %v2338_v52 = vadd.f32 %v5511_v35, %v7025_v41  ;;  %v2235_v53 = vpop.f32.mrb[61].mxu1  ;;  %v2329_v54 = vpop.f32.mrb[69].mxu0  ;;  %v2244_v9 = vadd.f32 %v5497_v34, %v7032_v11 }
 0x9f5   : > { %v2330_v56 = vadd.f32 %v7025_v41, %v2329_v54  ;;  %v5498_v59 = vpop.f32.mrb[62].mxu1  ;;  %v5512_v60 = vpop.f32.mrb[70].mxu0  ;;  %v2236_v3 = vadd.f32 %v7032_v11, %v2235_v53 }
 0x9f6   : > { %v4898_v61 = vmul.f32 -1.442695, %v2338_v52  ;;  %v2341_v37 = vadd.f32 %v5512_v60, %v7025_v41  ;;  %v2238_v24 = vpop.f32.mrb[63].mxu1  ;;  %v2332_v25 = vpop.f32.mrb[71].mxu0  ;;  %v2247_v10 = vadd.f32 %v5498_v59, %v7032_v11 }
 0x9f7   : > { %v4896_v19 = vmul.f32 -1.442695, %v2330_v56  ;;  %v2333_v16 = vadd.f32 %v7025_v41, %v2332_v25  ;;  %v2239_v12 = vadd.f32 %v7032_v11, %v2238_v24 }
 0x9f8   : > { %6167 = vpow2.f32 %v4898_v61  ;;  %v4899_v36 = vmul.f32 -1.442695, %v2341_v37 }
 0x9f9   : > { %6169 = vpow2.f32 %v4896_v19  ;;  %v4897_v39 = vmul.f32 -1.442695, %v2333_v16 }
 0x9fa   : > { %6171 = vpow2.f32 %v4899_v36 }
 0x9fb   : > { %6173 = vpow2.f32 %v4897_v39 }
 0xa02   : > { %v6168_v22 = vpop.eup %6167 }
 0xa03   : > { %v6170_v20 = vpop.eup %6169  ;;  %v2402_v49 = vadd.f32 1.0, %v6168_v22  ;;  %v5501_v50 = vpop.f32.mrb[64].mxu1 }
 0xa04   : > { %v5515_v40 = vpop.f32.mrb[72].mxu0  ;;  %v6172_v38 = vpop.eup %6171  ;;  %v2400_v42 = vadd.f32 1.0, %v6170_v20  ;;  %v2260_v61 = vadd.f32 %v5501_v50, %v7032_v11 }
 0xa05   : > { %v2354_v44 = vadd.f32 %v5515_v40, %v7025_v41  ;;  %v2251_v57 = vpop.f32.mrb[65].mxu1  ;;  %v2345_v58 = vpop.f32.mrb[73].mxu0  ;;  %6175 = vrcp.f32 %v2402_v49  ;;  %v2403_v46 = vadd.f32 1.0, %v6172_v38 }
 0xa06   : > { %v6174_v45 = vpop.eup %6173  ;;  %v2346_v47 = vadd.f32 %v7025_v41, %v2345_v58  ;;  %v5502_v48 = vpop.f32.mrb[66].mxu1  ;;  %6177 = vrcp.f32 %v2400_v42  ;;  %v2252_v24 = vadd.f32 %v7032_v11, %v2251_v57 }
 0xa07   : > { %v5516_v51 = vpop.f32.mrb[74].mxu0  ;;  %v2401_v55 = vadd.f32 1.0, %v6174_v45  ;;  %v4902_v26 = vmul.f32 -1.442695, %v2354_v44  ;;  %v2254_v62 = vpop.f32.mrb[67].mxu1  ;;  %6179 = vrcp.f32 %v2403_v46  ;;  %v2263_v19 = vadd.f32 %v5502_v48, %v7032_v11  ;;  %v6025_v46 = vld [vmem:[%s6751_s3 + $0x18] sm:$0xff]  }
 0xa08   : > { %v2348_v14 = vpop.f32.mrb[75].mxu0  ;;  %v4900_v63 = vmul.f32 -1.442695, %v2346_v47  ;;  %v2357_v1 = vadd.f32 %v5516_v51, %v7025_v41  ;;  %v2255_v39 = vadd.f32 %v7032_v11, %v2254_v62  ;;  %v2445_v44 = vpack.c.bf16 %v7042_v33, %v7037_v15  ;;  %v6026_v47 = vld [vmem:[%s6759_s6 + $0x18] sm:$0xff]   ;;  %5537 = vmatprep.subr.bf16.mxu0 %v6025_v46 }
 0xa09   : > { %6181 = vrcp.f32 %v2401_v55  ;;  %v2349_v2 = vadd.f32 %v7025_v41, %v2348_v14  ;;  %5538 = vmatpush3.bf16.msra.mxu0 %v6025_v46 }
 0xa0a   : > { %6183 = vpow2.f32 %v4902_v26  ;;  %v4903_v29 = vmul.f32 -1.442695, %v2357_v1  ;;  %5567 = vmatprep.subr.bf16.mxu0 %v6417_v0 }
 0xa0b   : > { %6185 = vpow2.f32 %v4900_v63  ;;  %v4901_v4 = vmul.f32 -1.442695, %v2349_v2 }
 0xa0c   : > { %6187 = vpow2.f32 %v4903_v29 }
 0xa0d   : > { %6189 = vpow2.f32 %v4901_v4 }
 0xa0f   : > { %v6176_v28 = vpop.eup %6175 }
 0xa10   : > { %v6178_v6 = vpop.eup %6177  ;;  %v2438_v8 = vmul.f32 %v6176_v28, %v2244_v9 }
 0xa11   : > { %v6180_v30 = vpop.eup %6179  ;;  %v2436_v13 = vmul.f32 %v6178_v6, %v2236_v3 }
 0xa12   : > { %v2439_v32 = vmul.f32 %v6180_v30, %v2247_v10 }
 0xa13   : > { %v6182_v41 = vpop.eup %6181 }
 0xa14   : > { %v6184_v17 = vpop.eup %6183  ;;  %v2437_v18 = vmul.f32 %v6182_v41, %v2239_v12  ;;  %v2447_v52 = vpack.c.bf16 %v2439_v32, %v2438_v8 }
 0xa15   : > { %v6186_v31 = vpop.eup %6185  ;;  %v2406_v35 = vadd.f32 1.0, %v6184_v17 }
 0xa16   : > { %v6188_v54 = vpop.eup %6187  ;;  %v2404_v34 = vadd.f32 1.0, %v6186_v31  ;;  %v2446_v56 = vpack.c.bf16 %v2437_v18, %v2436_v13  ;;  %2453 = vrot.lane.b32.xlu0 %v2447_v52, %s7605_s4 }
 0xa17   : > { %v6190_v60 = vpop.eup %6189  ;;  %6191 = vrcp.f32 %v2406_v35  ;;  %v2407_v53 = vadd.f32 1.0, %v6188_v54 }
 0xa18   : > { %6193 = vrcp.f32 %v2404_v34  ;;  %v2405_v59 = vadd.f32 1.0, %v6190_v60  ;;  %v7116_v60 = vld [vmem:[%s6785_s17 + $0x1] ss:$0 sm:$0xff] }
 0xa19   : > { %6195 = vrcp.f32 %v2407_v53 }
 0xa1a   : > { %6197 = vrcp.f32 %v2405_v59 }
 0xa21   : > { %v6192_v37 = vpop.eup %6191 }
 0xa22   : > { %v6194_v25 = vpop.eup %6193  ;;  %v2442_v16 = vmul.f32 %v6192_v37, %v2260_v61 }
 0xa23   : > { %v6196_v36 = vpop.eup %6195  ;;  %v7065_v22 = vmul.f32 %v6194_v25, %v2252_v24 }
 0xa24   : > { %v6198_v20 = vpop.eup %6197  ;;  %v2443_v49 = vmul.f32 %v6196_v36, %v2263_v19 }
 0xa25   : > { %v7067_v40 = vmul.f32 %v6198_v20, %v2255_v39 }
 0xa26   : > { %v2449_v38 = vpack.c.bf16 %v2443_v49, %v2442_v16 }
 0xa27   : > { %v2448_v50 = vpack.c.bf16 %v7067_v40, %v7065_v22 }
 0xa28   : > { %2457 = vrot.lane.b32.xlu0 %v2449_v38, %s7605_s4 }
 0xa29   : > { %2455 = vrot.lane.b32.xlu1 %v2448_v50, %s7605_s4 }
 0xa88   : > { %v2454_v42 = vpop.permute.xlu0 %2453 }
 0xa89   : > { %v2461_v11 = vsel %vm1223_vm4, %v2444_v23, %v2454_v42  ;;  %v6024_v23 = vld [vmem:[%s6759_s6 + $0x10] sm:$0xff]  }
 0xa8a   : > { %5518 = vmatpush3.bf16.msra.mxu1 %v2461_v11 }
 0xa8b   : > { %5519 = vmatprep.subr.bf16.mxu1 %v6417_v0 }
 0xa9a   : > { %v2458_v45 = vpop.permute.xlu0 %2457 }
 0xa9b   : > { %v2456_v57 = vpop.permute.xlu1 %2455  ;;  %v2469_v21 = vsel %vm1223_vm4, %v2446_v56, %v2458_v45 }
 0xa9c   : > { %v2465_v58 = vsel %vm1223_vm4, %v2445_v44, %v2456_v57 }
 0xa9d   : > { %5520 = vmatpush3.bf16.msra.mxu1 %v2465_v58 }
 0xa9e   : > { %5521 = vmatprep.subr.bf16.mxu1 %v6417_v0 }
 0xaa1   : > { %5522 = vmatpush3.bf16.msra.mxu1 %v2469_v21 }
 0xaa2   : > { %5551 = vmatprep.subr.bf16.mxu1 %v6024_v23 }
 0xaa4   : > { %5524 = vmatmul.mubr.msk.bf16.vlgmr.msra.gmra.mrb[68].mxu1 %vm824_vm2, %v6932_v5 }
 0xaa5   : > { %5527 = vmatprep.mubr.msk.bf16.mxu1 %vm6419_vm0, %v6417_v0  ;;  %5552 = vmatpush3.bf16.msra.mxu1 %v6024_v23 }
 0xaa6   : > { %5553 = vmatprep.subr.bf16.mxu1 %v6026_v47 }
 0xaa9   : > { %5554 = vmatpush3.bf16.msra.mxu1 %v6026_v47  ;;  %v7123_v47 = vld [vmem:[%s6798_s0 + $0x1] ss:$0 sm:$0xff] }
 0xaac   : > { %5528 = vmatmul.mubr.msk.bf16.gmra.mrb[72].mxu1 %vm824_vm2, %v6941_v7 }
 0xaad   : > { %5531 = vmatprep.mubr.msk.bf16.mxu1 %vm6419_vm0, %v6417_v0 }
 0xab4   : > { %5532 = vmatmul.mubr.msk.bf16.gmra.mrb[76].mxu1 %vm824_vm2, %v6950_v27 }
 0xb77   : > { %v2505_v48 = vpop.f32.mrb[68].mxu1 }
 0xb78   : > { %v5525_v51 = vpop.f32.mrb[69].mxu1 }
 0xb79   : > { %v2508_v55 = vpop.f32.mrb[70].mxu1 }
 0xb7a   : > { %v5922_v26 = vpack.i.bf16 %v2508_v55, %v2505_v48  ;;  %v2552_v62 = vpack.c.bf16 %v2508_v55, %v2505_v48  ;;  %v5526_v14 = vpop.f32.mrb[71].mxu1 }
 0xb7c   : > { %5923 = vrot.lane.b32.xlu1 %v5922_v26, %s7609_s9  ;;  %5539 = vmatprep.mubr.msk.bf16.mxu0 %vm1223_vm4, %v2552_v62 }
 0xb7d   : > { %5555 = vmatprep.mubr.msk.bf16.mxu1 %vm1223_vm4, %v2552_v62 }
 0xb7f   : > { %v2513_v63 = vpop.f32.mrb[72].mxu1 }
 0xb80   : > { %v5529_v1 = vpop.f32.mrb[73].mxu1 }
 0xb81   : > { %v2516_v2 = vpop.f32.mrb[74].mxu1 }
 0xb82   : > { %v5927_v29 = vpack.i.bf16 %v2516_v2, %v2513_v63  ;;  %v2553_v4 = vpack.c.bf16 %v2516_v2, %v2513_v63  ;;  %v5530_v9 = vpop.f32.mrb[75].mxu1 }
 0xb84   : > { %5928 = vrot.lane.b32.xlu0 %v5927_v29, %s7609_s9  ;;  %5540 = vmatmul.mubr.msk.bf16.vlgmr.msra.gmra.mrb[76].mxu0 %vm1223_vm4, %v2553_v4 }
 0xb85   : > { %5556 = vmatmul.mubr.msk.bf16.vlgmr.msra.gmra.mrb[80].mxu1 %vm1223_vm4, %v2553_v4 }
 0xb87   : > { %v2521_v28 = vpop.f32.mrb[76].mxu1 }
 0xb88   : > { %v5533_v3 = vpop.f32.mrb[77].mxu1 }
 0xb89   : > { %v2524_v6 = vpop.f32.mrb[78].mxu1 }
 0xb8a   : > { %v5932_v10 = vpack.i.bf16 %v2524_v6, %v2521_v28  ;;  %v2554_v8 = vpack.c.bf16 %v2524_v6, %v2521_v28  ;;  %v5534_v30 = vpop.f32.mrb[79].mxu1 }
 0xb8c   : > { %5933 = vrot.lane.b32.xlu1 %v5932_v10, %s7609_s9  ;;  %5543 = vmatprep.mubr.msk.bf16.mxu0 %vm1223_vm4, %v2554_v8 }
 0xb8d   : > { %5559 = vmatprep.mubr.msk.bf16.mxu1 %vm1223_vm4, %v2554_v8 }
 0xbee   : > { %v5924_v12 = vpop.permute.xlu1 %5923 }
 0xbef   : > { %v5926_v13 = vunpack.i.h.bf16 %v5924_v12  ;;  %v5925_v41 = vunpack.i.l.bf16 %v5924_v12 }
 0xbf1   : > { %v2555_v32 = vpack.c.bf16 %v5926_v13, %v5925_v41 }
 0xbf3   : > { %5544 = vmatmul.mubr.msk.bf16.gmra.mrb[80].mxu0 %vm1223_vm4, %v2555_v32  ;;  %5560 = vmatmul.mubr.msk.bf16.gmra.mrb[84].mxu1 %vm1223_vm4, %v2555_v32 }
 0xbf6   : > { %v5929_v17 = vpop.permute.xlu0 %5928 }
 0xbf7   : > { %v5931_v18 = vunpack.i.h.bf16 %v5929_v17  ;;  %v5930_v31 = vunpack.i.l.bf16 %v5929_v17 }
 0xbf9   : > { %v2556_v35 = vpack.c.bf16 %v5931_v18, %v5930_v31 }
 0xbfb   : > { %5547 = vmatprep.mubr.msk.bf16.mxu0 %vm1223_vm4, %v2556_v35  ;;  %5563 = vmatprep.mubr.msk.bf16.mxu1 %vm1223_vm4, %v2556_v35 }
 0xbfe   : > { %v5934_v52 = vpop.permute.xlu1 %5933 }
 0xbff   : > { %v5936_v54 = vunpack.i.h.bf16 %v5934_v52  ;;  %v5935_v34 = vunpack.i.l.bf16 %v5934_v52 }
 0xc01   : > { %v2557_v56 = vpack.c.bf16 %v5936_v54, %v5935_v34 }
 0xc03   : > { %5548 = vmatmul.mubr.msk.bf16.gmra.mrb[84].mxu0 %vm1223_vm4, %v2557_v56  ;;  %5564 = vmatmul.mubr.msk.bf16.gmra.mrb[88].mxu1 %vm1223_vm4, %v2557_v56 }
 0xc04   : > { %5573 = vmatprep.mubr.msk.bf16.mxu0 %vm6419_vm0, %v6417_v0 }
 0xc57   : > { %v5541_v53 = vpop.f32.mrb[76].mxu0 }
 0xc58   : > { %v5557_v59 = vpop.f32.mrb[80].mxu1  ;;  %v2635_v61 = vpop.f32.mrb[77].mxu0  ;;  %v2644_v48 = vadd.f32 %v5541_v53, %v7123_v47 }
 0xc59   : > { %v2750_v37 = vadd.f32 %v5557_v59, %v7116_v60  ;;  %v2741_v24 = vpop.f32.mrb[81].mxu1  ;;  %v5542_v25 = vpop.f32.mrb[78].mxu0  ;;  %v2636_v55 = vadd.f32 %v7123_v47, %v2635_v61 }
 0xc5a   : > { %v2742_v19 = vadd.f32 %v7116_v60, %v2741_v24  ;;  %v5558_v16 = vpop.f32.mrb[82].mxu1  ;;  %v2638_v36 = vpop.f32.mrb[79].mxu0  ;;  %v2647_v62 = vadd.f32 %v5542_v25, %v7123_v47 }
 0xc5b   : > { %v4937_v39 = vmul.f32 -1.442695, %v2750_v37  ;;  %v2753_v20 = vadd.f32 %v5558_v16, %v7116_v60  ;;  %v2744_v49 = vpop.f32.mrb[83].mxu1  ;;  %v2639_v1 = vadd.f32 %v7123_v47, %v2638_v36 }
 0xc5c   : > { %v4935_v38 = vmul.f32 -1.442695, %v2742_v19  ;;  %v2745_v50 = vadd.f32 %v7116_v60, %v2744_v49 }
 0xc5d   : > { %6199 = vpow2.f32 %v4937_v39  ;;  %v4938_v42 = vmul.f32 -1.442695, %v2753_v20 }
 0xc5e   : > { %6201 = vpow2.f32 %v4935_v38  ;;  %v4936_v11 = vmul.f32 -1.442695, %v2745_v50 }
 0xc5f   : > { %6203 = vpow2.f32 %v4938_v42 }
 0xc60   : > { %6205 = vpow2.f32 %v4936_v11 }
 0xc67   : > { %v6200_v44 = vpop.eup %6199 }
 0xc68   : > { %v6202_v57 = vpop.eup %6201  ;;  %v2826_v58 = vadd.f32 1.0, %v6200_v44 }
 0xc69   : > { %v6204_v45 = vpop.eup %6203  ;;  %v2824_v21 = vadd.f32 1.0, %v6202_v57 }
 0xc6a   : > { %v6206_v43 = vpop.eup %6205  ;;  %6207 = vrcp.f32 %v2826_v58  ;;  %v2827_v23 = vadd.f32 1.0, %v6204_v45 }
 0xc6b   : > { %6209 = vrcp.f32 %v2824_v21  ;;  %v2825_v46 = vadd.f32 1.0, %v6206_v43 }
 0xc6c   : > { %6211 = vrcp.f32 %v2827_v23 }
 0xc6d   : > { %6213 = vrcp.f32 %v2825_v46 }
 0xc74   : > { %v6208_v51 = vpop.eup %6207 }
 0xc75   : > { %v6210_v26 = vpop.eup %6209  ;;  %v7128_v14 = vmul.f32 %v6208_v51, %v2644_v48 }
 0xc76   : > { %v6212_v63 = vpop.eup %6211  ;;  %v7131_v2 = vmul.f32 %v6210_v26, %v2636_v55 }
 0xc77   : > { %v6214_v29 = vpop.eup %6213  ;;  %v7133_v4 = vmul.f32 %v6212_v63, %v2647_v62 }
 0xc78   : > { %v7135_v9 = vmul.f32 %v6214_v29, %v2639_v1 }
 0xc79   : > { %v2877_v28 = vpack.c.bf16 %v7133_v4, %v7128_v14 }
 0xc7a   : > { %v2876_v3 = vpack.c.bf16 %v7135_v9, %v7131_v2  ;;  %v6027_v9 = vld [vmem:[%s6869_s8 + $0x10] sm:$0xff]  }
 0xc7b   : > { %5585 = vmatprep.subr.bf16.mxu1 %v6027_v9 }
 0xc7c   : > { %5586 = vmatpush3.bf16.msra.mxu1 %v6027_v9 }
 0xcc6   : > { %v5545_v6 = vpop.f32.mrb[80].mxu0  ;;  %v5561_v10 = vpop.f32.mrb[84].mxu1 }
 0xcc7   : > { %v2766_v8 = vadd.f32 %v5561_v10, %v7116_v60  ;;  %v2651_v30 = vpop.f32.mrb[81].mxu0  ;;  %v2757_v12 = vpop.f32.mrb[85].mxu1  ;;  %v2660_v48 = vadd.f32 %v5545_v6, %v7123_v47 }
 0xcc8   : > { %v2758_v13 = vadd.f32 %v7116_v60, %v2757_v12  ;;  %v5546_v41 = vpop.f32.mrb[82].mxu0  ;;  %v5562_v32 = vpop.f32.mrb[86].mxu1  ;;  %v2652_v55 = vadd.f32 %v7123_v47, %v2651_v30 }
 0xcc9   : > { %v4941_v17 = vmul.f32 -1.442695, %v2766_v8  ;;  %v2769_v18 = vadd.f32 %v5562_v32, %v7116_v60  ;;  %v2654_v31 = vpop.f32.mrb[83].mxu0  ;;  %v2760_v35 = vpop.f32.mrb[87].mxu1  ;;  %v2663_v62 = vadd.f32 %v5546_v41, %v7123_v47 }
 0xcca   : > { %v4939_v52 = vmul.f32 -1.442695, %v2758_v13  ;;  %v2761_v54 = vadd.f32 %v7116_v60, %v2760_v35  ;;  %v2655_v29 = vadd.f32 %v7123_v47, %v2654_v31 }
 0xccb   : > { %6215 = vpow2.f32 %v4941_v17  ;;  %v4942_v34 = vmul.f32 -1.442695, %v2769_v18 }
 0xccc   : > { %6217 = vpow2.f32 %v4939_v52  ;;  %v4940_v56 = vmul.f32 -1.442695, %v2761_v54 }
 0xccd   : > { %6219 = vpow2.f32 %v4942_v34 }
 0xcce   : > { %6221 = vpow2.f32 %v4940_v56 }
 0xcd5   : > { %v6216_v53 = vpop.eup %6215 }
 0xcd6   : > { %v6218_v59 = vpop.eup %6217  ;;  %v2830_v61 = vadd.f32 1.0, %v6216_v53  ;;  %v5549_v37 = vpop.f32.mrb[84].mxu0 }
 0xcd7   : > { %v5565_v24 = vpop.f32.mrb[88].mxu1  ;;  %v6220_v25 = vpop.eup %6219  ;;  %v2828_v19 = vadd.f32 1.0, %v6218_v59  ;;  %v2676_v31 = vadd.f32 %v5549_v37, %v7123_v47 }
 0xcd8   : > { %v2782_v16 = vadd.f32 %v5565_v24, %v7116_v60  ;;  %v2667_v36 = vpop.f32.mrb[85].mxu0  ;;  %v2773_v39 = vpop.f32.mrb[89].mxu1  ;;  %6223 = vrcp.f32 %v2830_v61  ;;  %v2831_v49 = vadd.f32 1.0, %v6220_v25 }
 0xcd9   : > { %v6222_v20 = vpop.eup %6221  ;;  %v2774_v38 = vadd.f32 %v7116_v60, %v2773_v39  ;;  %v5550_v50 = vpop.f32.mrb[86].mxu0  ;;  %6225 = vrcp.f32 %v2828_v19  ;;  %v2668_v56 = vadd.f32 %v7123_v47, %v2667_v36 }
 0xcda   : > { %v5566_v42 = vpop.f32.mrb[90].mxu1  ;;  %v2829_v11 = vadd.f32 1.0, %v6222_v20  ;;  %v4945_v44 = vmul.f32 -1.442695, %v2782_v16  ;;  %v2670_v57 = vpop.f32.mrb[87].mxu0  ;;  %6227 = vrcp.f32 %v2831_v49  ;;  %v2679_v59 = vadd.f32 %v5550_v50, %v7123_v47 }
 0xcdb   : > { %v2776_v58 = vpop.f32.mrb[91].mxu1  ;;  %v4943_v45 = vmul.f32 -1.442695, %v2774_v38  ;;  %v2785_v21 = vadd.f32 %v5566_v42, %v7116_v60  ;;  %v2671_v25 = vadd.f32 %v7123_v47, %v2670_v57  ;;  %v5002_v57 = vld [vmem:[%s6563_s23 + $0xa8] sm:$0xff] }
 0xcdc   : > { %6229 = vrcp.f32 %v2829_v11  ;;  %v2777_v43 = vadd.f32 %v7116_v60, %v2776_v58  ;;  %v4995_v11 = vld [vmem:[%s6568_s27 + $0x28] sm:$0xff] }
 0xcdd   : > { %6231 = vpow2.f32 %v4945_v44  ;;  %v4946_v23 = vmul.f32 -1.442695, %v2785_v21  ;;  %v5001_v44 = vld [vmem:[%s6563_s23 + $0xa0] sm:$0xff]  ;;  %v3273_v58 = vadd.f32 %v5002_v57, %v4995_v11 }
 0xcde   : > { %6233 = vpow2.f32 %v4943_v45  ;;  %v4944_v46 = vmul.f32 -1.442695, %v2777_v43  ;;  %v4987_v21 = vld [vmem:[%s6563_s23 + $0x20] sm:$0xff]  ;;  %v4988_v43 = vld [vmem:[%s6563_s23 + $0x28] sm:$0xff] }
 0xcdf   : > { %6235 = vpow2.f32 %v4946_v23 }
 0xce0   : > { %6237 = vpow2.f32 %v4944_v46 }
 0xce2   : > { %v6224_v51 = vpop.eup %6223 }
 0xce3   : > { %v6226_v26 = vpop.eup %6225  ;;  %v2866_v63 = vmul.f32 %v6224_v51, %v2660_v48 }
 0xce4   : > { %v6228_v1 = vpop.eup %6227  ;;  %v2864_v10 = vmul.f32 %v6226_v26, %v2652_v55  ;;  %v3259_v55 = vadd.f32 %v4995_v11, %v4988_v43 }
 0xce5   : > { %v2867_v8 = vmul.f32 %v6228_v1, %v2663_v62 }
 0xce6   : > { %v6230_v60 = vpop.eup %6229 }
 0xce7   : > { %v6232_v12 = vpop.eup %6231  ;;  %v2865_v13 = vmul.f32 %v6230_v60, %v2655_v29  ;;  %v2879_v18 = vpack.c.bf16 %v2867_v8, %v2866_v63  ;;  %v4996_v60 = vld [vmem:[%s6568_s27 + $0x30] sm:$0xff]  ;;  %v4997_v8 = vld [vmem:[%s6568_s27 + $0x38] sm:$0xff] }
 0xce8   : > { %v6234_v32 = vpop.eup %6233  ;;  %v2834_v17 = vadd.f32 1.0, %v6232_v12  ;;  %v5003_v12 = vld [vmem:[%s6563_s23 + $0xb0] sm:$0xff] }
 0xce9   : > { %v6236_v35 = vpop.eup %6235  ;;  %v2832_v6 = vadd.f32 1.0, %v6234_v32  ;;  %v2878_v52 = vpack.c.bf16 %v2865_v13, %v2864_v10  ;;  %2885 = vrot.lane.b32.xlu0 %v2879_v18, %s7605_s4  ;;  %v5004_v13 = vld [vmem:[%s6563_s23 + $0xb8] sm:$0xff] }
 0xcea   : > { %v6238_v54 = vpop.eup %6237  ;;  %6239 = vrcp.f32 %v2834_v17  ;;  %v2835_v30 = vadd.f32 1.0, %v6236_v35 }
 0xceb   : > { %6241 = vrcp.f32 %v2832_v6  ;;  %v2833_v41 = vadd.f32 1.0, %v6238_v54  ;;  %v3275_v54 = vadd.f32 %v5004_v13, %v4997_v8 }
 0xcec   : > { %6243 = vrcp.f32 %v2835_v30 }
 0xced   : > { %6245 = vrcp.f32 %v2833_v41 }
 0xcf4   : > { %v6240_v34 = vpop.eup %6239 }
 0xcf5   : > { %v6242_v53 = vpop.eup %6241  ;;  %v2870_v61 = vmul.f32 %v6240_v34, %v2676_v31 }
 0xcf6   : > { %v6244_v24 = vpop.eup %6243  ;;  %v7158_v19 = vmul.f32 %v6242_v53, %v2668_v56  ;;  %v4998_v53 = vld [vmem:[%s6568_s27 + $0x40] sm:$0xff] }
 0xcf7   : > { %v6246_v16 = vpop.eup %6245  ;;  %v2871_v39 = vmul.f32 %v6244_v24, %v2679_v59  ;;  %v4999_v59 = vld [vmem:[%s6568_s27 + $0x48] sm:$0xff] }
 0xcf8   : > { %v7160_v20 = vmul.f32 %v6246_v16, %v2671_v25  ;;  %v5006_v24 = vld [vmem:[%s6563_s23 + $0xc8] sm:$0xff] }
 0xcf9   : > { %v2881_v49 = vpack.c.bf16 %v2871_v39, %v2870_v61  ;;  %v5005_v61 = vld [vmem:[%s6563_s23 + $0xc0] sm:$0xff] }
 0xcfa   : > { %v2880_v37 = vpack.c.bf16 %v7160_v20, %v7158_v19  ;;  %v3276_v39 = vadd.f32 %v5005_v61, %v4998_v53 }
 0xcfb   : > { %2889 = vrot.lane.b32.xlu0 %v2881_v49, %s7605_s4  ;;  %v3277_v49 = vadd.f32 %v5006_v24, %v4999_v59 }
 0xcfc   : > { %2887 = vrot.lane.b32.xlu1 %v2880_v37, %s7605_s4 }
 0xd5b   : > { %v2886_v36 = vpop.permute.xlu0 %2885 }
 0xd5c   : > { %v2893_v47 = vsel %vm1223_vm4, %v2876_v3, %v2886_v36  ;;  %v6030_v3 = vld [vmem:[%s6875_s24 + $0x18] sm:$0xff]  }
 0xd5d   : > { %5568 = vmatpush3.bf16.msra.mxu0 %v2893_v47 }
 0xd5e   : > { %5569 = vmatprep.subr.bf16.mxu0 %v6417_v0 }
 0xd6d   : > { %v2890_v42 = vpop.permute.xlu0 %2889 }
 0xd6e   : > { %v2888_v38 = vpop.permute.xlu1 %2887  ;;  %v2901_v2 = vsel %vm1223_vm4, %v2878_v52, %v2890_v42  ;;  %v3274_v52 = vadd.f32 %v5003_v12, %v4996_v60 }
 0xd6f   : > { %v2897_v50 = vsel %vm1223_vm4, %v2877_v28, %v2888_v38  ;;  %v6028_v28 = vld [vmem:[%s6875_s24 + $0x10] sm:$0xff]  }
 0xd70   : > { %5570 = vmatpush3.bf16.msra.mxu0 %v2897_v50  ;;  %v5952_v56 = vpack.i.bf16 %v3275_v54, %v3274_v52  ;;  %v5962_v50 = vpack.i.bf16 %v3277_v49, %v3276_v39  ;;  %v4969_v52 = vld [vmem:[%s6958_s11 + $0x1] ss:$0 sm:$0xff]  ;;  %v5010_v49 = vld [vmem:[%s6636_s1 + $0x4] sm:$0x3]  ;;  %s7612_s1 = sand.u32 1, %s6407_s19  }
 0xd71   : > { %5571 = vmatprep.subr.bf16.mxu0 %v6417_v0 }
 0xd74   : > { %5572 = vmatpush3.bf16.msra.mxu0 %v2901_v2 }
 0xd75   : > { %5601 = vmatprep.subr.bf16.mxu0 %v6028_v28 }
 0xd77   : > { %5574 = vmatmul.mubr.msk.bf16.vlgmr.msra.gmra.mrb[88].mxu0 %vm824_vm2, %v6932_v5  ;;  %v6029_v5 = vld [vmem:[%s6869_s8 + $0x18] sm:$0xff]  }
 0xd78   : > { %5577 = vmatprep.mubr.msk.bf16.mxu0 %vm6419_vm0, %v6417_v0  ;;  %5602 = vmatpush3.bf16.msra.mxu0 %v6028_v28 }
 0xd79   : > { %5587 = vmatprep.subr.bf16.mxu1 %v6029_v5  ;;  %5603 = vmatprep.subr.bf16.mxu0 %v6030_v3 }
 0xd7a   : > { %5588 = vmatpush3.bf16.msra.mxu1 %v6029_v5  ;;  %v4989_v5 = vld [vmem:[%s6563_s23 + $0x30] sm:$0xff] }
 0xd7b   : > { %5617 = vmatprep.subr.bf16.mxu1 %v6417_v0  ;;  %v3260_v57 = vadd.f32 %v4996_v60, %v4989_v5  ;;  %v2872_v5 = vmax.f32 %v7037_v15, %v7128_v14 }
 0xd7c   : > { %5604 = vmatpush3.bf16.msra.mxu0 %v6030_v3  ;;  %v4990_v3 = vld [vmem:[%s6563_s23 + $0x38] sm:$0xff] }
 0xd7d   : > { %5771 = vmatprep.subr.msk.bf16.mxu0 %vm947_vm3, %v5010_v49 }
 0xd7f   : > { %5578 = vmatmul.mubr.msk.bf16.gmra.mrb[92].mxu0 %vm824_vm2, %v6941_v7  ;;  %v4994_v7 = vld [vmem:[%s6568_s27 + $0x20] sm:$0xff] }
 0xd80   : > { %5581 = vmatprep.mubr.msk.bf16.mxu0 %vm6419_vm0, %v6417_v0  ;;  %v3258_v51 = vadd.f32 %v4994_v7, %v4987_v21 }
 0xd87   : > { %5582 = vmatmul.mubr.msk.bf16.gmra.mrb[96].mxu0 %vm824_vm2, %v6950_v27  ;;  %v3272_v27 = vadd.f32 %v5001_v44, %v4994_v7 }
 0xd89   : > { %v5937_v45 = vpack.i.bf16 %v3273_v58, %v3272_v27  ;;  %v3261_v27 = vadd.f32 %v4997_v8, %v4990_v3 }
 0xd8b   : > { %5938 = vrot.lane.b32.xlu0 %v5937_v45, %s7608_s7 }
 0xdfd   : > { %v5939_v1 = vpop.permute.xlu0 %5938 }
 0xdfe   : > { %v5941_v29 = vunpack.i.h.bf16 %v5939_v1  ;;  %v5940_v10 = vunpack.i.l.bf16 %v5939_v1 }
 0xe00   : > { %v3303_v32 = vsel %vm799_vm1, %v3259_v55, %v5941_v29  ;;  %v3302_v17 = vsel %vm799_vm1, %v3258_v51, %v5940_v10  ;;  %v4992_v51 = vld [vmem:[%s6563_s23 + $0x48] sm:$0xff] }
 0xe01   : > { %v3308_v18 = vpack.c.bf16 %v3303_v32, %v3302_v17  ;;  %v3263_v29 = vadd.f32 %v4999_v59, %v4992_v51 }
 0xe4a   : > { %v2937_v23 = vpop.f32.mrb[88].mxu0 }
 0xe4b   : > { %v5575_v46 = vpop.f32.mrb[89].mxu0 }
 0xe4c   : > { %v2940_v48 = vpop.f32.mrb[90].mxu0 }
 0xe4d   : > { %v5942_v26 = vpack.i.bf16 %v2940_v48, %v2937_v23  ;;  %v2984_v62 = vpack.c.bf16 %v2940_v48, %v2937_v23  ;;  %v5576_v63 = vpop.f32.mrb[91].mxu0  ;;  %v4991_v48 = vld [vmem:[%s6563_s23 + $0x40] sm:$0xff] }
 0xe4e   : > { %v3262_v1 = vadd.f32 %v4998_v53, %v4991_v48 }
 0xe4f   : > { %5943 = vrot.lane.b32.xlu1 %v5942_v26, %s7609_s9  ;;  %5589 = vmatprep.mubr.msk.bf16.mxu1 %vm1223_vm4, %v2984_v62 }
 0xe50   : > { %5605 = vmatprep.mubr.msk.bf16.mxu0 %vm1223_vm4, %v2984_v62 }
 0xe52   : > { %v2945_v35 = vpop.f32.mrb[92].mxu0 }
 0xe53   : > { %v5579_v6 = vpop.f32.mrb[93].mxu0 }
 0xe54   : > { %v2948_v30 = vpop.f32.mrb[94].mxu0  ;;  %v7259_v6 = vld [vmem:[%s7551_s2 + $0x10] sm:$0xff]  }
 0xe55   : > { %v5947_v41 = vpack.i.bf16 %v2948_v30, %v2945_v35  ;;  %v2985_v31 = vpack.c.bf16 %v2948_v30, %v2945_v35  ;;  %v5580_v34 = vpop.f32.mrb[95].mxu0  ;;  %v7250_v35 = vld [vmem:[%s7551_s2 + $0x8] sm:$0xff]  }
 0xe57   : > { %5948 = vrot.lane.b32.xlu1 %v5947_v41, %s7609_s9  ;;  %5590 = vmatmul.mubr.msk.bf16.vlgmr.msra.gmra.mrb[92].mxu1 %vm1223_vm4, %v2985_v31 }
 0xe58   : > { %5606 = vmatmul.mubr.msk.bf16.vlgmr.msra.gmra.mrb[100].mxu0 %vm1223_vm4, %v2985_v31  ;;  %5618 = vmatpush3.bf16.msra.mxu1 %v3308_v18  ;;  %v7241_v18 = vld [vmem:[%s7551_s2] sm:$0xff]  }
 0xe59   : > { %5619 = vmatprep.subr.bf16.mxu1 %v6417_v0 }
 0xe5a   : > { %v2953_v25 = vpop.f32.mrb[96].mxu0 }
 0xe5b   : > { %v5583_v16 = vpop.f32.mrb[97].mxu0  ;;  %5953 = vrot.lane.b32.xlu1 %v5952_v56, %s7608_s7 }
 0xe5c   : > { %v2956_v37 = vpop.f32.mrb[98].mxu0 }
 0xe5d   : > { %v5957_v36 = vpack.i.bf16 %v2956_v37, %v2953_v25  ;;  %v2986_v47 = vpack.c.bf16 %v2956_v37, %v2953_v25  ;;  %v5584_v38 = vpop.f32.mrb[99].mxu0  ;;  %v5019_v37 = vld [vmem:[%s6644_s20 + $0x4] sm:$0x3] }
 0xe5e   : > { %v3521_v38 = vsel %vm947_vm3, %v5019_v37, 0 }
 0xe5f   : > { %5958 = vrot.lane.b32.xlu0 %v5957_v36, %s7609_s9  ;;  %5593 = vmatprep.mubr.msk.bf16.mxu1 %vm1223_vm4, %v2986_v47 }
 0xe60   : > { %5609 = vmatprep.mubr.msk.bf16.mxu0 %vm1223_vm4, %v2986_v47  ;;  %v3427_v47 = vsel %vm947_vm3, %v5010_v49, 0 }
 0xe61   : > { %5636 = vmatpush3.bf16.msra.mxu0 %v3427_v47 }
 0xe62   : > { %5663 = vmatprep.subr.bf16.mxu0 %v6417_v0 }
 0xe63   : > { %5963 = vrot.lane.b32.xlu0 %v5962_v50, %s7608_s7 }
 0xec1   : > { %v5944_v42 = vpop.permute.xlu1 %5943 }
 0xec2   : > { %v5946_v2 = vunpack.i.h.bf16 %v5944_v42  ;;  %v5945_v9 = vunpack.i.l.bf16 %v5944_v42 }
 0xec4   : > { %v2987_v28 = vpack.c.bf16 %v5946_v2, %v5945_v9  ;;  %v7272_v2 = vld [vmem:[%s6976_s10 + $0x1] ss:$0 sm:$0xff] }
 0xec6   : > { %5594 = vmatmul.mubr.msk.bf16.gmra.mrb[96].mxu1 %vm1223_vm4, %v2987_v28  ;;  %5610 = vmatmul.mubr.msk.bf16.gmra.mrb[104].mxu0 %vm1223_vm4, %v2987_v28 }
 0xec9   : > { %v5949_v7 = vpop.permute.xlu1 %5948 }
 0xeca   : > { %v5951_v11 = vunpack.i.h.bf16 %v5949_v7  ;;  %v5950_v44 = vunpack.i.l.bf16 %v5949_v7 }
 0xecc   : > { %v2988_v58 = vpack.c.bf16 %v5951_v11, %v5950_v44  ;;  %v2873_v44 = vmax.f32 %v7042_v33, %v7133_v4 }
 0xecd   : > { %v5954_v45 = vpop.permute.xlu1 %5953 }
 0xece   : > { %5597 = vmatprep.mubr.msk.bf16.mxu1 %vm1223_vm4, %v2988_v58  ;;  %5613 = vmatprep.mubr.msk.bf16.mxu0 %vm1223_vm4, %v2988_v58  ;;  %v5956_v21 = vunpack.i.h.bf16 %v5954_v45  ;;  %v5955_v43 = vunpack.i.l.bf16 %v5954_v45 }
 0xed0   : > { %v3305_v23 = vsel %vm799_vm1, %v3261_v27, %v5956_v21  ;;  %v3304_v46 = vsel %vm799_vm1, %v3260_v57, %v5955_v43 }
 0xed1   : > { %v3309_v55 = vpack.c.bf16 %v3305_v23, %v3304_v46  ;;  %v5959_v26 = vpop.permute.xlu0 %5958 }
 0xed2   : > { %v5961_v62 = vunpack.i.h.bf16 %v5959_v26  ;;  %v5960_v63 = vunpack.i.l.bf16 %v5959_v26 }
 0xed3   : > { %5620 = vmatpush3.bf16.msra.mxu1 %v3309_v55 }
 0xed4   : > { %v2989_v10 = vpack.c.bf16 %v5961_v62, %v5960_v63  ;;  %5621 = vmatprep.subr.bf16.mxu1 %v6417_v0 }
 0xed5   : > { %v5964_v60 = vpop.permute.xlu0 %5963 }
 0xed6   : > { %v5966_v8 = vunpack.i.h.bf16 %v5964_v60  ;;  %v5965_v12 = vunpack.i.l.bf16 %v5964_v60  ;;  %5598 = vmatmul.mubr.msk.bf16.gmra.mrb[100].mxu1 %vm1223_vm4, %v2989_v10  ;;  %5614 = vmatmul.mubr.msk.bf16.gmra.mrb[108].mxu0 %vm1223_vm4, %v2989_v10 }
 0xed7   : > { %5623 = vmatprep.mubr.msk.bf16.mxu1 %vm6419_vm0, %v6417_v0 }
 0xed8   : > { %v3307_v13 = vsel %vm799_vm1, %v3263_v29, %v5966_v8  ;;  %v3306_v32 = vsel %vm799_vm1, %v3262_v1, %v5965_v12 }
 0xed9   : > { %v3310_v17 = vpack.c.bf16 %v3307_v13, %v3306_v32 }
 0xedb   : > { %5622 = vmatpush3.bf16.msra.mxu1 %v3310_v17 }
 0xedc   : > { %5772 = vmatprep.subr.msk.bf16.mxu1 %vm947_vm3, %v5019_v37 }
 0xede   : > { %5624 = vmatmul.mubr.msk.bf16.vlgmr.msra.gmra.mrb[104].mxu1 %vm824_vm2, %v7241_v18 }
 0xedf   : > { %5627 = vmatprep.mubr.msk.bf16.mxu1 %vm6419_vm0, %v6417_v0  ;;  %5650 = vmatpush3.bf16.msra.mxu1 %v3521_v38 }
 0xee6   : > { %5628 = vmatmul.mubr.msk.bf16.gmra.mrb[108].mxu1 %vm824_vm2, %v7250_v35 }
 0xee7   : > { %5631 = vmatprep.mubr.msk.bf16.mxu1 %vm6419_vm0, %v6417_v0 }
 0xeee   : > { %5632 = vmatmul.mubr.msk.bf16.gmra.mrb[112].mxu1 %vm824_vm2, %v7259_v6 }
 0xf2a   : > { %v5591_v54 = vpop.f32.mrb[92].mxu1 }
 0xf2b   : > { %v5607_v30 = vpop.f32.mrb[100].mxu0  ;;  %v3067_v41 = vpop.f32.mrb[93].mxu1  ;;  %v3074_v9 = vadd.f32 %v5591_v54, %v7272_v2 }
 0xf2c   : > { %v3172_v31 = vadd.f32 %v5607_v30, %v4969_v52  ;;  %v3165_v34 = vpop.f32.mrb[101].mxu0  ;;  %v5592_v56 = vpop.f32.mrb[94].mxu1 }
 0xf2d   : > { %v5608_v53 = vpop.f32.mrb[102].mxu0  ;;  %v3069_v59 = vpop.f32.mrb[95].mxu1  ;;  %v3077_v7 = vadd.f32 %v5592_v56, %v7272_v2 }
 0xf2e   : > { %v4978_v61 = vmul.f32 -1.442695, %v3172_v31  ;;  %v3175_v24 = vadd.f32 %v5608_v53, %v4969_v52  ;;  %v3167_v25 = vpop.f32.mrb[103].mxu0 }
 0xf30   : > { %6247 = vpow2.f32 %v4978_v61  ;;  %v4979_v16 = vmul.f32 -1.442695, %v3175_v24 }
 0xf32   : > { %6249 = vpow2.f32 %v4979_v16 }
 0xf3a   : > { %v6248_v39 = vpop.eup %6247 }
 0xf3b   : > { %v3216_v36 = vadd.f32 1.0, %v6248_v39 }
 0xf3c   : > { %v6250_v50 = vpop.eup %6249 }
 0xf3d   : > { %6251 = vrcp.f32 %v3216_v36  ;;  %v3217_v42 = vadd.f32 1.0, %v6250_v50 }
 0xf3f   : > { %6253 = vrcp.f32 %v3217_v42  ;;  %v2874_v42 = vmax.f32 %v7065_v22, %v7158_v19 }
 0xf47   : > { %v6252_v28 = vpop.eup %6251 }
 0xf48   : > { %v3228_v3 = vmul.f32 %v6252_v28, %v3074_v9 }
 0xf49   : > { %v6254_v11 = vpop.eup %6253 }
 0xf4a   : > { %v3232_v57 = vmax.f32 %v2872_v5, %v3228_v3  ;;  %v3229_v27 = vmul.f32 %v6254_v11, %v3077_v7  ;;  %v2875_v3 = vmax.f32 %v7067_v40, %v7160_v20 }
 0xf4c   : > { %4982 = vst.msk [vmem:[%s6989_s25 + $0x10] sm:$0xff] %vm1223_vm4, %v3232_v57  ;;  %v3233_v58 = vmax.f32 %v2873_v44, %v3229_v27 }
 0xf4e   : > { %4983 = vst.msk [vmem:[%s6989_s25 + $0x18] sm:$0xff] %vm1223_vm4, %v3233_v58 }
 0xf99   : > { %v5595_v45 = vpop.f32.mrb[96].mxu1  ;;  %v5611_v21 = vpop.f32.mrb[104].mxu0 }
 0xf9a   : > { %v3081_v43 = vpop.f32.mrb[97].mxu1  ;;  %v3179_v23 = vpop.f32.mrb[105].mxu0 }
 0xf9b   : > { %v5596_v46 = vpop.f32.mrb[98].mxu1  ;;  %v5612_v15 = vpop.f32.mrb[106].mxu0 }
 0xf9c   : > { %v3083_v14 = vpop.f32.mrb[99].mxu1  ;;  %v3181_v48 = vpop.f32.mrb[107].mxu0  ;;  %v7312_v46 = vld [vmem:[%s6692_s16 + $0x2] ss:$0 sm:$0xff] }
 0xfa9   : > { %v5599_v51 = vpop.f32.mrb[100].mxu1  ;;  %v5615_v55 = vpop.f32.mrb[108].mxu0 }
 0xfaa   : > { %v3093_v26 = vpop.f32.mrb[101].mxu1  ;;  %v3191_v62 = vpop.f32.mrb[109].mxu0 }
 0xfab   : > { %v3192_v33 = vadd.f32 %v4969_v52, %v3191_v62  ;;  %v5600_v4 = vpop.f32.mrb[102].mxu1  ;;  %v5616_v63 = vpop.f32.mrb[110].mxu0  ;;  %v3094_v38 = vadd.f32 %v7272_v2, %v3093_v26 }
 0xfac   : > { %v3096_v1 = vpop.f32.mrb[103].mxu1  ;;  %v3194_v29 = vpop.f32.mrb[111].mxu0 }
 0xfad   : > { %v4980_v10 = vmul.f32 -1.442695, %v3192_v33  ;;  %v3195_v60 = vadd.f32 %v4969_v52, %v3194_v29  ;;  %v3097_v28 = vadd.f32 %v7272_v2, %v3096_v1 }
 0xfaf   : > { %6255 = vpow2.f32 %v4980_v10  ;;  %v4981_v8 = vmul.f32 -1.442695, %v3195_v60 }
 0xfb1   : > { %6257 = vpow2.f32 %v4981_v8  ;;  %v3345_v12 = vpop.f32.mrb[104].mxu1 }
 0xfb2   : > { %v5625_v13 = vpop.f32.mrb[105].mxu1 }
 0xfb3   : > { %v3348_v32 = vpop.f32.mrb[106].mxu1 }
 0xfb4   : > { %v5967_v17 = vpack.i.bf16 %v3348_v32, %v3345_v12  ;;  %v3392_v54 = vpack.c.bf16 %v3348_v32, %v3345_v12  ;;  %v5626_v30 = vpop.f32.mrb[107].mxu1 }
 0xfb6   : > { %5968 = vrot.lane.b32.xlu1 %v5967_v17, %s7611_s12  ;;  %5637 = vmatprep.mubr.msk.bf16.mxu0 %vm799_vm1, %v3392_v54 }
 0xfb7   : > { %5651 = vmatprep.mubr.msk.bf16.mxu1 %vm799_vm1, %v3392_v54 }
 0xfb9   : > { %v6256_v41 = vpop.eup %6255  ;;  %v3353_v31 = vpop.f32.mrb[108].mxu1 }
 0xfba   : > { %v3218_v34 = vadd.f32 1.0, %v6256_v41  ;;  %v5629_v56 = vpop.f32.mrb[109].mxu1 }
 0xfbb   : > { %v6258_v52 = vpop.eup %6257  ;;  %v3356_v53 = vpop.f32.mrb[110].mxu1  ;;  %v7319_v56 = vld [vmem:[%s6699_s26 + $0x2] ss:$0 sm:$0xff] }
 0xfbc   : > { %6259 = vrcp.f32 %v3218_v34  ;;  %v3219_v59 = vadd.f32 1.0, %v6258_v52  ;;  %v5972_v61 = vpack.i.bf16 %v3356_v53, %v3353_v31  ;;  %v3393_v24 = vpack.c.bf16 %v3356_v53, %v3353_v31  ;;  %v5630_v25 = vpop.f32.mrb[111].mxu1 }
 0xfbe   : > { %6261 = vrcp.f32 %v3219_v59  ;;  %5973 = vrot.lane.b32.xlu0 %v5972_v61, %s7611_s12  ;;  %5638 = vmatmul.mubr.msk.bf16.vlgmr.msra.gmra.mrb[112].mxu0 %vm799_vm1, %v3393_v24 }
 0xfbf   : > { %5652 = vmatmul.mubr.msk.bf16.vlgmr.msra.gmra.mrb[116].mxu1 %vm799_vm1, %v3393_v24 }
 0xfc1   : > { %v3361_v16 = vpop.f32.mrb[112].mxu1 }
 0xfc2   : > { %v5633_v39 = vpop.f32.mrb[113].mxu1 }
 0xfc3   : > { %v3364_v49 = vpop.f32.mrb[114].mxu1 }
 0xfc4   : > { %v5977_v37 = vpack.i.bf16 %v3364_v49, %v3361_v16  ;;  %v3394_v36 = vpack.c.bf16 %v3364_v49, %v3361_v16  ;;  %v5634_v47 = vpop.f32.mrb[115].mxu1 }
 0xfc6   : > { %v6260_v50 = vpop.eup %6259  ;;  %5978 = vrot.lane.b32.xlu1 %v5977_v37, %s7611_s12  ;;  %5641 = vmatprep.mubr.msk.bf16.mxu0 %vm799_vm1, %v3394_v36 }
 0xfc7   : > { %v3230_v9 = vmul.f32 %v6260_v50, %v3094_v38  ;;  %5655 = vmatprep.mubr.msk.bf16.mxu1 %vm799_vm1, %v3394_v36 }
 0xfc8   : > { %v6262_v5 = vpop.eup %6261 }
 0xfc9   : > { %v3234_v7 = vmax.f32 %v2874_v42, %v3230_v9  ;;  %v3231_v11 = vmul.f32 %v6262_v5, %v3097_v28 }
 0xfcb   : > { %4984 = vst.msk [vmem:[%s6989_s25 + $0x40] sm:$0xff] %vm1223_vm4, %v3234_v7  ;;  %v3235_v44 = vmax.f32 %v2875_v3, %v3231_v11 }
 0xfcd   : > { %4985 = vst.msk [vmem:[%s6989_s25 + $0x48] sm:$0xff] %vm1223_vm4, %v3235_v44 }
0x1028   : > { %v5969_v57 = vpop.permute.xlu1 %5968 }
0x1029   : > { %v5971_v27 = vunpack.i.h.bf16 %v5969_v57  ;;  %v5970_v58 = vunpack.i.l.bf16 %v5969_v57 }
0x102b   : > { %v3395_v22 = vpack.c.bf16 %v5971_v27, %v5970_v58 }
0x102d   : > { %5642 = vmatmul.mubr.msk.bf16.gmra.mrb[116].mxu0 %vm799_vm1, %v3395_v22  ;;  %5656 = vmatmul.mubr.msk.bf16.gmra.mrb[120].mxu1 %vm799_vm1, %v3395_v22 }
0x1030   : > { %v5974_v19 = vpop.permute.xlu0 %5973 }
0x1031   : > { %v5976_v2 = vunpack.i.h.bf16 %v5974_v19  ;;  %v5975_v45 = vunpack.i.l.bf16 %v5974_v19 }
0x1033   : > { %v3396_v40 = vpack.c.bf16 %v5976_v2, %v5975_v45 }
0x1035   : > { %5645 = vmatprep.mubr.msk.bf16.mxu0 %vm799_vm1, %v3396_v40  ;;  %5659 = vmatprep.mubr.msk.bf16.mxu1 %vm799_vm1, %v3396_v40 }
0x1038   : > { %v5979_v20 = vpop.permute.xlu1 %5978 }
0x1039   : > { %v5981_v21 = vunpack.i.h.bf16 %v5979_v20  ;;  %v5980_v43 = vunpack.i.l.bf16 %v5979_v20 }
0x103b   : > { %v3397_v23 = vpack.c.bf16 %v5981_v21, %v5980_v43 }
0x103d   : > { %5646 = vmatmul.mubr.msk.bf16.gmra.mrb[120].mxu0 %vm799_vm1, %v3397_v23  ;;  %5660 = vmatmul.mubr.msk.bf16.gmra.mrb[124].mxu1 %vm799_vm1, %v3397_v23 }
0x103e   : > { %5669 = vmatprep.mubr.msk.bf16.mxu0 %vm6419_vm0, %v6417_v0 }
0x1091   : > { %v5639_v15 = vpop.f32.mrb[112].mxu0 }
0x1092   : > { %v5653_v14 = vpop.f32.mrb[116].mxu1  ;;  %v3463_v48 = vpop.f32.mrb[113].mxu0  ;;  %v3472_v52 = vadd.f32 %v5639_v15, %v7319_v56 }
0x1093   : > { %v3566_v51 = vadd.f32 %v5653_v14, %v7312_v46  ;;  %v3557_v55 = vpop.f32.mrb[117].mxu1  ;;  %v5640_v26 = vpop.f32.mrb[114].mxu0  ;;  %v3464_v59 = vadd.f32 %v7319_v56, %v3463_v48 }
0x1094   : > { %v3558_v62 = vadd.f32 %v7312_v46, %v3557_v55  ;;  %v5654_v33 = vpop.f32.mrb[118].mxu1  ;;  %v3466_v4 = vpop.f32.mrb[115].mxu0  ;;  %v3475_v24 = vadd.f32 %v5640_v26, %v7319_v56 }
0x1095   : > { %v5030_v63 = vmul.f32 -1.442695, %v3566_v51  ;;  %v3569_v1 = vadd.f32 %v5654_v33, %v7312_v46  ;;  %v3560_v29 = vpop.f32.mrb[119].mxu1  ;;  %v3467_v39 = vadd.f32 %v7319_v56, %v3466_v4 }
0x1096   : > { %v5028_v10 = vmul.f32 -1.442695, %v3558_v62  ;;  %v3561_v60 = vadd.f32 %v7312_v46, %v3560_v29 }
0x1097   : > { %6263 = vpow2.f32 %v5030_v63  ;;  %v5031_v8 = vmul.f32 -1.442695, %v3569_v1 }
0x1098   : > { %6265 = vpow2.f32 %v5028_v10  ;;  %v5029_v12 = vmul.f32 -1.442695, %v3561_v60 }
0x1099   : > { %6267 = vpow2.f32 %v5031_v8 }
0x109a   : > { %6269 = vpow2.f32 %v5029_v12 }
0x10a1   : > { %v6264_v13 = vpop.eup %6263 }
0x10a2   : > { %v6266_v32 = vpop.eup %6265  ;;  %v3642_v17 = vadd.f32 1.0, %v6264_v13 }
0x10a3   : > { %v6268_v54 = vpop.eup %6267  ;;  %v3640_v30 = vadd.f32 1.0, %v6266_v32 }
0x10a4   : > { %v6270_v41 = vpop.eup %6269  ;;  %6271 = vrcp.f32 %v3642_v17  ;;  %v3643_v31 = vadd.f32 1.0, %v6268_v54 }
0x10a5   : > { %6273 = vrcp.f32 %v3640_v30  ;;  %v3641_v34 = vadd.f32 1.0, %v6270_v41 }
0x10a6   : > { %6275 = vrcp.f32 %v3643_v31 }
0x10a7   : > { %6277 = vrcp.f32 %v3641_v34 }
0x10ae   : > { %v6272_v53 = vpop.eup %6271 }
0x10af   : > { %v6274_v61 = vpop.eup %6273  ;;  %v7324_v25 = vmul.f32 %v6272_v53, %v3472_v52 }
0x10b0   : > { %v6276_v16 = vpop.eup %6275  ;;  %v7327_v49 = vmul.f32 %v6274_v61, %v3464_v59 }
0x10b1   : > { %v6278_v37 = vpop.eup %6277  ;;  %v7329_v36 = vmul.f32 %v6276_v16, %v3475_v24 }
0x10b2   : > { %v7331_v47 = vmul.f32 %v6278_v37, %v3467_v39 }
0x10b4   : > { %v3688_v38 = vpack.c.bf16 %v7331_v47, %v7327_v49  ;;  %v6031_v47 = vld [vmem:[%s6751_s3 + $0x20] sm:$0xff]  }
0x10b5   : > { %5681 = vmatprep.subr.bf16.mxu1 %v6031_v47 }
0x10b6   : > { %5682 = vmatpush3.bf16.msra.mxu1 %v6031_v47 }
0x1100   : > { %v5643_v50 = vpop.f32.mrb[116].mxu0  ;;  %v5657_v42 = vpop.f32.mrb[120].mxu1 }
0x1101   : > { %v3582_v9 = vadd.f32 %v5657_v42, %v7312_v46  ;;  %v3479_v28 = vpop.f32.mrb[117].mxu0  ;;  %v3573_v5 = vpop.f32.mrb[121].mxu1  ;;  %v3488_v54 = vadd.f32 %v5643_v50, %v7319_v56 }
0x1102   : > { %v3574_v3 = vadd.f32 %v7312_v46, %v3573_v5  ;;  %v5644_v7 = vpop.f32.mrb[118].mxu0  ;;  %v5658_v11 = vpop.f32.mrb[122].mxu1  ;;  %v3480_v41 = vadd.f32 %v7319_v56, %v3479_v28 }
0x1103   : > { %v5034_v44 = vmul.f32 -1.442695, %v3582_v9  ;;  %v3585_v57 = vadd.f32 %v5658_v11, %v7312_v46  ;;  %v3482_v27 = vpop.f32.mrb[119].mxu0  ;;  %v3576_v58 = vpop.f32.mrb[123].mxu1  ;;  %v3491_v34 = vadd.f32 %v5644_v7, %v7319_v56 }
0x1104   : > { %v5032_v22 = vmul.f32 -1.442695, %v3574_v3  ;;  %v3577_v19 = vadd.f32 %v7312_v46, %v3576_v58  ;;  %v3483_v59 = vadd.f32 %v7319_v56, %v3482_v27 }
0x1105   : > { %6279 = vpow2.f32 %v5034_v44  ;;  %v5035_v2 = vmul.f32 -1.442695, %v3585_v57 }
0x1106   : > { %6281 = vpow2.f32 %v5032_v22  ;;  %v5033_v45 = vmul.f32 -1.442695, %v3577_v19 }
0x1107   : > { %6283 = vpow2.f32 %v5035_v2 }
0x1108   : > { %6285 = vpow2.f32 %v5033_v45 }
0x110f   : > { %v6280_v40 = vpop.eup %6279 }
0x1110   : > { %v6282_v20 = vpop.eup %6281  ;;  %v3646_v21 = vadd.f32 1.0, %v6280_v40  ;;  %v5647_v43 = vpop.f32.mrb[120].mxu0 }
0x1111   : > { %v5661_v23 = vpop.f32.mrb[124].mxu1  ;;  %v6284_v15 = vpop.eup %6283  ;;  %v3644_v14 = vadd.f32 1.0, %v6282_v20  ;;  %v3504_v44 = vadd.f32 %v5647_v43, %v7319_v56 }
0x1112   : > { %v3598_v48 = vadd.f32 %v5661_v23, %v7312_v46  ;;  %v3495_v51 = vpop.f32.mrb[121].mxu0  ;;  %v3589_v55 = vpop.f32.mrb[125].mxu1  ;;  %6287 = vrcp.f32 %v3646_v21  ;;  %v3647_v62 = vadd.f32 1.0, %v6284_v15 }
0x1113   : > { %v6286_v26 = vpop.eup %6285  ;;  %v3590_v33 = vadd.f32 %v7312_v46, %v3589_v55  ;;  %v5648_v4 = vpop.f32.mrb[122].mxu0  ;;  %6289 = vrcp.f32 %v3644_v14  ;;  %v3496_v27 = vadd.f32 %v7319_v56, %v3495_v51 }
0x1114   : > { %v5662_v63 = vpop.f32.mrb[126].mxu1  ;;  %v3645_v1 = vadd.f32 1.0, %v6286_v26  ;;  %v5038_v29 = vmul.f32 -1.442695, %v3598_v48  ;;  %v3498_v10 = vpop.f32.mrb[123].mxu0  ;;  %6291 = vrcp.f32 %v3647_v62  ;;  %v3507_v22 = vadd.f32 %v5648_v4, %v7319_v56  ;;  %v6033_v62 = vld [vmem:[%s6751_s3 + $0x28] sm:$0xff]  }
0x1115   : > { %v3592_v60 = vpop.f32.mrb[127].mxu1  ;;  %v5036_v8 = vmul.f32 -1.442695, %v3590_v33  ;;  %v3601_v12 = vadd.f32 %v5662_v63, %v7312_v46  ;;  %v3499_v45 = vadd.f32 %v7319_v56, %v3498_v10  ;;  %v3689_v48 = vpack.c.bf16 %v7329_v36, %v7324_v25  ;;  %v6034_v33 = vld [vmem:[%s6759_s6 + $0x28] sm:$0xff]   ;;  %5683 = vmatprep.subr.bf16.mxu1 %v6033_v62  ;;  %s4487_s3 = scalar_lea.sflag [#allocation3], %s7612_s1 }
0x1116   : > { %6293 = vrcp.f32 %v3645_v1  ;;  %v3593_v13 = vadd.f32 %v7312_v46, %v3592_v60  ;;  %5684 = vmatpush3.bf16.msra.mxu1 %v6033_v62 }
0x1117   : > { %6295 = vpow2.f32 %v5038_v29  ;;  %v5039_v32 = vmul.f32 -1.442695, %v3601_v12  ;;  %5713 = vmatprep.subr.bf16.mxu1 %v6417_v0 }
0x1118   : > { %6297 = vpow2.f32 %v5036_v8  ;;  %v5037_v17 = vmul.f32 -1.442695, %v3593_v13 }
0x1119   : > { %6299 = vpow2.f32 %v5039_v32 }
0x111a   : > { %6301 = vpow2.f32 %v5037_v17 }
0x111c   : > { %v6288_v30 = vpop.eup %6287 }
0x111d   : > { %v6290_v31 = vpop.eup %6289  ;;  %v3682_v52 = vmul.f32 %v6288_v30, %v3488_v54 }
0x111e   : > { %v6292_v53 = vpop.eup %6291  ;;  %v3680_v61 = vmul.f32 %v6290_v31, %v3480_v41 }
0x111f   : > { %v3683_v24 = vmul.f32 %v6292_v53, %v3491_v34 }
0x1120   : > { %v6294_v46 = vpop.eup %6293 }
0x1121   : > { %v6296_v16 = vpop.eup %6295  ;;  %v3681_v39 = vmul.f32 %v6294_v46, %v3483_v59  ;;  %v3691_v9 = vpack.c.bf16 %v3683_v24, %v3682_v52 }
0x1122   : > { %v6298_v37 = vpop.eup %6297  ;;  %v3650_v42 = vadd.f32 1.0, %v6296_v16 }
0x1123   : > { %v6300_v5 = vpop.eup %6299  ;;  %v3648_v50 = vadd.f32 1.0, %v6298_v37  ;;  %v3690_v3 = vpack.c.bf16 %v3681_v39, %v3680_v61  ;;  %3697 = vrot.lane.b32.xlu0 %v3691_v9, %s7605_s4 }
0x1124   : > { %v6302_v11 = vpop.eup %6301  ;;  %6303 = vrcp.f32 %v3650_v42  ;;  %v3651_v28 = vadd.f32 1.0, %v6300_v5 }
0x1125   : > { %6305 = vrcp.f32 %v3648_v50  ;;  %v3649_v7 = vadd.f32 1.0, %v6302_v11  ;;  %v7403_v11 = vld [vmem:[%s6785_s17 + $0x2] ss:$0 sm:$0xff] }
0x1126   : > { %6307 = vrcp.f32 %v3651_v28 }
0x1127   : > { %6309 = vrcp.f32 %v3649_v7 }
0x112e   : > { %v6304_v57 = vpop.eup %6303 }
0x112f   : > { %v6306_v58 = vpop.eup %6305  ;;  %v3686_v19 = vmul.f32 %v6304_v57, %v3504_v44 }
0x1130   : > { %v6308_v2 = vpop.eup %6307  ;;  %v7352_v40 = vmul.f32 %v6306_v58, %v3496_v27 }
0x1131   : > { %v6310_v20 = vpop.eup %6309  ;;  %v3687_v21 = vmul.f32 %v6308_v2, %v3507_v22 }
0x1132   : > { %v7354_v23 = vmul.f32 %v6310_v20, %v3499_v45 }
0x1133   : > { %v3693_v15 = vpack.c.bf16 %v3687_v21, %v3686_v19 }
0x1134   : > { %v3692_v43 = vpack.c.bf16 %v7354_v23, %v7352_v40 }
0x1135   : > { %3701 = vrot.lane.b32.xlu0 %v3693_v15, %s7605_s4 }
0x1136   : > { %3699 = vrot.lane.b32.xlu1 %v3692_v43, %s7605_s4 }
0x1195   : > { %v3698_v14 = vpop.permute.xlu0 %3697 }
0x1196   : > { %v3705_v56 = vsel %vm1223_vm4, %v3688_v38, %v3698_v14  ;;  %v6032_v38 = vld [vmem:[%s6759_s6 + $0x20] sm:$0xff]  }
0x1197   : > { %5664 = vmatpush3.bf16.msra.mxu0 %v3705_v56 }
0x1198   : > { %5665 = vmatprep.subr.bf16.mxu0 %v6417_v0 }
0x11a7   : > { %v3702_v26 = vpop.permute.xlu0 %3701 }
0x11a8   : > { %v3700_v51 = vpop.permute.xlu1 %3699  ;;  %v3713_v49 = vsel %vm1223_vm4, %v3690_v3, %v3702_v26 }
0x11a9   : > { %v3709_v55 = vsel %vm1223_vm4, %v3689_v48, %v3700_v51 }
0x11aa   : > { %5666 = vmatpush3.bf16.msra.mxu0 %v3709_v55 }
0x11ab   : > { %5667 = vmatprep.subr.bf16.mxu0 %v6417_v0 }
0x11ae   : > { %5668 = vmatpush3.bf16.msra.mxu0 %v3713_v49 }
0x11af   : > { %5697 = vmatprep.subr.bf16.mxu0 %v6032_v38 }
0x11b1   : > { %5670 = vmatmul.mubr.msk.bf16.vlgmr.msra.gmra.mrb[124].mxu0 %vm824_vm2, %v7241_v18 }
0x11b2   : > { %5673 = vmatprep.mubr.msk.bf16.mxu0 %vm6419_vm0, %v6417_v0  ;;  %5698 = vmatpush3.bf16.msra.mxu0 %v6032_v38 }
0x11b3   : > { %5699 = vmatprep.subr.bf16.mxu0 %v6034_v33 }
0x11b6   : > { %5700 = vmatpush3.bf16.msra.mxu0 %v6034_v33  ;;  %v7410_v33 = vld [vmem:[%s6798_s0 + $0x2] ss:$0 sm:$0xff] }
0x11b9   : > { %5674 = vmatmul.mubr.msk.bf16.gmra.mrb[128].mxu0 %vm824_vm2, %v7250_v35 }
0x11ba   : > { %5677 = vmatprep.mubr.msk.bf16.mxu0 %vm6419_vm0, %v6417_v0 }
0x11c1   : > { %5678 = vmatmul.mubr.msk.bf16.gmra.mrb[132].mxu0 %vm824_vm2, %v7259_v6 }
0x1284   : > { %v3749_v4 = vpop.f32.mrb[124].mxu0 }
0x1285   : > { %v5671_v63 = vpop.f32.mrb[125].mxu0 }
0x1286   : > { %v3752_v1 = vpop.f32.mrb[126].mxu0 }
0x1287   : > { %v5982_v29 = vpack.i.bf16 %v3752_v1, %v3749_v4  ;;  %v3796_v10 = vpack.c.bf16 %v3752_v1, %v3749_v4  ;;  %v5672_v60 = vpop.f32.mrb[127].mxu0 }
0x1289   : > { %5983 = vrot.lane.b32.xlu1 %v5982_v29, %s7609_s9  ;;  %5685 = vmatprep.mubr.msk.bf16.mxu1 %vm1223_vm4, %v3796_v10 }
0x128a   : > { %5701 = vmatprep.mubr.msk.bf16.mxu0 %vm1223_vm4, %v3796_v10 }
0x128c   : > { %v3757_v8 = vpop.f32.mrb[128].mxu0 }
0x128d   : > { %v5675_v12 = vpop.f32.mrb[129].mxu0 }
0x128e   : > { %v3760_v13 = vpop.f32.mrb[130].mxu0 }
0x128f   : > { %v5987_v32 = vpack.i.bf16 %v3760_v13, %v3757_v8  ;;  %v3797_v17 = vpack.c.bf16 %v3760_v13, %v3757_v8  ;;  %v5676_v54 = vpop.f32.mrb[131].mxu0 }
0x1291   : > { %5988 = vrot.lane.b32.xlu0 %v5987_v32, %s7609_s9  ;;  %5686 = vmatmul.mubr.msk.bf16.vlgmr.msra.gmra.mrb[128].mxu1 %vm1223_vm4, %v3797_v17 }
0x1292   : > { %5702 = vmatmul.mubr.msk.bf16.vlgmr.msra.gmra.mrb[136].mxu0 %vm1223_vm4, %v3797_v17 }
0x1294   : > { %v3765_v30 = vpop.f32.mrb[132].mxu0 }
0x1295   : > { %v5679_v41 = vpop.f32.mrb[133].mxu0 }
0x1296   : > { %v3768_v31 = vpop.f32.mrb[134].mxu0 }
0x1297   : > { %v5992_v34 = vpack.i.bf16 %v3768_v31, %v3765_v30  ;;  %v3798_v52 = vpack.c.bf16 %v3768_v31, %v3765_v30  ;;  %v5680_v53 = vpop.f32.mrb[135].mxu0 }
0x1299   : > { %5993 = vrot.lane.b32.xlu1 %v5992_v34, %s7609_s9  ;;  %5689 = vmatprep.mubr.msk.bf16.mxu1 %vm1223_vm4, %v3798_v52 }
0x129a   : > { %5705 = vmatprep.mubr.msk.bf16.mxu0 %vm1223_vm4, %v3798_v52 }
0x12fb   : > { %v5984_v59 = vpop.permute.xlu1 %5983 }
0x12fc   : > { %v5986_v61 = vunpack.i.h.bf16 %v5984_v59  ;;  %v5985_v46 = vunpack.i.l.bf16 %v5984_v59 }
0x12fe   : > { %v3799_v24 = vpack.c.bf16 %v5986_v61, %v5985_v46 }
0x1300   : > { %5690 = vmatmul.mubr.msk.bf16.gmra.mrb[132].mxu1 %vm1223_vm4, %v3799_v24  ;;  %5706 = vmatmul.mubr.msk.bf16.gmra.mrb[140].mxu0 %vm1223_vm4, %v3799_v24 }
0x1303   : > { %v5989_v16 = vpop.permute.xlu0 %5988 }
0x1304   : > { %v5991_v39 = vunpack.i.h.bf16 %v5989_v16  ;;  %v5990_v37 = vunpack.i.l.bf16 %v5989_v16 }
0x1306   : > { %v3800_v42 = vpack.c.bf16 %v5991_v39, %v5990_v37 }
0x1308   : > { %5693 = vmatprep.mubr.msk.bf16.mxu1 %vm1223_vm4, %v3800_v42  ;;  %5709 = vmatprep.mubr.msk.bf16.mxu0 %vm1223_vm4, %v3800_v42 }
0x130b   : > { %v5994_v9 = vpop.permute.xlu1 %5993 }
0x130c   : > { %v5996_v5 = vunpack.i.h.bf16 %v5994_v9  ;;  %v5995_v50 = vunpack.i.l.bf16 %v5994_v9 }
0x130e   : > { %v3801_v3 = vpack.c.bf16 %v5996_v5, %v5995_v50 }
0x1310   : > { %5694 = vmatmul.mubr.msk.bf16.gmra.mrb[136].mxu1 %vm1223_vm4, %v3801_v3  ;;  %5710 = vmatmul.mubr.msk.bf16.gmra.mrb[144].mxu0 %vm1223_vm4, %v3801_v3 }
0x1311   : > { %5719 = vmatprep.mubr.msk.bf16.mxu1 %vm6419_vm0, %v6417_v0 }
0x1364   : > { %v5687_v28 = vpop.f32.mrb[128].mxu1 }
0x1365   : > { %v5703_v7 = vpop.f32.mrb[136].mxu0  ;;  %v3879_v44 = vpop.f32.mrb[129].mxu1  ;;  %v3888_v4 = vadd.f32 %v5687_v28, %v7410_v33 }
0x1366   : > { %v3994_v57 = vadd.f32 %v5703_v7, %v7403_v11  ;;  %v3985_v27 = vpop.f32.mrb[137].mxu0  ;;  %v5688_v58 = vpop.f32.mrb[130].mxu1  ;;  %v3880_v1 = vadd.f32 %v7410_v33, %v3879_v44 }
0x1367   : > { %v3986_v22 = vadd.f32 %v7403_v11, %v3985_v27  ;;  %v5704_v19 = vpop.f32.mrb[138].mxu0  ;;  %v3882_v2 = vpop.f32.mrb[131].mxu1  ;;  %v3891_v10 = vadd.f32 %v5688_v58, %v7410_v33 }
0x1368   : > { %v5073_v45 = vmul.f32 -1.442695, %v3994_v57  ;;  %v3997_v20 = vadd.f32 %v5704_v19, %v7403_v11  ;;  %v3988_v21 = vpop.f32.mrb[139].mxu0  ;;  %v3883_v12 = vadd.f32 %v7410_v33, %v3882_v2 }
0x1369   : > { %v5071_v15 = vmul.f32 -1.442695, %v3986_v22  ;;  %v3989_v43 = vadd.f32 %v7403_v11, %v3988_v21 }
0x136a   : > { %6311 = vpow2.f32 %v5073_v45  ;;  %v5074_v14 = vmul.f32 -1.442695, %v3997_v20 }
0x136b   : > { %6313 = vpow2.f32 %v5071_v15  ;;  %v5072_v56 = vmul.f32 -1.442695, %v3989_v43 }
0x136c   : > { %6315 = vpow2.f32 %v5074_v14 }
0x136d   : > { %6317 = vpow2.f32 %v5072_v56 }
0x1374   : > { %v6312_v48 = vpop.eup %6311 }
0x1375   : > { %v6314_v51 = vpop.eup %6313  ;;  %v4070_v55 = vadd.f32 1.0, %v6312_v48 }
0x1376   : > { %v6316_v26 = vpop.eup %6315  ;;  %v4068_v49 = vadd.f32 1.0, %v6314_v51 }
0x1377   : > { %v6318_v47 = vpop.eup %6317  ;;  %6319 = vrcp.f32 %v4070_v55  ;;  %v4071_v38 = vadd.f32 1.0, %v6316_v26 }
0x1378   : > { %6321 = vrcp.f32 %v4068_v49  ;;  %v4069_v62 = vadd.f32 1.0, %v6318_v47 }
0x1379   : > { %6323 = vrcp.f32 %v4071_v38 }
0x137a   : > { %6325 = vrcp.f32 %v4069_v62 }
0x1381   : > { %v6320_v63 = vpop.eup %6319 }
0x1382   : > { %v6322_v29 = vpop.eup %6321  ;;  %v7415_v60 = vmul.f32 %v6320_v63, %v3888_v4 }
0x1383   : > { %v6324_v8 = vpop.eup %6323  ;;  %v7418_v13 = vmul.f32 %v6322_v29, %v3880_v1 }
0x1384   : > { %v6326_v32 = vpop.eup %6325  ;;  %v7420_v17 = vmul.f32 %v6324_v8, %v3891_v10 }
0x1385   : > { %v7422_v54 = vmul.f32 %v6326_v32, %v3883_v12 }
0x1386   : > { %v4121_v30 = vpack.c.bf16 %v7420_v17, %v7415_v60 }
0x1387   : > { %v4120_v41 = vpack.c.bf16 %v7422_v54, %v7418_v13  ;;  %v6035_v54 = vld [vmem:[%s6875_s24 + $0x20] sm:$0xff]  }
0x13d3   : > { %v5691_v31 = vpop.f32.mrb[132].mxu1  ;;  %v5707_v34 = vpop.f32.mrb[140].mxu0 }
0x13d4   : > { %v4010_v52 = vadd.f32 %v5707_v34, %v7403_v11  ;;  %v3895_v53 = vpop.f32.mrb[133].mxu1  ;;  %v4001_v59 = vpop.f32.mrb[141].mxu0  ;;  %v3904_v4 = vadd.f32 %v5691_v31, %v7410_v33 }
0x13d5   : > { %v4002_v61 = vadd.f32 %v7403_v11, %v4001_v59  ;;  %v5692_v46 = vpop.f32.mrb[134].mxu1  ;;  %v5708_v24 = vpop.f32.mrb[142].mxu0  ;;  %v3896_v1 = vadd.f32 %v7410_v33, %v3895_v53 }
0x13d6   : > { %v5077_v16 = vmul.f32 -1.442695, %v4010_v52  ;;  %v4013_v39 = vadd.f32 %v5708_v24, %v7403_v11  ;;  %v3898_v37 = vpop.f32.mrb[135].mxu1  ;;  %v4004_v42 = vpop.f32.mrb[143].mxu0  ;;  %v3907_v10 = vadd.f32 %v5692_v46, %v7410_v33 }
0x13d7   : > { %v5075_v9 = vmul.f32 -1.442695, %v4002_v61  ;;  %v4005_v5 = vadd.f32 %v7403_v11, %v4004_v42  ;;  %v3899_v32 = vadd.f32 %v7410_v33, %v3898_v37 }
0x13d8   : > { %6327 = vpow2.f32 %v5077_v16  ;;  %v5078_v50 = vmul.f32 -1.442695, %v4013_v39 }
0x13d9   : > { %6329 = vpow2.f32 %v5075_v9  ;;  %v5076_v3 = vmul.f32 -1.442695, %v4005_v5 }
0x13da   : > { %6331 = vpow2.f32 %v5078_v50 }
0x13db   : > { %6333 = vpow2.f32 %v5076_v3 }
0x13e2   : > { %v6328_v28 = vpop.eup %6327 }
0x13e3   : > { %v6330_v7 = vpop.eup %6329  ;;  %v4074_v44 = vadd.f32 1.0, %v6328_v28  ;;  %v5695_v57 = vpop.f32.mrb[136].mxu1 }
0x13e4   : > { %v5711_v27 = vpop.f32.mrb[144].mxu0  ;;  %v6332_v58 = vpop.eup %6331  ;;  %v4072_v22 = vadd.f32 1.0, %v6330_v7  ;;  %v3920_v37 = vadd.f32 %v5695_v57, %v7410_v33 }
0x13e5   : > { %v4026_v19 = vadd.f32 %v5711_v27, %v7403_v11  ;;  %v3911_v2 = vpop.f32.mrb[137].mxu1  ;;  %v4017_v45 = vpop.f32.mrb[145].mxu0  ;;  %6335 = vrcp.f32 %v4074_v44  ;;  %v4075_v21 = vadd.f32 1.0, %v6332_v58 }
0x13e6   : > { %v6334_v20 = vpop.eup %6333  ;;  %v4018_v15 = vadd.f32 %v7403_v11, %v4017_v45  ;;  %v5696_v43 = vpop.f32.mrb[138].mxu1  ;;  %6337 = vrcp.f32 %v4072_v22  ;;  %v3912_v3 = vadd.f32 %v7410_v33, %v3911_v2 }
0x13e7   : > { %v5712_v14 = vpop.f32.mrb[146].mxu0  ;;  %v4073_v56 = vadd.f32 1.0, %v6334_v20  ;;  %v5081_v48 = vmul.f32 -1.442695, %v4026_v19  ;;  %v3914_v51 = vpop.f32.mrb[139].mxu1  ;;  %6339 = vrcp.f32 %v4075_v21  ;;  %v3923_v7 = vadd.f32 %v5696_v43, %v7410_v33 }
0x13e8   : > { %v4020_v55 = vpop.f32.mrb[147].mxu0  ;;  %v5079_v26 = vmul.f32 -1.442695, %v4018_v15  ;;  %v4029_v49 = vadd.f32 %v5712_v14, %v7403_v11  ;;  %v3915_v58 = vadd.f32 %v7410_v33, %v3914_v51 }
0x13e9   : > { %6341 = vrcp.f32 %v4073_v56  ;;  %v4021_v47 = vadd.f32 %v7403_v11, %v4020_v55 }
0x13ea   : > { %6343 = vpow2.f32 %v5081_v48  ;;  %v5082_v38 = vmul.f32 -1.442695, %v4029_v49 }
0x13eb   : > { %6345 = vpow2.f32 %v5079_v26  ;;  %v5080_v62 = vmul.f32 -1.442695, %v4021_v47 }
0x13ec   : > { %6347 = vpow2.f32 %v5082_v38 }
0x13ed   : > { %6349 = vpow2.f32 %v5080_v62 }
0x13ef   : > { %v6336_v63 = vpop.eup %6335 }
0x13f0   : > { %v6338_v29 = vpop.eup %6337  ;;  %v4110_v8 = vmul.f32 %v6336_v63, %v3904_v4 }
0x13f1   : > { %v6340_v12 = vpop.eup %6339  ;;  %v4108_v34 = vmul.f32 %v6338_v29, %v3896_v1 }
0x13f2   : > { %v4111_v52 = vmul.f32 %v6340_v12, %v3907_v10 }
0x13f3   : > { %v6342_v11 = vpop.eup %6341 }
0x13f4   : > { %v6344_v59 = vpop.eup %6343  ;;  %v4109_v61 = vmul.f32 %v6342_v11, %v3899_v32  ;;  %v4123_v39 = vpack.c.bf16 %v4111_v52, %v4110_v8 }
0x13f5   : > { %v6346_v24 = vpop.eup %6345  ;;  %v4078_v16 = vadd.f32 1.0, %v6344_v59 }
0x13f6   : > { %v6348_v42 = vpop.eup %6347  ;;  %v4076_v31 = vadd.f32 1.0, %v6346_v24  ;;  %v4122_v9 = vpack.c.bf16 %v4109_v61, %v4108_v34  ;;  %4129 = vrot.lane.b32.xlu0 %v4123_v39, %s7605_s4 }
0x13f7   : > { %v6350_v5 = vpop.eup %6349  ;;  %6351 = vrcp.f32 %v4078_v16  ;;  %v4079_v53 = vadd.f32 1.0, %v6348_v42 }
0x13f8   : > { %6353 = vrcp.f32 %v4076_v31  ;;  %v4077_v46 = vadd.f32 1.0, %v6350_v5 }
0x13f9   : > { %6355 = vrcp.f32 %v4079_v53 }
0x13fa   : > { %6357 = vrcp.f32 %v4077_v46 }
0x1401   : > { %v6352_v50 = vpop.eup %6351 }
0x1402   : > { %v6354_v28 = vpop.eup %6353  ;;  %v4114_v44 = vmul.f32 %v6352_v50, %v3920_v37 }
0x1403   : > { %v6356_v27 = vpop.eup %6355  ;;  %v7445_v22 = vmul.f32 %v6354_v28, %v3912_v3 }
0x1404   : > { %v6358_v19 = vpop.eup %6357  ;;  %v4115_v45 = vmul.f32 %v6356_v27, %v3923_v7 }
0x1405   : > { %v7447_v20 = vmul.f32 %v6358_v19, %v3915_v58 }
0x1406   : > { %v4125_v21 = vpack.c.bf16 %v4115_v45, %v4114_v44 }
0x1407   : > { %v4124_v57 = vpack.c.bf16 %v7447_v20, %v7445_v22 }
0x1408   : > { %4133 = vrot.lane.b32.xlu0 %v4125_v21, %s7605_s4 }
0x1409   : > { %4131 = vrot.lane.b32.xlu1 %v4124_v57, %s7605_s4 }
0x1468   : > { %v4130_v2 = vpop.permute.xlu0 %4129 }
0x1469   : > { %v4137_v33 = vsel %vm1223_vm4, %v4120_v41, %v4130_v2  ;;  %v6037_v41 = vld [vmem:[%s6875_s24 + $0x28] sm:$0xff]  }
0x146a   : > { %5714 = vmatpush3.bf16.msra.mxu1 %v4137_v33  ;;  %v5091_v33 = vld [vmem:[%s6976_s10 + $0x2] ss:$0 sm:$0xff] }
0x146b   : > { %5715 = vmatprep.subr.bf16.mxu1 %v6417_v0 }
0x147a   : > { %v4134_v14 = vpop.permute.xlu0 %4133 }
0x147b   : > { %v4132_v15 = vpop.permute.xlu1 %4131  ;;  %v4145_v13 = vsel %vm1223_vm4, %v4122_v9, %v4134_v14  ;;  %v5105_v9 = vld [vmem:[%s6958_s11 + $0x2] ss:$0 sm:$0xff]  ;;  %v4116_v14 = vmax.f32 %v7324_v25, %v7415_v60 }
0x147c   : > { %v4141_v43 = vsel %vm1223_vm4, %v4121_v30, %v4132_v15  ;;  %v6036_v30 = vld [vmem:[%s6869_s8 + $0x20] sm:$0xff]  }
0x147d   : > { %5716 = vmatpush3.bf16.msra.mxu1 %v4141_v43  ;;  %5731 = vmatprep.subr.bf16.mxu0 %v6036_v30 }
0x147e   : > { %5717 = vmatprep.subr.bf16.mxu1 %v6417_v0  ;;  %5732 = vmatpush3.bf16.msra.mxu0 %v6036_v30 }
0x1481   : > { %5718 = vmatpush3.bf16.msra.mxu1 %v4145_v13 }
0x1482   : > { %5747 = vmatprep.subr.bf16.mxu1 %v6035_v54 }
0x1484   : > { %5720 = vmatmul.mubr.msk.bf16.vlgmr.msra.gmra.mrb[140].mxu1 %vm824_vm2, %v7241_v18  ;;  %v6038_v18 = vld [vmem:[%s6869_s8 + $0x28] sm:$0xff]  }
0x1485   : > { %5723 = vmatprep.mubr.msk.bf16.mxu1 %vm6419_vm0, %v6417_v0  ;;  %5748 = vmatpush3.bf16.msra.mxu1 %v6035_v54 }
0x1486   : > { %5749 = vmatprep.subr.bf16.mxu1 %v6037_v41  ;;  %5733 = vmatprep.subr.bf16.mxu0 %v6038_v18 }
0x1487   : > { %5734 = vmatpush3.bf16.msra.mxu0 %v6038_v18  ;;  %v4117_v18 = vmax.f32 %v7329_v36, %v7420_v17 }
0x1489   : > { %5750 = vmatpush3.bf16.msra.mxu1 %v6037_v41 }
0x148c   : > { %5724 = vmatmul.mubr.msk.bf16.gmra.mrb[144].mxu1 %vm824_vm2, %v7250_v35 }
0x148d   : > { %5727 = vmatprep.mubr.msk.bf16.mxu1 %vm6419_vm0, %v6417_v0 }
0x1494   : > { %5728 = vmatmul.mubr.msk.bf16.gmra.mrb[148].mxu1 %vm824_vm2, %v7259_v6 }
0x1557   : > { %v4181_v56 = vpop.f32.mrb[140].mxu1 }
0x1558   : > { %v5721_v35 = vpop.f32.mrb[141].mxu1 }
0x1559   : > { %v4184_v48 = vpop.f32.mrb[142].mxu1 }
0x155a   : > { %v5997_v51 = vpack.i.bf16 %v4184_v48, %v4181_v56  ;;  %v4228_v0 = vpack.c.bf16 %v4184_v48, %v4181_v56  ;;  %v5722_v55 = vpop.f32.mrb[143].mxu1 }
0x155c   : > { %5998 = vrot.lane.b32.xlu1 %v5997_v51, %s7609_s9  ;;  %5735 = vmatprep.mubr.msk.bf16.mxu0 %vm1223_vm4, %v4228_v0 }
0x155d   : > { %5751 = vmatprep.mubr.msk.bf16.mxu1 %vm1223_vm4, %v4228_v0 }
0x155f   : > { %v4189_v6 = vpop.f32.mrb[144].mxu1 }
0x1560   : > { %v5725_v26 = vpop.f32.mrb[145].mxu1 }
0x1561   : > { %v4192_v49 = vpop.f32.mrb[146].mxu1 }
0x1562   : > { %v6002_v47 = vpack.i.bf16 %v4192_v49, %v4189_v6  ;;  %v4229_v38 = vpack.c.bf16 %v4192_v49, %v4189_v6  ;;  %v5726_v62 = vpop.f32.mrb[147].mxu1 }
0x1564   : > { %5752 = vmatmul.mubr.msk.bf16.vlgmr.msra.gmra.mrb[152].mxu1 %vm1223_vm4, %v4229_v38  ;;  %5736 = vmatmul.mubr.msk.bf16.vlgmr.msra.gmra.mrb[148].mxu0 %vm1223_vm4, %v4229_v38 }
0x1565   : > { %6003 = vrot.lane.b32.xlu0 %v6002_v47, %s7609_s9 }
0x1567   : > { %v4197_v4 = vpop.f32.mrb[148].mxu1 }
0x1568   : > { %v5729_v63 = vpop.f32.mrb[149].mxu1 }
0x1569   : > { %v4200_v1 = vpop.f32.mrb[150].mxu1 }
0x156a   : > { %v6007_v29 = vpack.i.bf16 %v4200_v1, %v4197_v4  ;;  %v4230_v10 = vpack.c.bf16 %v4200_v1, %v4197_v4  ;;  %v5730_v8 = vpop.f32.mrb[151].mxu1 }
0x156c   : > { %6008 = vrot.lane.b32.xlu1 %v6007_v29, %s7609_s9  ;;  %5739 = vmatprep.mubr.msk.bf16.mxu0 %vm1223_vm4, %v4230_v10 }
0x156d   : > { %5755 = vmatprep.mubr.msk.bf16.mxu1 %vm1223_vm4, %v4230_v10 }
0x15ce   : > { %v5999_v12 = vpop.permute.xlu1 %5998 }
0x15cf   : > { %v6001_v32 = vunpack.i.h.bf16 %v5999_v12  ;;  %v6000_v34 = vunpack.i.l.bf16 %v5999_v12 }
0x15d1   : > { %v4231_v11 = vpack.c.bf16 %v6001_v32, %v6000_v34 }
0x15d3   : > { %5740 = vmatmul.mubr.msk.bf16.gmra.mrb[152].mxu0 %vm1223_vm4, %v4231_v11  ;;  %5756 = vmatmul.mubr.msk.bf16.gmra.mrb[156].mxu1 %vm1223_vm4, %v4231_v11 }
0x15d7   : > { %v6004_v52 = vpop.permute.xlu0 %6003 }
0x15d8   : > { %v6006_v59 = vunpack.i.h.bf16 %v6004_v52  ;;  %v6005_v61 = vunpack.i.l.bf16 %v6004_v52 }
0x15da   : > { %v4232_v24 = vpack.c.bf16 %v6006_v59, %v6005_v61  ;;  %v4118_v61 = vmax.f32 %v7352_v40, %v7445_v22 }
0x15dc   : > { %5743 = vmatprep.mubr.msk.bf16.mxu0 %vm1223_vm4, %v4232_v24  ;;  %5759 = vmatprep.mubr.msk.bf16.mxu1 %vm1223_vm4, %v4232_v24 }
0x15de   : > { %v6009_v16 = vpop.permute.xlu1 %6008 }
0x15df   : > { %v6011_v39 = vunpack.i.h.bf16 %v6009_v16  ;;  %v6010_v42 = vunpack.i.l.bf16 %v6009_v16 }
0x15e1   : > { %v4233_v31 = vpack.c.bf16 %v6011_v39, %v6010_v42 }
0x15e3   : > { %5760 = vmatmul.mubr.msk.bf16.gmra.mrb[160].mxu1 %vm1223_vm4, %v4233_v31  ;;  %5744 = vmatmul.mubr.msk.bf16.gmra.mrb[156].mxu0 %vm1223_vm4, %v4233_v31  ;;  %v4119_v31 = vmax.f32 %v7354_v23, %v7447_v20 }
0x1637   : > { %v5753_v5 = vpop.f32.mrb[152].mxu1  ;;  %v5737_v53 = vpop.f32.mrb[148].mxu0 }
0x1638   : > { %v4416_v46 = vadd.f32 %v5753_v5, %v5105_v9  ;;  %v4409_v37 = vpop.f32.mrb[153].mxu1  ;;  %v4311_v50 = vpop.f32.mrb[149].mxu0  ;;  %v4318_v15 = vadd.f32 %v5737_v53, %v5091_v33 }
0x1639   : > { %v5754_v3 = vpop.f32.mrb[154].mxu1  ;;  %v5738_v28 = vpop.f32.mrb[150].mxu0 }
0x163a   : > { %v5114_v7 = vmul.f32 -1.442695, %v4416_v46  ;;  %v4419_v44 = vadd.f32 %v5754_v3, %v5105_v9  ;;  %v4313_v27 = vpop.f32.mrb[151].mxu0  ;;  %v4411_v58 = vpop.f32.mrb[155].mxu1  ;;  %v4321_v54 = vadd.f32 %v5738_v28, %v5091_v33 }
0x163c   : > { %6359 = vpow2.f32 %v5114_v7  ;;  %v5115_v19 = vmul.f32 -1.442695, %v4419_v44 }
0x163e   : > { %6361 = vpow2.f32 %v5115_v19 }
0x1646   : > { %v6360_v45 = vpop.eup %6359 }
0x1647   : > { %v4460_v21 = vadd.f32 1.0, %v6360_v45 }
0x1648   : > { %v6362_v57 = vpop.eup %6361 }
0x1649   : > { %6363 = vrcp.f32 %v4460_v21  ;;  %v4461_v2 = vadd.f32 1.0, %v6362_v57 }
0x164b   : > { %6365 = vrcp.f32 %v4461_v2 }
0x1653   : > { %v6364_v43 = vpop.eup %6363 }
0x1654   : > { %v4472_v13 = vmul.f32 %v6364_v43, %v4318_v15 }
0x1655   : > { %v6366_v30 = vpop.eup %6365 }
0x1656   : > { %v4476_v41 = vmax.f32 %v4116_v14, %v4472_v13  ;;  %v4473_v56 = vmul.f32 %v6366_v30, %v4321_v54 }
0x1658   : > { %5118 = vst.msk [vmem:[%s6989_s25 + $0x20] sm:$0xff] %vm1223_vm4, %v4476_v41  ;;  %v4477_v35 = vmax.f32 %v4117_v18, %v4473_v56 }
0x165a   : > { %5119 = vst.msk [vmem:[%s6989_s25 + $0x28] sm:$0xff] %vm1223_vm4, %v4477_v35 }
0x16a6   : > { %v5741_v48 = vpop.f32.mrb[152].mxu0  ;;  %v5757_v51 = vpop.f32.mrb[156].mxu1 }
0x16a7   : > { %v4325_v0 = vpop.f32.mrb[153].mxu0  ;;  %v4423_v55 = vpop.f32.mrb[157].mxu1 }
0x16a8   : > { %v5742_v6 = vpop.f32.mrb[154].mxu0  ;;  %v5758_v26 = vpop.f32.mrb[158].mxu1 }
0x16a9   : > { %v4327_v25 = vpop.f32.mrb[155].mxu0  ;;  %v4425_v60 = vpop.f32.mrb[159].mxu1 }
0x16b6   : > { %v5761_v49 = vpop.f32.mrb[160].mxu1  ;;  %v5745_v47 = vpop.f32.mrb[156].mxu0 }
0x16b7   : > { %v4435_v38 = vpop.f32.mrb[161].mxu1  ;;  %v4337_v62 = vpop.f32.mrb[157].mxu0 }
0x16b8   : > { %v4436_v4 = vadd.f32 %v5105_v9, %v4435_v38  ;;  %v5762_v36 = vpop.f32.mrb[162].mxu1  ;;  %v5746_v17 = vpop.f32.mrb[158].mxu0  ;;  %v4338_v52 = vadd.f32 %v5091_v33, %v4337_v62 }
0x16b9   : > { %v4438_v63 = vpop.f32.mrb[163].mxu1  ;;  %v4340_v1 = vpop.f32.mrb[159].mxu0 }
0x16ba   : > { %v5116_v29 = vmul.f32 -1.442695, %v4436_v4  ;;  %v4439_v10 = vadd.f32 %v5105_v9, %v4438_v63  ;;  %v4341_v16 = vadd.f32 %v5091_v33, %v4340_v1 }
0x16bc   : > { %6367 = vpow2.f32 %v5116_v29  ;;  %v5117_v8 = vmul.f32 -1.442695, %v4439_v10 }
0x16be   : > { %6369 = vpow2.f32 %v5117_v8 }
0x16c6   : > { %v6368_v12 = vpop.eup %6367 }
0x16c7   : > { %v4462_v32 = vadd.f32 1.0, %v6368_v12 }
0x16c8   : > { %v6370_v34 = vpop.eup %6369 }
0x16c9   : > { %6371 = vrcp.f32 %v4462_v32  ;;  %v4463_v11 = vadd.f32 1.0, %v6370_v34 }
0x16cb   : > { %6373 = vrcp.f32 %v4463_v11 }
0x16d3   : > { %v6372_v59 = vpop.eup %6371 }
0x16d4   : > { %v4474_v24 = vmul.f32 %v6372_v59, %v4338_v52 }
0x16d5   : > { %v6374_v39 = vpop.eup %6373 }
0x16d6   : > { %v4478_v42 = vmax.f32 %v4118_v61, %v4474_v24  ;;  %v4475_v9 = vmul.f32 %v6374_v39, %v4341_v16 }
0x16d8   : > { %5120 = vst.msk [vmem:[%s6989_s25 + $0x50] sm:$0xff] %vm1223_vm4, %v4478_v42  ;;  %v4479_v5 = vmax.f32 %v4119_v31, %v4475_v9 }
0x16da   : > { %5121 = vst.msk [vmem:[%s6989_s25 + $0x58] sm:$0xff] %vm1223_vm4, %v4479_v5 }
0x16db   : > { %s5132_s6 = smul.u32 768, %s6531_s22  ;;  %s4517_s8 = sshll.u32 %s6989_s25, 4  ;;  %s4518_s8 = int_to_ptr.vmem [resolvable:$true] %s4517_s8 }
0x16dc   : > { %s6423_s26 = smov 768   ;;  %s6424_s0 = smov 1536  }
0x16dd   : > { %s4500_s16 = scalar_lea.hbm %s7564_s15, %s5132_s6  ;;  %5774 = sst [smem:[#allocation5]] (%p6548_p5), %s6423_s26 }
0x16de   : > { %5775 = sst [smem:[#allocation5 + $0x1]] (%p6548_p5), %s6424_s0  ;;  %s6425_s17 = smov 6  }
0x16df   : > { %5776 = sst [smem:[#allocation5 + $0x2]] (%p6548_p5), %s6425_s17  ;;  %s6426_s4 = smov 128  }
0x16e0   : > { %5777 = sst [smem:[#allocation5 + $0x3]] (%p6548_p5), %s6426_s4  ;;  %s6427_s22 = smov 8  }
0x16e1   : > { %5778 = sst [smem:[#allocation5 + $0x4]] (%p6548_p5), %s6426_s4  ;;  %s6428_s9 = smov [#allocation4]  }
0x16e2   : > { %5779 = sst [smem:[#allocation5 + $0x5]] (%p6548_p5), %s6427_s22  ;;  %s6429_s11 = smov 0  }
0x16e3   : > { %5780 = dma.general (%p6548_p5), %s4518_s8, 1536, %s4500_s16, %s4487_s3, %s6428_s9, [#allocation5], %s6429_s11, 0  }
0x16e4 PF: > { %p5786_p11 = scmp.ge.s32.totalorder %s6415_s21, 2  ;;  %s4545_s25 = sand.u32 1, %s6403_s18  }
0x16e5   : > { %s4546_s12 = scalar_lea.sflag [#allocation3], %s4545_s25 }
0x16e6   : > { %p5783_p12 = pnand %p5786_p11, %p6552_p6 }
0x16e8   : > { %6398 = dma.done.wait (!%p5783_p12), %s4546_s12, 1536  }
0x16e9   : > { %6400 = vsyncadd (!%p5783_p12), %s4546_s12, 4294965760  ;;  %s7614_s21 = sld [smem:[#allocation8_spill]]  ;;  %s7615_s27 = sld [smem:[#allocation7_spill]] }
0x16ea   : > { %s7616_s20 = sld [smem:[#allocation9_spill]]  ;;  %s7617_s18 = smov %s6407_s19 }
0x16ef   : > { %p25_p13 = scmp.ge.s32.totalorder %s7614_s21, 4   ;;  %s7618_s19 = smov %s7615_s27 }
0x16f1   :  { %27 = sbr.rel (!%p25_p13) target bundleno = 16 (0x10), region = 191 }
0x16f8   :  { %4551 = vsyncpa [#allocation3], 1 }
0x16f9   :  { %4553 = vsyncpa [#allocation3 + $0x1], 1 }

</bundles_post_ra>
